<compile_context>
chip_gen: v5e
topology: v5e:2x2
jax: 0.10.0
libtpu: 0.0.40
codegen_flags: <defaults>
</compile_context>

<pallas_src>
import functools
import math

import jax
import jax.numpy as jnp
import numpy as np
from jax.experimental import pallas as pl
from jax.experimental.pallas import tpu as pltpu

EPS = 1e-5  # nn.GroupNorm default


def attn_block_kernel(x_ref, mgc_ref, mcg_ref, wqkv_ref, bqkv_ref,
                      wproj_ref, bproj_ref, o_ref, *, num_heads):
    C, T = x_ref.shape[1], x_ref.shape[2]
    G = mgc_ref.shape[0]
    per = C // G
    ch = C // num_heads

    x = x_ref[0]                                                   # (C, T) f32, native layout

    # ---- GroupNorm(G, C): two-pass stats, per-channel apply ------------------
    # Group reductions via tiny membership matmuls (no lane<->sublane reshapes).
    inv_cnt = 1.0 / float(T * per)
    chan_sum = jnp.sum(x, axis=1, keepdims=True)                   # (C, 1) lane reduce
    mean_g = jnp.dot(mgc_ref[...], chan_sum,
                     preferred_element_type=jnp.float32) * inv_cnt  # (G, 1)
    mean_c = jnp.dot(mcg_ref[...], mean_g,
                     preferred_element_type=jnp.float32)            # (C, 1)
    xc = x - mean_c                                                 # centered (two-pass: robust)
    chan_sq = jnp.sum(xc * xc, axis=1, keepdims=True)               # (C, 1)
    var_g = jnp.dot(mgc_ref[...], chan_sq,
                    preferred_element_type=jnp.float32) * inv_cnt   # (G, 1)
    inv_g = jax.lax.rsqrt(var_g + EPS)
    inv_c = jnp.dot(mcg_ref[...], inv_g,
                    preferred_element_type=jnp.float32)             # (C, 1)
    # gamma/beta are folded into wqkv/bqkv at prep time -> single VALU op here.
    xn = xc * inv_c                                                 # (C, T)

    # ---- qkv = Conv1d(C, 3C, 1): one (3C,C)@(C,T) bf16 MXU matmul, f32 acc ---
    qkv = jnp.dot(wqkv_ref[...], xn.astype(jnp.bfloat16),
                  preferred_element_type=jnp.float32) + bqkv_ref[...]  # (3C, T)

    # ---- QKVAttention per head (att_scale folded into W/b at prep time) ------
    h_acc = None
    for h in range(num_heads):                      # static unroll
        base = h * 3 * ch
        q = qkv[base:base + ch].astype(jnp.bfloat16)                # (ch, T)
        k = qkv[base + ch:base + 2 * ch].astype(jnp.bfloat16)       # (ch, T)
        v = qkv[base + 2 * ch:base + 3 * ch].astype(jnp.bfloat16)   # (ch, T)
        # logits with key index s on sublanes, query index t on lanes:
        # s2[s, t] = sum_c k[c,s] q[c,t]  -> softmax stats come out lane-dense.
        s2 = jnp.einsum('cs,ct->st', k, q,
                        preferred_element_type=jnp.float32)         # (T, T) f32
        m = jnp.max(s2, axis=0, keepdims=True)                      # (1, T)
        p = jnp.exp(s2 - m)                                         # unnormalized probs
        l = jnp.sum(p, axis=0, keepdims=True)                       # (1, T)
        # PV first (plain NN matmul), normalize the small (ch,T) output after.
        o = jnp.dot(v, p.astype(jnp.bfloat16),
                    preferred_element_type=jnp.float32)             # (ch, T)
        a = o * pl.reciprocal(l, approx=True)                       # EUP reciprocal
        # proj_out accumulated per head: no concat, no live per-head outputs.
        contrib = jnp.dot(wproj_ref[:, h * ch:(h + 1) * ch],
                          a.astype(jnp.bfloat16),
                          preferred_element_type=jnp.float32)       # (C, T)
        h_acc = contrib if h_acc is None else h_acc + contrib

    # ---- residual (f32, matches module output dtype) --------------------------
    o_ref[0] = (x + h_acc + bproj_ref[...]).astype(o_ref.dtype)


def _group_membership(C, G):
    per = C // G
    m = np.zeros((G, C), np.float32)
    for c in range(C):
        m[c // per, c] = 1.0
    return m


def prepare_params(params, channels, num_heads=1, num_groups=32):
    """One-time constant folding (host-side, outside jit):
       * GroupNorm gamma/beta folded into the qkv conv:  W' = W*gamma, b' = W@beta + b
       * attention scale ch**-0.25 folded into the q/k rows of W' and b'
       * MXU operands cast to bf16 (f32 accumulation happens in the kernel)."""
    C = channels
    ch = C // num_heads
    att_scale = ch ** -0.25
    gamma = np.asarray(params["gn_g"], np.float32)            # (C,)
    beta = np.asarray(params["gn_b"], np.float32)              # (C,)
    w_qkv = np.asarray(params["qkv_w"], np.float32)            # (3C, C)  torch Conv1d weight
    b_qkv = np.asarray(params["qkv_b"], np.float32)            # (3C,)

    w = w_qkv * gamma[None, :]
    b = b_qkv + w_qkv @ beta
    row_scale = np.ones(3 * C, np.float32)
    for h in range(num_heads):
        row_scale[h * 3 * ch: h * 3 * ch + 2 * ch] = att_scale  # q and k rows
    w = w * row_scale[:, None]
    b = b * row_scale

    return {
        "wqkv": jnp.asarray(w, jnp.bfloat16),                                   # (3C, C)
        "bqkv": jnp.asarray(b.reshape(3 * C, 1), jnp.float32),                  # (3C, 1)
        "wproj": jnp.asarray(np.asarray(params["proj_w"], np.float32), jnp.bfloat16),  # (C, C)
        "bproj": jnp.asarray(np.asarray(params["proj_b"], np.float32).reshape(C, 1),
                             jnp.float32),                                      # (C, 1)
    }


@functools.partial(jax.jit, static_argnames=("num_heads", "num_groups"))
def attention_block(x, prepped, num_heads=1, num_groups=32):
    """x: (B, C, *spatial), NCHW-style like the PyTorch module."""
    B, C = x.shape[0], x.shape[1]
    T = int(np.prod(x.shape[2:]))
    G = num_groups

    # Native (B, C, T): pure reshape, zero data movement (no transposes).
    x_ct = x.reshape(B, C, T).astype(jnp.float32)

    mgc_np = _group_membership(C, G)
    mgc = jnp.asarray(mgc_np)          # (G, C)
    mcg = jnp.asarray(mgc_np.T)        # (C, G)

    full = lambda shp: pl.BlockSpec(shp, lambda b: (0,) * len(shp))

    out = pl.pallas_call(
        functools.partial(attn_block_kernel, num_heads=num_heads),
        out_shape=jax.ShapeDtypeStruct((B, C, T), jnp.float32),
        grid_spec=pltpu.PrefetchScalarGridSpec(
            num_scalar_prefetch=0,
            grid=(B,),
            in_specs=[
                pl.BlockSpec((1, C, T), lambda b: (b, 0, 0)),   # x
                full((G, C)), full((C, G)),                     # group membership
                full((3 * C, C)), full((3 * C, 1)),             # qkv W / b (folded)
                full((C, C)), full((C, 1)),                     # proj W / b
            ],
            out_specs=pl.BlockSpec((1, C, T), lambda b: (b, 0, 0)),
        ),
        compiler_params=pltpu.CompilerParams(
            dimension_semantics=("parallel",)),   # 2x on v7x (2 TCs); ~0.35us/step on v5e/v6e
    )(x_ct, mgc, mcg,
      prepped["wqkv"], prepped["bqkv"], prepped["wproj"], prepped["bproj"])

    return out.reshape(x.shape).astype(x.dtype)


def reference_forward(x, params, num_heads=1, num_groups=32):
    """Pure-JAX f32 reference: exact math of the PyTorch module (eval mode)."""
    B, C = x.shape[0], x.shape[1]
    T = int(np.prod(x.shape[2:]))
    G = num_groups
    ch = C // num_heads
    hp = jax.lax.Precision.HIGHEST

    xf = x.reshape(B, C, T).astype(jnp.float32)
    xg = xf.reshape(B, G, (C // G) * T)
    mean = xg.mean(axis=-1, keepdims=True)
    var = ((xg - mean) ** 2).mean(axis=-1, keepdims=True)
    xn = ((xg - mean) / jnp.sqrt(var + EPS)).reshape(B, C, T)
    xn = xn * params["gn_g"].reshape(1, C, 1) + params["gn_b"].reshape(1, C, 1)

    qkv = jnp.einsum('dc,bct->bdt', params["qkv_w"], xn, precision=hp)
    qkv = qkv + params["qkv_b"].reshape(1, 3 * C, 1)
    qkv = qkv.reshape(B * num_heads, 3 * ch, T)
    q, k, v = jnp.split(qkv, 3, axis=1)
    scale = 1.0 / math.sqrt(math.sqrt(ch))
    w = jnp.einsum('bct,bcs->bts', q * scale, k * scale, precision=hp)
    w = jax.nn.softmax(w, axis=-1)
    a = jnp.einsum('bts,bcs->bct', w, v, precision=hp).reshape(B, C, T)
    h = jnp.einsum('dc,bct->bdt', params["proj_w"], a, precision=hp)
    h = h + params["proj_b"].reshape(1, C, 1)
    return (xf + h).reshape(x.shape)


if __name__ == "__main__":
    # GroupNorm(32, C) requires C % 32 == 0; C = 128 fills the 128-lane axis for
    # the weights and T = 16*16 = 256 fills it (x2) for the activations.
    B, C, H, W = 2, 128, 16, 16
    NUM_HEADS, NUM_GROUPS = 1, 32

    key = jax.random.PRNGKey(0)
    ks = jax.random.split(key, 8)
    x = jax.random.normal(ks[0], (B, C, H, W), jnp.float32)   # NCHW like PyTorch

    params = {
        "gn_g": 1.0 + 0.1 * jax.random.normal(ks[1], (C,), jnp.float32),
        "gn_b": 0.1 * jax.random.normal(ks[2], (C,), jnp.float32),
        "qkv_w": 0.05 * jax.random.normal(ks[3], (3 * C, C), jnp.float32),
        "qkv_b": 0.05 * jax.random.normal(ks[4], (3 * C,), jnp.float32),
        # NOTE: PyTorch __init__ zero-initializes proj_out (zero_module); random
        # here so the full attention compute path is exercised deterministically.
        "proj_w": 0.05 * jax.random.normal(ks[5], (C, C), jnp.float32),
        "proj_b": 0.05 * jax.random.normal(ks[6], (C,), jnp.float32),
    }

    prepped = prepare_params(params, C, NUM_HEADS, NUM_GROUPS)   # one-time constant fold

    out = jax.block_until_ready(
        attention_block(x, prepped, num_heads=NUM_HEADS, num_groups=NUM_GROUPS))
    ref = jax.block_until_ready(
        reference_forward(x, params, num_heads=NUM_HEADS, num_groups=NUM_GROUPS))

    # bf16 MXU operands with f32 accumulation -> bf16-appropriate tolerance vs
    # the f32 reference (expected, documented; not a bug).
    np.testing.assert_allclose(np.asarray(out), np.asarray(ref), rtol=2e-2, atol=2e-2)
    assert out.shape == (B, C, H, W)
    print("KERNEL_OK")
</pallas_src>

<mosaic_0001>
module attributes {stable_mosaic.version = 11 : i64} {
  func.func @attn_block_kernel(%arg0: i32, %arg1: memref<1x128x256xf32, #tpu.memory_space<vmem>>, %arg2: memref<32x128xf32, #tpu.memory_space<vmem>>, %arg3: memref<128x32xf32, #tpu.memory_space<vmem>>, %arg4: memref<384x128xbf16, #tpu.memory_space<vmem>>, %arg5: memref<384x1xf32, #tpu.memory_space<vmem>>, %arg6: memref<128x128xbf16, #tpu.memory_space<vmem>>, %arg7: memref<128x1xf32, #tpu.memory_space<vmem>>, %arg8: memref<1x128x256xf32, #tpu.memory_space<vmem>>) attributes {dimension_semantics = [#tpu.dimension_semantics<parallel>], iteration_bounds = array<i64: 2>, scalar_prefetch = 0 : i64, scratch_operands = 0 : i64, tpu.core_type = #tpu.core_type<tc>, window_params = [{transform_indices = @transform_0, window_bounds = array<i64: 1, 128, 256>}, {pipeline_mode = #tpu.pipeline_mode<synchronous>, transform_indices = @transform_1, window_bounds = array<i64: 32, 128>}, {pipeline_mode = #tpu.pipeline_mode<synchronous>, transform_indices = @transform_2, window_bounds = array<i64: 128, 32>}, {pipeline_mode = #tpu.pipeline_mode<synchronous>, transform_indices = @transform_3, window_bounds = array<i64: 384, 128>}, {pipeline_mode = #tpu.pipeline_mode<synchronous>, transform_indices = @transform_4, window_bounds = array<i64: 384, 1>}, {pipeline_mode = #tpu.pipeline_mode<synchronous>, transform_indices = @transform_5, window_bounds = array<i64: 128, 128>}, {pipeline_mode = #tpu.pipeline_mode<synchronous>, transform_indices = @transform_6, window_bounds = array<i64: 128, 1>}, {transform_indices = @transform_7, window_bounds = array<i64: 1, 128, 256>}]} {
    %c0 = arith.constant 0 : index
    %c0_0 = arith.constant 0 : index
    %c0_1 = arith.constant 0 : index
    %0 = vector.load %arg1[%c0, %c0_0, %c0_1] : memref<1x128x256xf32, #tpu.memory_space<vmem>>, vector<1x128x256xf32>
    %1 = vector.shape_cast %0 : vector<1x128x256xf32> to vector<128x256xf32>
    %cst = arith.constant dense<0.000000e+00> : vector<128xf32>
    %2 = vector.multi_reduction <add>, %1, %cst [1] : vector<128x256xf32> to vector<128xf32>
    %3 = vector.shape_cast %2 : vector<128xf32> to vector<128x1xf32>
    %c0_2 = arith.constant 0 : index
    %c0_3 = arith.constant 0 : index
    %4 = vector.load %arg2[%c0_2, %c0_3] : memref<32x128xf32, #tpu.memory_space<vmem>>, vector<32x128xf32>
    %cst_4 = arith.constant dense<0.000000e+00> : vector<32x1xf32>
    %5 = tpu.matmul %4, %3, %cst_4 {dimension_numbers = #tpu.dot_dimension_numbers<[1], [0], [0], [1], [0, 0, 1, 1], [], []>} : vector<32x128xf32>, vector<128x1xf32>, vector<32x1xf32> -> vector<32x1xf32>
    %cst_5 = arith.constant 9.765625E-4 : f32
    %6 = vector.broadcast %cst_5 : f32 to vector<32x1xf32>
    %7 = arith.mulf %5, %6 : vector<32x1xf32>
    %c0_6 = arith.constant 0 : index
    %c0_7 = arith.constant 0 : index
    %8 = vector.load %arg3[%c0_6, %c0_7] : memref<128x32xf32, #tpu.memory_space<vmem>>, vector<128x32xf32>
    %cst_8 = arith.constant dense<0.000000e+00> : vector<128x1xf32>
    %9 = tpu.matmul %8, %7, %cst_8 {dimension_numbers = #tpu.dot_dimension_numbers<[1], [0], [0], [1], [0, 0, 1, 1], [], []>} : vector<128x32xf32>, vector<32x1xf32>, vector<128x1xf32> -> vector<128x1xf32>
    %10 = vector.broadcast %9 : vector<128x1xf32> to vector<128x256xf32>
    %11 = arith.subf %1, %10 : vector<128x256xf32>
    %12 = arith.mulf %11, %11 : vector<128x256xf32>
    %cst_9 = arith.constant dense<0.000000e+00> : vector<128xf32>
    %13 = vector.multi_reduction <add>, %12, %cst_9 [1] : vector<128x256xf32> to vector<128xf32>
    %14 = vector.shape_cast %13 : vector<128xf32> to vector<128x1xf32>
    %c0_10 = arith.constant 0 : index
    %c0_11 = arith.constant 0 : index
    %15 = vector.load %arg2[%c0_10, %c0_11] : memref<32x128xf32, #tpu.memory_space<vmem>>, vector<32x128xf32>
    %cst_12 = arith.constant dense<0.000000e+00> : vector<32x1xf32>
    %16 = tpu.matmul %15, %14, %cst_12 {dimension_numbers = #tpu.dot_dimension_numbers<[1], [0], [0], [1], [0, 0, 1, 1], [], []>} : vector<32x128xf32>, vector<128x1xf32>, vector<32x1xf32> -> vector<32x1xf32>
    %cst_13 = arith.constant 9.765625E-4 : f32
    %17 = vector.broadcast %cst_13 : f32 to vector<32x1xf32>
    %18 = arith.mulf %16, %17 : vector<32x1xf32>
    %cst_14 = arith.constant 9.99999974E-6 : f32
    %19 = vector.broadcast %cst_14 : f32 to vector<32x1xf32>
    %20 = arith.addf %18, %19 : vector<32x1xf32>
    %21 = math.rsqrt %20 : vector<32x1xf32>
    %c0_15 = arith.constant 0 : index
    %c0_16 = arith.constant 0 : index
    %22 = vector.load %arg3[%c0_15, %c0_16] : memref<128x32xf32, #tpu.memory_space<vmem>>, vector<128x32xf32>
    %cst_17 = arith.constant dense<0.000000e+00> : vector<128x1xf32>
    %23 = tpu.matmul %22, %21, %cst_17 {dimension_numbers = #tpu.dot_dimension_numbers<[1], [0], [0], [1], [0, 0, 1, 1], [], []>} : vector<128x32xf32>, vector<32x1xf32>, vector<128x1xf32> -> vector<128x1xf32>
    %24 = vector.broadcast %23 : vector<128x1xf32> to vector<128x256xf32>
    %25 = arith.mulf %11, %24 : vector<128x256xf32>
    %c0_18 = arith.constant 0 : index
    %c0_19 = arith.constant 0 : index
    %26 = vector.load %arg4[%c0_18, %c0_19] : memref<384x128xbf16, #tpu.memory_space<vmem>>, vector<384x128xbf16>
    %27 = arith.truncf %25 : vector<128x256xf32> to vector<128x256xbf16>
    %cst_20 = arith.constant dense<0.000000e+00> : vector<384x256xf32>
    %28 = tpu.matmul %26, %27, %cst_20 {dimension_numbers = #tpu.dot_dimension_numbers<[1], [0], [0], [1], [0, 0, 1, 1], [], []>} : vector<384x128xbf16>, vector<128x256xbf16>, vector<384x256xf32> -> vector<384x256xf32>
    %c0_21 = arith.constant 0 : index
    %c0_22 = arith.constant 0 : index
    %29 = vector.load %arg5[%c0_21, %c0_22] : memref<384x1xf32, #tpu.memory_space<vmem>>, vector<384x1xf32>
    %30 = vector.broadcast %29 : vector<384x1xf32> to vector<384x256xf32>
    %31 = arith.addf %28, %30 : vector<384x256xf32>
    %32 = vector.extract_strided_slice %31 {offsets = [0, 0], sizes = [128, 256], strides = [1, 1]} : vector<384x256xf32> to vector<128x256xf32>
    %33 = arith.truncf %32 : vector<128x256xf32> to vector<128x256xbf16>
    %34 = vector.extract_strided_slice %31 {offsets = [128, 0], sizes = [128, 256], strides = [1, 1]} : vector<384x256xf32> to vector<128x256xf32>
    %35 = arith.truncf %34 : vector<128x256xf32> to vector<128x256xbf16>
    %36 = vector.extract_strided_slice %31 {offsets = [256, 0], sizes = [128, 256], strides = [1, 1]} : vector<384x256xf32> to vector<128x256xf32>
    %37 = arith.truncf %36 : vector<128x256xf32> to vector<128x256xbf16>
    "tpu.trace_start"() <{level = 10 : i32, message = "cs,ct->st"}> : () -> ()
    %cst_23 = arith.constant dense<0.000000e+00> : vector<256x256xf32>
    %38 = tpu.matmul %35, %33, %cst_23 {dimension_numbers = #tpu.dot_dimension_numbers<[0], [0], [1], [1], [0, 1, 1, 1], [], []>} : vector<128x256xbf16>, vector<128x256xbf16>, vector<256x256xf32> -> vector<256x256xf32>
    "tpu.trace_stop"() : () -> ()
    %cst_24 = arith.constant dense<0xFF800000> : vector<256xf32>
    %39 = vector.multi_reduction <maximumf>, %38, %cst_24 [0] : vector<256x256xf32> to vector<256xf32>
    %40 = vector.shape_cast %39 : vector<256xf32> to vector<1x256xf32>
    %41 = vector.broadcast %40 : vector<1x256xf32> to vector<256x256xf32>
    %42 = arith.subf %38, %41 : vector<256x256xf32>
    %43 = math.exp %42 : vector<256x256xf32>
    %cst_25 = arith.constant dense<0.000000e+00> : vector<256xf32>
    %44 = vector.multi_reduction <add>, %43, %cst_25 [0] : vector<256x256xf32> to vector<256xf32>
    %45 = vector.shape_cast %44 : vector<256xf32> to vector<1x256xf32>
    %46 = arith.truncf %43 : vector<256x256xf32> to vector<256x256xbf16>
    %cst_26 = arith.constant dense<0.000000e+00> : vector<128x256xf32>
    %47 = tpu.matmul %37, %46, %cst_26 {dimension_numbers = #tpu.dot_dimension_numbers<[1], [0], [0], [1], [0, 0, 1, 1], [], []>} : vector<128x256xbf16>, vector<256x256xbf16>, vector<128x256xf32> -> vector<128x256xf32>
    %48 = tpu.reciprocal %45 {approx = true} : vector<1x256xf32> -> vector<1x256xf32>
    %49 = vector.broadcast %48 : vector<1x256xf32> to vector<128x256xf32>
    %50 = arith.mulf %47, %49 : vector<128x256xf32>
    %c0_27 = arith.constant 0 : index
    %c0_28 = arith.constant 0 : index
    %51 = vector.load %arg6[%c0_27, %c0_28] : memref<128x128xbf16, #tpu.memory_space<vmem>>, vector<128x128xbf16>
    %52 = arith.truncf %50 : vector<128x256xf32> to vector<128x256xbf16>
    %cst_29 = arith.constant dense<0.000000e+00> : vector<128x256xf32>
    %53 = tpu.matmul %51, %52, %cst_29 {dimension_numbers = #tpu.dot_dimension_numbers<[1], [0], [0], [1], [0, 0, 1, 1], [], []>} : vector<128x128xbf16>, vector<128x256xbf16>, vector<128x256xf32> -> vector<128x256xf32>
    %54 = arith.addf %1, %53 : vector<128x256xf32>
    %c0_30 = arith.constant 0 : index
    %c0_31 = arith.constant 0 : index
    %55 = vector.load %arg7[%c0_30, %c0_31] : memref<128x1xf32, #tpu.memory_space<vmem>>, vector<128x1xf32>
    %56 = vector.broadcast %55 : vector<128x1xf32> to vector<128x256xf32>
    %57 = arith.addf %54, %56 : vector<128x256xf32>
    %c0_32 = arith.constant 0 : index
    %c0_33 = arith.constant 0 : index
    %c0_34 = arith.constant 0 : index
    %58 = vector.load %arg8[%c0_32, %c0_33, %c0_34] : memref<1x128x256xf32, #tpu.memory_space<vmem>>, vector<1x128x256xf32>
    %59 = vector.shape_cast %58 : vector<1x128x256xf32> to vector<128x256xf32>
    %60 = vector.shape_cast %57 : vector<128x256xf32> to vector<1x128x256xf32>
    tpu.vector_store %arg8[%c0_32, %c0_33, %c0_34], %60 {strides = array<i32>} : memref<1x128x256xf32, #tpu.memory_space<vmem>>, vector<1x128x256xf32>,
    return
  }
  func.func @transform_0(%arg0: i32) -> (i32, i32, i32) {
    %c0_i32 = arith.constant 0 : i32
    %c0_i32_0 = arith.constant 0 : i32
    %c0_i32_1 = arith.constant 0 : i32
    return %arg0, %c0_i32, %c0_i32_0 : i32, i32, i32
  }
  func.func @transform_1(%arg0: i32) -> (i32, i32) {
    %c0_i32 = arith.constant 0 : i32
    %c0_i32_0 = arith.constant 0 : i32
    %c0_i32_1 = arith.constant 0 : i32
    return %c0_i32, %c0_i32_0 : i32, i32
  }
  func.func @transform_2(%arg0: i32) -> (i32, i32) {
    %c0_i32 = arith.constant 0 : i32
    %c0_i32_0 = arith.constant 0 : i32
    %c0_i32_1 = arith.constant 0 : i32
    return %c0_i32, %c0_i32_0 : i32, i32
  }
  func.func @transform_3(%arg0: i32) -> (i32, i32) {
    %c0_i32 = arith.constant 0 : i32
    %c0_i32_0 = arith.constant 0 : i32
    %c0_i32_1 = arith.constant 0 : i32
    return %c0_i32, %c0_i32_0 : i32, i32
  }
  func.func @transform_4(%arg0: i32) -> (i32, i32) {
    %c0_i32 = arith.constant 0 : i32
    %c0_i32_0 = arith.constant 0 : i32
    %c0_i32_1 = arith.constant 0 : i32
    return %c0_i32, %c0_i32_0 : i32, i32
  }
  func.func @transform_5(%arg0: i32) -> (i32, i32) {
    %c0_i32 = arith.constant 0 : i32
    %c0_i32_0 = arith.constant 0 : i32
    %c0_i32_1 = arith.constant 0 : i32
    return %c0_i32, %c0_i32_0 : i32, i32
  }
  func.func @transform_6(%arg0: i32) -> (i32, i32) {
    %c0_i32 = arith.constant 0 : i32
    %c0_i32_0 = arith.constant 0 : i32
    %c0_i32_1 = arith.constant 0 : i32
    return %c0_i32, %c0_i32_0 : i32, i32
  }
  func.func @transform_7(%arg0: i32) -> (i32, i32, i32) {
    %c0_i32 = arith.constant 0 : i32
    %c0_i32_0 = arith.constant 0 : i32
    %c0_i32_1 = arith.constant 0 : i32
    return %arg0, %c0_i32, %c0_i32_0 : i32, i32, i32
  }
}

</mosaic_0001>

<bundles_post_ra>
// kernel: attention_block.1
= control target key start
LH: loop header
LB: loop body
LE: loop exit
PB: predicated region body
PF: predicated region fallthrough
CT: control target
= control target key end

     0   :  { %s3449_s24 = smov 0   ;;  %s5191_s0 = inlined_call_operand.vmem [shape: f32[2,128,256], index: 0, kind: input, shape index: {}]   ;;  %s5192_s1 = inlined_call_operand.vmem [shape: f32[32,128], index: 1, kind: input, shape index: {}]   ;;  %s5193_s2 = inlined_call_operand.vmem [shape: f32[128,32], index: 2, kind: input, shape index: {}]   ;;  %s5194_s3 = inlined_call_operand.vmem [shape: bf16[384,128], index: 3, kind: input, shape index: {}]   ;;  %s5195_s4 = inlined_call_operand.vmem [shape: f32[384,1], index: 4, kind: input, shape index: {}]   ;;  %s5196_s5 = inlined_call_operand.vmem [shape: bf16[128,128], index: 5, kind: input, shape index: {}]   ;;  %s5197_s6 = inlined_call_operand.vmem [shape: f32[128,1], index: 6, kind: input, shape index: {}]   ;;  %s5198_s7 = inlined_call_operand.vmem [shape: f32[2,128,256], index: 7, kind: output, shape index: {}]  }
   0x1 LB: > { %s3003_s25 = sadd.s32 4294967295, %s3406_s24   ;;  %p3007_p0 = scmp.ge.s32.totalorder %s3406_s24, 1  ;;  %s3406_s24 = sphi %s3449_s24, %s17_s24  }
   0x2   : > { %p237_p1 = scmp.lt.s32.totalorder %s3406_s24, 3 }
   0x4   : > { %p238_p2 = pnand %p3007_p0, %p237_p1 }
   0x6   : > { %241 = sbr.rel (%p238_p2) target bundleno = 2858 (0xb2a), region = 48 }
   0xb   : > { %p269_p3 = scmp.lt.s32.totalorder %s3003_s25, 1  ;;  %v3598_v63 = vld [vmem:[%s5192_s1] sm:$0xff]  ;;  %vm412_vm0 = vcmask 261120  }
   0xd   : > { %s5320_s25 = smov (!%p269_p3, %s3003_s25), 1 }
   0xe   : > { %s3174_s26 = sshll.u32 %s5320_s25, 8 }
   0xf   : > { %s3465_s29 = scalar_lea.vmem %s5191_s0, %s3174_s26  ;;  %s5123_s13 = scalar_lea.vmem %s5198_s7, %s3174_s26 }
  0x10   : > { %v3468_v0 = vld [vmem:[%s3465_s29 + $0xf0] sm:$0xff]  ;;  %v3471_v1 = vld [vmem:[%s3465_s29 + $0xf8] sm:$0xff]  ;;  %v3492_v9 = vld [vmem:[%s3465_s29 + $0xe0] sm:$0xff] }
  0x11   : > { %v3474_v2 = vld [vmem:[%s3465_s29 + $0xd0] sm:$0xff]  ;;  %v356_v3 = vadd.f32 %v3471_v1, %v3468_v0  ;;  %v3479_v4 = vld [vmem:[%s3465_s29 + $0xd8] sm:$0xff]  ;;  %v3495_v10 = vld [vmem:[%s3465_s29 + $0xe8] sm:$0xff] }
  0x12   : > { %v3482_v5 = vld [vmem:[%s3465_s29 + $0xb0] sm:$0xff]  ;;  %v3485_v6 = vld [vmem:[%s3465_s29 + $0xb8] sm:$0xff]  ;;  %v350_v7 = vadd.f32 %v3479_v4, %v3474_v2  ;;  %v3498_v11 = vld [vmem:[%s3465_s29 + $0xc0] sm:$0xff]  ;;  %v353_v15 = vadd.f32 %v3495_v10, %v3492_v9 }
  0x13   : > { %v344_v8 = vadd.f32 %v3485_v6, %v3482_v5  ;;  %357 = vadd.xlane.f32.xlu0 %v356_v3  ;;  %v3501_v12 = vld [vmem:[%s3465_s29 + $0xc8] sm:$0xff]  ;;  %v3504_v13 = vld [vmem:[%s3465_s29 + $0xa0] sm:$0xff]  ;;  %v3516_v18 = vld [vmem:[%s3465_s29 + $0x90] sm:$0xff] }
  0x14   : > { %351 = vadd.xlane.f32.xlu1 %v350_v7  ;;  %v3507_v14 = vld [vmem:[%s3465_s29 + $0xa8] sm:$0xff]  ;;  %v347_v16 = vadd.f32 %v3501_v12, %v3498_v11  ;;  %v3519_v19 = vld [vmem:[%s3465_s29 + $0x98] sm:$0xff]  ;;  %v3522_v20 = vld [vmem:[%s3465_s29 + $0x80] sm:$0xff] }
  0x15   : > { %345 = vadd.xlane.f32.xlu2 %v344_v8  ;;  %v341_v17 = vadd.f32 %v3507_v14, %v3504_v13  ;;  %v3525_v21 = vld [vmem:[%s3465_s29 + $0x88] sm:$0xff]  ;;  %v3528_v22 = vld [vmem:[%s3465_s29 + $0x70] sm:$0xff]  ;;  %v3531_v23 = vld [vmem:[%s3465_s29 + $0x78] sm:$0xff]  ;;  %v338_v24 = vadd.f32 %v3519_v19, %v3516_v18 }
  0x16   : > { %v335_v25 = vadd.f32 %v3525_v21, %v3522_v20  ;;  %v332_v26 = vadd.f32 %v3531_v23, %v3528_v22  ;;  %v3540_v27 = vld [vmem:[%s3465_s29 + $0x60] sm:$0xff]  ;;  %v3543_v28 = vld [vmem:[%s3465_s29 + $0x68] sm:$0xff]  ;;  %v3546_v29 = vld [vmem:[%s3465_s29 + $0x50] sm:$0xff] }
  0x17   : > { %v3549_v30 = vld [vmem:[%s3465_s29 + $0x58] sm:$0xff]  ;;  %v3552_v31 = vld [vmem:[%s3465_s29 + $0x40] sm:$0xff]  ;;  %v3555_v32 = vld [vmem:[%s3465_s29 + $0x48] sm:$0xff]  ;;  %v329_v33 = vadd.f32 %v3543_v28, %v3540_v27 }
  0x18   : > { %v326_v34 = vadd.f32 %v3549_v30, %v3546_v29  ;;  %v323_v35 = vadd.f32 %v3555_v32, %v3552_v31  ;;  %v3564_v36 = vld [vmem:[%s3465_s29 + $0x30] sm:$0xff]  ;;  %v3567_v37 = vld [vmem:[%s3465_s29 + $0x38] sm:$0xff]  ;;  %v3570_v38 = vld [vmem:[%s3465_s29 + $0x20] sm:$0xff] }
  0x19   : > { %v3573_v39 = vld [vmem:[%s3465_s29 + $0x28] sm:$0xff]  ;;  %v3576_v40 = vld [vmem:[%s3465_s29 + $0x10] sm:$0xff]  ;;  %v3579_v41 = vld [vmem:[%s3465_s29 + $0x18] sm:$0xff]  ;;  %v320_v42 = vadd.f32 %v3567_v37, %v3564_v36 }
  0x1a   : > { %v317_v43 = vadd.f32 %v3573_v39, %v3570_v38  ;;  %v314_v44 = vadd.f32 %v3579_v41, %v3576_v40  ;;  %v3588_v45 = vld [vmem:[%s3465_s29] sm:$0xff]  ;;  %v3591_v46 = vld [vmem:[%s3465_s29 + $0x8] sm:$0xff]  ;;  %v3610_v8 = vld [vmem:[%s5192_s1 + $0x10] sm:$0xff] }
  0x1b   : > { %354 = vadd.xlane.f32.xlu0 %v353_v15  ;;  %v311_v47 = vadd.f32 %v3591_v46, %v3588_v45  ;;  %v3604_v7 = vld [vmem:[%s5192_s1 + $0x8] sm:$0xff]  ;;  %v3616_v15 = vld [vmem:[%s5192_s1 + $0x18] sm:$0xff] }
  0x1c   : > { %348 = vadd.xlane.f32.xlu1 %v347_v16 }
  0x1d   : > { %342 = vadd.xlane.f32.xlu2 %v341_v17 }
  0x23   : > { %339 = vadd.xlane.f32.xlu0 %v338_v24 }
  0x24   : > { %336 = vadd.xlane.f32.xlu1 %v335_v25 }
  0x25   : > { %333 = vadd.xlane.f32.xlu2 %v332_v26 }
  0x2b   : > { %330 = vadd.xlane.f32.xlu0 %v329_v33 }
  0x2c   : > { %327 = vadd.xlane.f32.xlu1 %v326_v34 }
  0x2d   : > { %324 = vadd.xlane.f32.xlu2 %v323_v35 }
  0x33   : > { %321 = vadd.xlane.f32.xlu0 %v320_v42  ;;  %v3622_v42 = vld [vmem:[%s5193_s2 + $0x20] sm:$0xff] }
  0x34   : > { %318 = vadd.xlane.f32.xlu1 %v317_v43  ;;  %v3629_v43 = vld [vmem:[%s5193_s2 + $0x28] sm:$0xff] }
  0x35   : > { %315 = vadd.xlane.f32.xlu2 %v314_v44  ;;  %v3636_v44 = vld [vmem:[%s5193_s2 + $0x30] sm:$0xff] }
  0x3b   : > { %312 = vadd.xlane.f32.xlu0 %v311_v47  ;;  %v3643_v47 = vld [vmem:[%s5193_s2 + $0x38] sm:$0xff] }
  0x86   : > { %v358_v48 = vpop.xlane.xlu0 %357 }
  0x87   : > { %363 = vmatpush.msra.mxu0 %v358_v48  ;;  %v352_v49 = vpop.xlane.xlu1 %351  ;;  %v3650_v48 = vld [vmem:[%s5193_s2] sm:$0xff] }
  0x88   : > { %v346_v50 = vpop.xlane.xlu2 %345 }
  0x8e   : > { %v355_v51 = vpop.xlane.xlu0 %354 }
  0x8f   : > { %364 = vmatpush.msra.mxu0 %v355_v51  ;;  %v349_v52 = vpop.xlane.xlu1 %348  ;;  %v3671_v51 = vld [vmem:[%s5193_s2 + $0x48] sm:$0xff] }
  0x90   : > { %v343_v53 = vpop.xlane.xlu2 %342 }
  0x91   : > { %365 = vmatpush.msra.mxu0 %v352_v49  ;;  %v3657_v49 = vld [vmem:[%s5193_s2 + $0x40] sm:$0xff] }
  0x93   : > { %366 = vmatpush.msra.mxu0 %v349_v52  ;;  %v3678_v52 = vld [vmem:[%s5193_s2 + $0x10] sm:$0xff] }
  0x95   : > { %367 = vmatpush.msra.mxu0 %v346_v50  ;;  %v3664_v50 = vld [vmem:[%s5193_s2 + $0x8] sm:$0xff] }
  0x96   : > { %v340_v54 = vpop.xlane.xlu0 %339 }
  0x97   : > { %368 = vmatpush.msra.mxu0 %v343_v53  ;;  %v337_v55 = vpop.xlane.xlu1 %336  ;;  %v3685_v53 = vld [vmem:[%s5193_s2 + $0x50] sm:$0xff] }
  0x98   : > { %v334_v56 = vpop.xlane.xlu2 %333 }
  0x99   : > { %369 = vmatpush.msra.mxu0 %v340_v54  ;;  %v3692_v54 = vld [vmem:[%s5193_s2 + $0x18] sm:$0xff] }
  0x9b   : > { %370 = vmatpush.msra.mxu0 %v337_v55  ;;  %v3699_v55 = vld [vmem:[%s5193_s2 + $0x58] sm:$0xff] }
  0x9d   : > { %371 = vmatpush.msra.mxu0 %v334_v56  ;;  %v3706_v56 = vld [vmem:[%s5193_s2 + $0x60] sm:$0xff] }
  0x9e   : > { %v331_v57 = vpop.xlane.xlu0 %330 }
  0x9f   : > { %372 = vmatpush.msra.mxu0 %v331_v57  ;;  %v328_v58 = vpop.xlane.xlu1 %327  ;;  %v3713_v57 = vld [vmem:[%s5193_s2 + $0x68] sm:$0xff] }
  0xa0   : > { %v325_v59 = vpop.xlane.xlu2 %324  ;;  %5233 = vst [vmem:[#allocation2_spill] sm:$0xff] %v3713_v57 }
  0xa1   : > { %373 = vmatpush.msra.mxu0 %v328_v58  ;;  %v3720_v58 = vld [vmem:[%s5193_s2 + $0x70] sm:$0xff] }
  0xa2   : > { %5234 = vst [vmem:[#allocation3_spill] sm:$0xff] %v3720_v58 }
  0xa3   : > { %374 = vmatpush.msra.mxu0 %v325_v59  ;;  %v3727_v59 = vld [vmem:[%s5193_s2 + $0x78] sm:$0xff] }
  0xa4   : > { %5235 = vst [vmem:[#allocation4_spill] sm:$0xff] %v3727_v59 }
  0xa6   : > { %v322_v60 = vpop.xlane.xlu0 %321 }
  0xa7   : > { %375 = vmatpush.msra.mxu0 %v322_v60  ;;  %v319_v61 = vpop.xlane.xlu1 %318  ;;  %v3408_v60 = vmov 0  }
  0xa8   : > { %v316_v62 = vpop.xlane.xlu2 %315  ;;  %3225 = vset.pattern.permute.xlu1 %v3408_v60  ;;  %3226 = vset.pattern.permute.xlu2 %v3408_v60 }
  0xa9   : > { %376 = vmatpush.msra.mxu0 %v319_v61  ;;  %3227 = vset.pattern.permute.xlu0 %v3408_v60 }
  0xab   : > { %377 = vmatpush.msra.mxu0 %v316_v62 }
  0xae   : > { %v313_v3 = vpop.xlane.xlu0 %312 }
  0xaf   : > { %378 = vmatpush.msra.mxu0 %v313_v3 }
  0xb0   : > { %379 = vmatmul.f32.vlgmr.msra.gmra.mxu0 %v3598_v63 }
  0xb8   : > { %382 = vmatmul.f32.gmra.mxu0 %v3604_v7 }
  0xc0   : > { %385 = vmatmul.f32.gmra.mxu0 %v3610_v8 }
  0xc8   : > { %388 = vmatmul.f32.gmra.mxu0 %v3616_v15 }
 0x12d   : > { %v380_v16 = vpop.f32.mrf.mxu0 }
 0x12e   : > { %v392_v35 = vmul.f32 0.0009765625, %v380_v16 }
 0x135   : > { %v383_v17 = vpop.f32.mrf.mxu0 }
 0x136   : > { %v393_v34 = vmul.f32 0.0009765625, %v383_v17 }
 0x13d   : > { %v386_v24 = vpop.f32.mrf.mxu0 }
 0x13e   : > { %v394_v33 = vmul.f32 0.0009765625, %v386_v24 }
 0x145   : > { %v389_v25 = vpop.f32.mrf.mxu0 }
 0x146   : > { %v395_v26 = vmul.f32 0.0009765625, %v389_v25 }
 0x148   : > { %473 = vmatpush.msrb.mxu0 %v395_v26  ;;  %3208 = vmatpush.msra.mxu1 %v395_v26 }
 0x14a   : > { %474 = vmatpush.msrb.mxu0 %v394_v33  ;;  %3209 = vmatpush.msra.mxu1 %v394_v33 }
 0x14c   : > { %475 = vmatpush.msrb.mxu0 %v393_v34  ;;  %3210 = vmatpush.msra.mxu1 %v393_v34 }
 0x14e   : > { %476 = vmatpush.msrb.mxu0 %v392_v35  ;;  %3211 = vmatpush.msra.mxu1 %v392_v35 }
 0x14f   : > { %3016 = vmatmul.msk.f32.vlgmr.msra.gmra.mxu1 %vm412_vm0, %v3622_v42  ;;  %3012 = vmatmul.msk.f32.vlgmr.msrb.gmra.mxu0 %vm412_vm0, %v3650_v48 }
 0x157   : > { %3017 = vmatmul.msk.f32.gmra.mxu1 %vm412_vm0, %v3629_v43  ;;  %3013 = vmatmul.msk.f32.gmra.mxu0 %vm412_vm0, %v3664_v50 }
 0x15f   : > { %3018 = vmatmul.msk.f32.gmra.mxu1 %vm412_vm0, %v3636_v44  ;;  %3014 = vmatmul.msk.f32.gmra.mxu0 %vm412_vm0, %v3678_v52 }
 0x167   : > { %3019 = vmatmul.msk.f32.gmra.mxu1 %vm412_vm0, %v3643_v47  ;;  %3015 = vmatmul.msk.f32.gmra.mxu0 %vm412_vm0, %v3692_v54 }
 0x16f   : > { %3020 = vmatmul.msk.f32.gmra.mxu1 %vm412_vm0, %v3657_v49 }
 0x177   : > { %3021 = vmatmul.msk.f32.gmra.mxu1 %vm412_vm0, %v3671_v51 }
 0x17f   : > { %3022 = vmatmul.msk.f32.gmra.mxu1 %vm412_vm0, %v3685_v53 }
 0x187   : > { %3023 = vmatmul.msk.f32.gmra.mxu1 %vm412_vm0, %v3699_v55 }
 0x18f   : > { %3024 = vmatmul.msk.f32.gmra.mxu1 %vm412_vm0, %v3706_v56 }
 0x197   : > { %3025 = vmatmul.msk.f32.gmra.mxu1 %vm412_vm0, %v3713_v57 }
 0x19f   : > { %3026 = vmatmul.msk.f32.gmra.mxu1 %vm412_vm0, %v3720_v58 }
 0x1a7   : > { %3027 = vmatmul.msk.f32.gmra.mxu1 %vm412_vm0, %v3727_v59 }
 0x1cc   : > { %v490_v61 = vpop.f32.mrf.mxu1  ;;  %v478_v33 = vpop.f32.mrf.mxu0 }
 0x1d4   : > { %v493_v62 = vpop.f32.mrf.mxu1  ;;  %v481_v35 = vpop.f32.mrf.mxu0 }
 0x1dc   : > { %v496_v3 = vpop.f32.mrf.mxu1  ;;  %v484_v60 = vpop.f32.mrf.mxu0 }
 0x1e4   : > { %v499_v16 = vpop.f32.mrf.mxu1 }
 0x1e5   : > { %563 = vperm.xlu1 %3225, %v499_v16   ;;  %v487_v16 = vpop.f32.mrf.mxu0 }
 0x1ec   : > { %v502_v17 = vpop.f32.mrf.mxu1 }
 0x1ed   : > { %568 = vperm.xlu2 %3226, %v502_v17  }
 0x1f4   : > { %v505_v24 = vpop.f32.mrf.mxu1 }
 0x1f5   : > { %573 = vperm.xlu1 %3225, %v505_v24  }
 0x1fc   : > { %v508_v25 = vpop.f32.mrf.mxu1 }
 0x1fd   : > { %578 = vperm.xlu2 %3226, %v508_v25  }
 0x204   : > { %v511_v26 = vpop.f32.mrf.mxu1 }
 0x205   : > { %583 = vperm.xlu1 %3225, %v511_v26  }
 0x20c   : > { %v514_v34 = vpop.f32.mrf.mxu1 }
 0x20d   : > { %588 = vperm.xlu2 %3226, %v514_v34  }
 0x214   : > { %v517_v59 = vpop.f32.mrf.mxu1 }
 0x215   : > { %553 = vperm.xlu2 %3226, %v493_v62   ;;  %593 = vperm.xlu0 %3227, %v517_v59  }
 0x21c   : > { %v520_v58 = vpop.f32.mrf.mxu1 }
 0x21d   : > { %558 = vperm.xlu0 %3227, %v496_v3   ;;  %598 = vperm.xlu2 %3226, %v520_v58  }
 0x224   : > { %v523_v57 = vpop.f32.mrf.mxu1 }
 0x225   : > { %603 = vperm.xlu1 %3225, %v523_v57   ;;  %538 = vperm.xlu2 %3226, %v484_v60  }
 0x226   : > { %543 = vperm.xlu0 %3227, %v487_v16  }
 0x22d   : > { %548 = vperm.xlu1 %3225, %v490_v61  }
 0x22e   : > { %528 = vperm.xlu0 %3227, %v478_v33  }
 0x235   : > { %533 = vperm.xlu1 %3225, %v481_v35  }
 0x247   : > { %v569_v17 = vpop.permute.xlu2 %568 }
 0x257   : > { %v3731_v24 = vpop.permute.xlu2 %578  ;;  %v3733_v25 = vpop.permute.xlu1 %563 }
 0x267   : > { %v589_v26 = vpop.permute.xlu2 %588  ;;  %v574_v3 = vpop.permute.xlu1 %573 }
 0x268   : > { %v3736_v59 = vsub.f32 %v3498_v11, %v589_v26  ;;  %v3739_v62 = vsub.f32 %v3501_v12, %v589_v26 }
 0x26a   : > { %v662_v57 = vmul.f32 %v3736_v59, %v3736_v59  ;;  %v663_v58 = vmul.f32 %v3739_v62, %v3739_v62 }
 0x26c   : > { %v706_v61 = vadd.f32 %v663_v58, %v662_v57 }
 0x26e   : > { %707 = vadd.xlane.f32.xlu2 %v706_v61  ;;  %v3766_v61 = vsub.f32 %v3522_v20, %v569_v17 }
 0x26f   : > { %v554_v33 = vpop.permute.xlu2 %553 }
 0x277   : > { %v584_v34 = vpop.permute.xlu1 %583  ;;  %v599_v60 = vpop.permute.xlu2 %598 }
 0x278   : > { %v3746_v35 = vsub.f32 %v3482_v5, %v584_v34  ;;  %v3749_v11 = vsub.f32 %v3485_v6, %v584_v34  ;;  %v3756_v26 = vsub.f32 %v3492_v9, %v599_v60  ;;  %v3759_v57 = vsub.f32 %v3495_v10, %v599_v60 }
 0x279   : > { %v3769_v34 = vsub.f32 %v3525_v21, %v569_v17  ;;  %v654_v10 = vmul.f32 %v3766_v61, %v3766_v61  ;;  %v3786_v17 = vsub.f32 %v3516_v18, %v574_v3 }
 0x27a   : > { %5236 = vst [vmem:[#allocation5_spill] sm:$0xff] %v3749_v11  ;;  %v660_v12 = vmul.f32 %v3746_v35, %v3746_v35  ;;  %v661_v16 = vmul.f32 %v3749_v11, %v3749_v11  ;;  %v666_v5 = vmul.f32 %v3756_v26, %v3756_v26  ;;  %v667_v6 = vmul.f32 %v3759_v57, %v3759_v57 }
 0x27b   : > { %v655_v60 = vmul.f32 %v3769_v34, %v3769_v34 }
 0x27c   : > { %v703_v58 = vadd.f32 %v661_v16, %v660_v12  ;;  %v712_v11 = vadd.f32 %v667_v6, %v666_v5  ;;  %v3792_v5 = vsub.f32 %v3546_v29, %v554_v33 }
 0x27e   : > { %704 = vadd.xlane.f32.xlu1 %v703_v58  ;;  %v3789_v58 = vsub.f32 %v3519_v19, %v574_v3  ;;  %v656_v19 = vmul.f32 %v3786_v17, %v3786_v17 }
 0x27f   : > { %v539_v3 = vpop.permute.xlu2 %538 }
 0x280   : > { %v657_v29 = vmul.f32 %v3789_v58, %v3789_v58 }
 0x286   : > { %713 = vadd.xlane.f32.xlu1 %v712_v11  ;;  %v694_v11 = vadd.f32 %v655_v60, %v654_v10  ;;  %v697_v60 = vadd.f32 %v657_v29, %v656_v19 }
 0x287   : > { %v594_v9 = vpop.permute.xlu0 %593 }
 0x288   : > { %v3776_v12 = vsub.f32 %v3474_v2, %v594_v9  ;;  %v3779_v16 = vsub.f32 %v3479_v4, %v594_v9  ;;  %v3795_v2 = vsub.f32 %v3549_v30, %v554_v33  ;;  %v648_v9 = vmul.f32 %v3792_v5, %v3792_v5 }
 0x289   : > { %v3806_v30 = vsub.f32 %v3570_v38, %v539_v3  ;;  %v3809_v33 = vsub.f32 %v3573_v39, %v539_v3 }
 0x28a   : > { %v664_v20 = vmul.f32 %v3776_v12, %v3776_v12  ;;  %v665_v21 = vmul.f32 %v3779_v16, %v3779_v16  ;;  %5237 = vst [vmem:[#allocation6_spill] sm:$0xff] %v3795_v2  ;;  %v649_v18 = vmul.f32 %v3795_v2, %v3795_v2 }
 0x28b   : > { %5238 = vst [vmem:[#allocation7_spill] sm:$0xff] %v3809_v33  ;;  %v642_v39 = vmul.f32 %v3806_v30, %v3806_v30 }
 0x28c   : > { %v709_v4 = vadd.f32 %v665_v21, %v664_v20  ;;  %v685_v10 = vadd.f32 %v649_v18, %v648_v9  ;;  %v3837_v9 = vsub.f32 %v3504_v13, %v3731_v24  ;;  %v3841_v18 = vsub.f32 %v3507_v14, %v3731_v24 }
 0x28e   : > { %695 = vadd.xlane.f32.xlu1 %v694_v11  ;;  %710 = vadd.xlane.f32.xlu0 %v709_v4  ;;  %v658_v13 = vmul.f32 %v3837_v9, %v3837_v9 }
 0x28f   : > { %v559_v6 = vpop.permute.xlu0 %558 }
 0x290   : > { %v3812_v20 = vsub.f32 %v3540_v27, %v559_v6  ;;  %v3815_v21 = vsub.f32 %v3543_v28, %v559_v6  ;;  %v643_v27 = vmul.f32 %v3809_v33, %v3809_v33 }
 0x292   : > { %v650_v28 = vmul.f32 %v3812_v20, %v3812_v20  ;;  %v651_v6 = vmul.f32 %v3815_v21, %v3815_v21  ;;  %v676_v29 = vadd.f32 %v643_v27, %v642_v39 }
 0x296   : > { %686 = vadd.xlane.f32.xlu1 %v685_v10  ;;  %698 = vadd.xlane.f32.xlu0 %v697_v60  ;;  %v688_v60 = vadd.f32 %v651_v6, %v650_v28 }
 0x297   : > { %v604_v11 = vpop.permute.xlu1 %603 }
 0x298   : > { %v3818_v4 = vsub.f32 %v3468_v0, %v604_v11  ;;  %v3821_v38 = vsub.f32 %v3471_v1, %v604_v11  ;;  %v544_v2 = vpop.permute.xlu0 %543  ;;  %v659_v11 = vmul.f32 %v3841_v18, %v3841_v18 }
 0x299   : > { %v3844_v3 = vsub.f32 %v3564_v36, %v544_v2  ;;  %v3847_v10 = vsub.f32 %v3567_v37, %v544_v2  ;;  %v3859_v37 = vsub.f32 %v3528_v22, %v3733_v25  ;;  %v3863_v2 = vsub.f32 %v3531_v23, %v3733_v25 }
 0x29a   : > { %v668_v0 = vmul.f32 %v3818_v4, %v3818_v4  ;;  %v669_v1 = vmul.f32 %v3821_v38, %v3821_v38  ;;  %v700_v39 = vadd.f32 %v659_v11, %v658_v13 }
 0x29b   : > { %v644_v14 = vmul.f32 %v3844_v3, %v3844_v3  ;;  %v645_v36 = vmul.f32 %v3847_v10, %v3847_v10  ;;  %v653_v22 = vmul.f32 %v3863_v2, %v3863_v2 }
 0x29c   : > { %v715_v19 = vadd.f32 %v669_v1, %v668_v0  ;;  %v652_v1 = vmul.f32 %v3859_v37, %v3859_v37 }
 0x29d   : > { %v679_v6 = vadd.f32 %v645_v36, %v644_v14 }
 0x29e   : > { %716 = vadd.xlane.f32.xlu2 %v715_v19  ;;  %677 = vadd.xlane.f32.xlu1 %v676_v29  ;;  %v691_v19 = vadd.f32 %v653_v22, %v652_v1 }
 0x29f   : > { %689 = vadd.xlane.f32.xlu0 %v688_v60  ;;  %v549_v0 = vpop.permute.xlu1 %548 }
 0x2a0   : > { %v529_v24 = vpop.permute.xlu0 %528  ;;  %v3880_v25 = vsub.f32 %v3552_v31, %v549_v0 }
 0x2a1   : > { %v3866_v27 = vsub.f32 %v3588_v45, %v529_v24  ;;  %v3869_v28 = vsub.f32 %v3591_v46, %v529_v24  ;;  %v3883_v46 = vsub.f32 %v3555_v32, %v549_v0 }
 0x2a2   : > { %v646_v60 = vmul.f32 %v3880_v25, %v3880_v25 }
 0x2a3   : > { %5239 = vst [vmem:[#allocation8_spill] sm:$0xff] %v3866_v27  ;;  %v638_v23 = vmul.f32 %v3866_v27, %v3866_v27  ;;  %v639_v45 = vmul.f32 %v3869_v28, %v3869_v28  ;;  %v647_v13 = vmul.f32 %v3883_v46, %v3883_v46 }
 0x2a4   : > { %5240 = vst [vmem:[#allocation9_spill] sm:$0xff] %v3869_v28 }
 0x2a5   : > { %v670_v29 = vadd.f32 %v639_v45, %v638_v23  ;;  %v682_v36 = vadd.f32 %v647_v13, %v646_v60 }
 0x2a6   : > { %701 = vadd.xlane.f32.xlu2 %v700_v39 }
 0x2a7   : > { %680 = vadd.xlane.f32.xlu0 %v679_v6  ;;  %v534_v11 = vpop.permute.xlu1 %533 }
 0x2a8   : > { %v3890_v14 = vsub.f32 %v3576_v40, %v534_v11  ;;  %v3893_v31 = vsub.f32 %v3579_v41, %v534_v11 }
 0x2aa   : > { %5241 = vst [vmem:[#allocation10_spill] sm:$0xff] %v3890_v14  ;;  %v640_v32 = vmul.f32 %v3890_v14, %v3890_v14  ;;  %v641_v24 = vmul.f32 %v3893_v31, %v3893_v31 }
 0x2ab   : > { %5242 = vst [vmem:[#allocation11_spill] sm:$0xff] %v3893_v31 }
 0x2ac   : > { %v673_v39 = vadd.f32 %v641_v24, %v640_v32 }
 0x2ae   : > { %692 = vadd.xlane.f32.xlu2 %v691_v19 }
 0x2af   : > { %671 = vadd.xlane.f32.xlu0 %v670_v29 }
 0x2b6   : > { %683 = vadd.xlane.f32.xlu2 %v682_v36 }
 0x2be   : > { %674 = vadd.xlane.f32.xlu2 %v673_v39 }
 0x2e1   : > { %v708_v0 = vpop.xlane.xlu2 %707 }
 0x2f1   : > { %v705_v6 = vpop.xlane.xlu1 %704 }
 0x2f9   : > { %v714_v22 = vpop.xlane.xlu1 %713 }
 0x301   : > { %v711_v1 = vpop.xlane.xlu0 %710  ;;  %v696_v41 = vpop.xlane.xlu1 %695 }
 0x309   : > { %v699_v40 = vpop.xlane.xlu0 %698  ;;  %v687_v60 = vpop.xlane.xlu1 %686 }
 0x311   : > { %v717_v23 = vpop.xlane.xlu2 %716  ;;  %v678_v36 = vpop.xlane.xlu1 %677 }
 0x312   : > { %718 = vmatpush.msra.mxu2 %v717_v23  ;;  %v690_v19 = vpop.xlane.xlu0 %689 }
 0x314   : > { %719 = vmatpush.msra.mxu2 %v714_v22 }
 0x316   : > { %720 = vmatpush.msra.mxu2 %v711_v1 }
 0x318   : > { %721 = vmatpush.msra.mxu2 %v708_v0 }
 0x319   : > { %v702_v45 = vpop.xlane.xlu2 %701 }
 0x31a   : > { %722 = vmatpush.msra.mxu2 %v705_v6  ;;  %v681_v13 = vpop.xlane.xlu0 %680 }
 0x31c   : > { %723 = vmatpush.msra.mxu2 %v702_v45 }
 0x31e   : > { %724 = vmatpush.msra.mxu2 %v699_v40 }
 0x320   : > { %725 = vmatpush.msra.mxu2 %v696_v41 }
 0x321   : > { %v693_v29 = vpop.xlane.xlu2 %692 }
 0x322   : > { %726 = vmatpush.msra.mxu2 %v693_v29  ;;  %v672_v24 = vpop.xlane.xlu0 %671 }
 0x324   : > { %727 = vmatpush.msra.mxu2 %v690_v19 }
 0x326   : > { %728 = vmatpush.msra.mxu2 %v687_v60 }
 0x329   : > { %v684_v11 = vpop.xlane.xlu2 %683 }
 0x32a   : > { %729 = vmatpush.msra.mxu2 %v684_v11 }
 0x32c   : > { %730 = vmatpush.msra.mxu2 %v681_v13 }
 0x32e   : > { %731 = vmatpush.msra.mxu2 %v678_v36 }
 0x331   : > { %v675_v32 = vpop.xlane.xlu2 %674 }
 0x332   : > { %732 = vmatpush.msra.mxu2 %v675_v32 }
 0x334   : > { %733 = vmatpush.msra.mxu2 %v672_v24 }
 0x335   : > { %734 = vmatmul.f32.vlgmr.msra.gmra.mxu2 %v3598_v63 }
 0x33d   : > { %737 = vmatmul.f32.gmra.mxu2 %v3604_v7 }
 0x345   : > { %740 = vmatmul.f32.gmra.mxu2 %v3610_v8 }
 0x34d   : > { %743 = vmatmul.f32.gmra.mxu2 %v3616_v15 }
 0x3b8   : > { %v735_v39 = vpop.f32.mrf.mxu2 }
 0x3b9   : > { %v747_v1 = vmul.f32 0.0009765625, %v735_v39 }
 0x3bb   : > { %v751_v41 = vadd.f32 1e-05, %v747_v1 }
 0x3bd   : > { %vm761_vm11 = vweird.f32 %v751_v41 }
 0x3c0   : > { %v738_v6 = vpop.f32.mrf.mxu2 }
 0x3c1   : > { %v748_v0 = vmul.f32 0.0009765625, %v738_v6 }
 0x3c3   : > { %v752_v22 = vadd.f32 1e-05, %v748_v0 }
 0x3c5   : > { %3228 = vrsqrt.f32 %v752_v22  ;;  %vm771_vm8 = vweird.f32 %v752_v22 }
 0x3c8   : > { %v741_v23 = vpop.f32.mrf.mxu2 }
 0x3c9   : > { %v749_v40 = vmul.f32 0.0009765625, %v741_v23 }
 0x3cb   : > { %v753_v45 = vadd.f32 1e-05, %v749_v40  ;;  %v3229_v29 = vpop.eup %3228 }
 0x3cc   : > { %v766_v15 = vmul.f32 %v3229_v29, %v752_v22  ;;  %vm772_vm6 = vweird.f32 %v3229_v29 }
 0x3cd   : > { %3230 = vrsqrt.f32 %v753_v45  ;;  %vm781_vm5 = vweird.f32 %v753_v45  ;;  %vm773_vm10 = vmor %vm771_vm8, %vm772_vm6 }
 0x3ce   : > { %3232 = vrsqrt.f32 %v751_v41  ;;  %v767_v32 = vmul.f32 %v3229_v29, %v766_v15 }
 0x3d0   : > { %v744_v19 = vpop.f32.mrf.mxu2  ;;  %v768_v23 = vmul.f32 0.5, %v767_v32  ;;  %v1061_v32 = vld [vmem:[%s5195_s4 + $0xc8] sm:$0xff] }
 0x3d1   : > { %v750_v63 = vmul.f32 0.0009765625, %v744_v19 }
 0x3d2   : > { %v769_v28 = vsub.f32 1.5, %v768_v23  ;;  %v1049_v23 = vld [vmem:[%s5195_s4 + $0x68] sm:$0xff] }
 0x3d3   : > { %v3231_v7 = vpop.eup %3230  ;;  %v754_v60 = vadd.f32 1e-05, %v750_v63 }
 0x3d4   : > { %v3233_v8 = vpop.eup %3232  ;;  %v776_v13 = vmul.f32 %v3231_v7, %v753_v45  ;;  %vm782_vm3 = vweird.f32 %v3231_v7  ;;  %v770_v15 = vmul.f32 %v3229_v29, %v769_v28 }
 0x3d5   : > { %3234 = vrsqrt.f32 %v754_v60  ;;  %v756_v11 = vmul.f32 %v3233_v8, %v751_v41  ;;  %vm791_vm2 = vweird.f32 %v754_v60  ;;  %vm783_vm7 = vmor %vm781_vm5, %vm782_vm3  ;;  %vm762_vm9 = vweird.f32 %v3233_v8 }
 0x3d6   : > { %v777_v36 = vmul.f32 %v3231_v7, %v776_v13  ;;  %vm763_vm12 = vmor %vm761_vm11, %vm762_vm9 }
 0x3d7   : > { %v757_v39 = vmul.f32 %v3233_v8, %v756_v11 }
 0x3d8   : > { %v778_v0 = vmul.f32 0.5, %v777_v36 }
 0x3d9   : > { %v758_v40 = vmul.f32 0.5, %v757_v39  ;;  %v1057_v39 = vld [vmem:[%s5195_s4 + $0xa8] sm:$0xff] }
 0x3da   : > { %v779_v14 = vsub.f32 1.5, %v778_v0  ;;  %v1056_v0 = vld [vmem:[%s5195_s4 + $0xa0] sm:$0xff] }
 0x3db   : > { %v3235_v24 = vpop.eup %3234  ;;  %v759_v63 = vsub.f32 1.5, %v758_v40  ;;  %v1059_v40 = vld [vmem:[%s5195_s4 + $0xb8] sm:$0xff] }
 0x3dc   : > { %v786_v6 = vmul.f32 %v3235_v24, %v754_v60  ;;  %vm792_vm1 = vweird.f32 %v3235_v24  ;;  %v780_v33 = vmul.f32 %v3231_v7, %v779_v14  ;;  %v1058_v60 = vld [vmem:[%s5195_s4 + $0xb0] sm:$0xff] }
 0x3dd   : > { %vm793_vm4 = vmor %vm791_vm2, %vm792_vm1  ;;  %v760_v36 = vmul.f32 %v3233_v8, %v759_v63  ;;  %v1046_v63 = vld [vmem:[%s5195_s4 + $0x50] sm:$0xff] }
 0x3de   : > { %v787_v1 = vmul.f32 %v3235_v24, %v786_v6  ;;  %v784_v11 = vsel %vm783_vm7, %v3231_v7, %v780_v33  ;;  %v1055_v7 = vld [vmem:[%s5195_s4 + $0x98] sm:$0xff]  ;;  %v1050_v6 = vld [vmem:[%s5195_s4 + $0x70] sm:$0xff] }
 0x3df   : > { %v764_v14 = vsel %vm763_vm12, %v3233_v8, %v760_v36  ;;  %v1054_v8 = vld [vmem:[%s5195_s4 + $0x90] sm:$0xff]  ;;  %v1051_v36 = vld [vmem:[%s5195_s4 + $0x78] sm:$0xff] }
 0x3e0   : > { %v788_v31 = vmul.f32 0.5, %v787_v1  ;;  %v1060_v1 = vld [vmem:[%s5195_s4 + $0xc0] sm:$0xff] }
 0x3e2   : > { %v789_v19 = vsub.f32 1.5, %v788_v31  ;;  %v774_v31 = vsel %vm773_vm10, %v3229_v29, %v770_v15  ;;  %v1052_v29 = vld [vmem:[%s5195_s4 + $0x80] sm:$0xff] }
 0x3e3   : > { %v1048_v15 = vld [vmem:[%s5195_s4 + $0x60] sm:$0xff] }
 0x3e4   : > { %v790_v27 = vmul.f32 %v3235_v24, %v789_v19  ;;  %v1063_v19 = vld [vmem:[%s5195_s4 + $0xd8] sm:$0xff] }
 0x3e6   : > { %v794_v13 = vsel %vm793_vm4, %v3235_v24, %v790_v27  ;;  %v1053_v24 = vld [vmem:[%s5195_s4 + $0x88] sm:$0xff] }
 0x3e7   : > { %807 = vmatpush.msrb.mxu2 %v794_v13  ;;  %3212 = vmatpush.msra.mxu3 %v794_v13  ;;  %v1062_v13 = vld [vmem:[%s5195_s4 + $0xd0] sm:$0xff] }
 0x3e9   : > { %808 = vmatpush.msrb.mxu2 %v784_v11  ;;  %3213 = vmatpush.msra.mxu3 %v784_v11  ;;  %v1067_v11 = vld [vmem:[%s5195_s4 + $0xf8] sm:$0xff] }
 0x3eb   : > { %809 = vmatpush.msrb.mxu2 %v774_v31  ;;  %3214 = vmatpush.msra.mxu3 %v774_v31  ;;  %v1065_v31 = vld [vmem:[%s5195_s4 + $0xe8] sm:$0xff] }
 0x3ed   : > { %810 = vmatpush.msrb.mxu2 %v764_v14  ;;  %3215 = vmatpush.msra.mxu3 %v764_v14  ;;  %v1042_v14 = vld [vmem:[%s5195_s4 + $0x30] sm:$0xff] }
 0x3ee   : > { %3032 = vmatmul.msk.f32.vlgmr.msra.gmra.mxu3 %vm412_vm0, %v3622_v42  ;;  %3028 = vmatmul.msk.f32.vlgmr.msrb.gmra.mxu2 %vm412_vm0, %v3650_v48  ;;  %v5243_v42 = vld [vmem:[#allocation2_spill] sm:$0xff] }
 0x3f6   : > { %3033 = vmatmul.msk.f32.gmra.mxu3 %vm412_vm0, %v3629_v43  ;;  %3029 = vmatmul.msk.f32.gmra.mxu2 %vm412_vm0, %v3664_v50  ;;  %v5244_v43 = vld [vmem:[#allocation3_spill] sm:$0xff] }
 0x3fe   : > { %3034 = vmatmul.msk.f32.gmra.mxu3 %vm412_vm0, %v3636_v44  ;;  %3030 = vmatmul.msk.f32.gmra.mxu2 %vm412_vm0, %v3678_v52  ;;  %v5245_v44 = vld [vmem:[#allocation4_spill] sm:$0xff] }
 0x406   : > { %3035 = vmatmul.msk.f32.gmra.mxu3 %vm412_vm0, %v3643_v47  ;;  %3031 = vmatmul.msk.f32.gmra.mxu2 %vm412_vm0, %v3692_v54 }
 0x40e   : > { %3036 = vmatmul.msk.f32.gmra.mxu3 %vm412_vm0, %v3657_v49 }
 0x416   : > { %3037 = vmatmul.msk.f32.gmra.mxu3 %vm412_vm0, %v3671_v51 }
 0x41e   : > { %3038 = vmatmul.msk.f32.gmra.mxu3 %vm412_vm0, %v3685_v53 }
 0x426   : > { %3039 = vmatmul.msk.f32.gmra.mxu3 %vm412_vm0, %v3699_v55 }
 0x42e   : > { %3040 = vmatmul.msk.f32.gmra.mxu3 %vm412_vm0, %v3706_v56 }
 0x436   : > { %3041 = vmatmul.msk.f32.gmra.mxu3 %vm412_vm0, %v5243_v42  ;;  %v1064_v42 = vld [vmem:[%s5195_s4 + $0xe0] sm:$0xff] }
 0x43e   : > { %3042 = vmatmul.msk.f32.gmra.mxu3 %vm412_vm0, %v5244_v43  ;;  %v1066_v43 = vld [vmem:[%s5195_s4 + $0xf0] sm:$0xff] }
 0x446   : > { %3043 = vmatmul.msk.f32.gmra.mxu3 %vm412_vm0, %v5245_v44  ;;  %v1041_v44 = vld [vmem:[%s5195_s4 + $0x28] sm:$0xff] }
 0x471   : > { %v824_v47 = vpop.f32.mrf.mxu3  ;;  %v812_v55 = vpop.f32.mrf.mxu2 }
 0x479   : > { %v827_v48 = vpop.f32.mrf.mxu3  ;;  %v815_v33 = vpop.f32.mrf.mxu2 }
 0x481   : > { %v830_v49 = vpop.f32.mrf.mxu3  ;;  %v818_v28 = vpop.f32.mrf.mxu2 }
 0x489   : > { %v833_v50 = vpop.f32.mrf.mxu3  ;;  %v821_v41 = vpop.f32.mrf.mxu2 }
 0x491   : > { %v836_v51 = vpop.f32.mrf.mxu3 }
 0x499   : > { %v839_v52 = vpop.f32.mrf.mxu3 }
 0x4a1   : > { %v842_v53 = vpop.f32.mrf.mxu3 }
 0x4a2   : > { %912 = vperm.xlu0 %3227, %v842_v53   ;;  %v1040_v53 = vld [vmem:[%s5195_s4 + $0x20] sm:$0xff] }
 0x4a9   : > { %v845_v54 = vpop.f32.mrf.mxu3 }
 0x4b1   : > { %v848_v56 = vpop.f32.mrf.mxu3 }
 0x4b2   : > { %922 = vperm.xlu0 %3227, %v848_v56  }
 0x4b9   : > { %v851_v27 = vpop.f32.mrf.mxu3 }
 0x4ba   : > { %907 = vperm.xlu0 %3227, %v839_v52   ;;  %927 = vperm.xlu1 %3225, %v851_v27   ;;  %v1044_v52 = vld [vmem:[%s5195_s4 + $0x40] sm:$0xff]  ;;  %v1039_v27 = vld [vmem:[%s5195_s4 + $0x18] sm:$0xff] }
 0x4c1   : > { %v854_v22 = vpop.f32.mrf.mxu3 }
 0x4c2   : > { %882 = vperm.xlu0 %3227, %v824_v47   ;;  %932 = vperm.xlu1 %3225, %v854_v22   ;;  %v1047_v47 = vld [vmem:[%s5195_s4 + $0x58] sm:$0xff]  ;;  %v1070_v22 = vld [vmem:[%s5195_s4 + $0x110] sm:$0xff] }
 0x4c9   : > { %v857_v45 = vpop.f32.mrf.mxu3 }
 0x4ca   : > { %902 = vperm.xlu1 %3225, %v836_v51   ;;  %937 = vperm.xlu2 %3226, %v857_v45  }
 0x4cb   : > { %877 = vperm.xlu0 %3227, %v821_v41  }
 0x4d2   : > { %897 = vperm.xlu1 %3225, %v833_v50   ;;  %917 = vperm.xlu2 %3226, %v845_v54   ;;  %v1068_v54 = vld [vmem:[%s5195_s4 + $0x100] sm:$0xff] }
 0x4d3   : > { %1166 = vperm.xlu0 %3227, %v1052_v29  }
 0x4da   : > { %892 = vperm.xlu2 %3226, %v830_v49   ;;  %872 = vperm.xlu1 %3225, %v818_v28   ;;  %v1036_v49 = vld [vmem:[%s5195_s4] sm:$0xff] }
 0x4db   : > { %1181 = vperm.xlu0 %3227, %v1055_v7  }
 0x4e2   : > { %887 = vperm.xlu2 %3226, %v827_v48   ;;  %867 = vperm.xlu1 %3225, %v815_v33   ;;  %v1045_v48 = vld [vmem:[%s5195_s4 + $0x48] sm:$0xff]  ;;  %v1043_v33 = vld [vmem:[%s5195_s4 + $0x38] sm:$0xff] }
 0x4e3   : > { %1196 = vperm.xlu0 %3227, %v1058_v60  }
 0x4ea   : > { %862 = vperm.xlu2 %3226, %v812_v55   ;;  %1176 = vperm.xlu1 %3225, %v1054_v8  }
 0x4eb   : > { %1211 = vperm.xlu0 %3227, %v1061_v32  }
 0x4f2   : > { %1171 = vperm.xlu2 %3226, %v1053_v24   ;;  %1191 = vperm.xlu1 %3225, %v1057_v39  }
 0x4f3   : > { %1156 = vperm.xlu0 %3227, %v1050_v6  }
 0x4fa   : > { %1186 = vperm.xlu2 %3226, %v1056_v0   ;;  %1206 = vperm.xlu1 %3225, %v1060_v1   ;;  %v1038_v0 = vld [vmem:[%s5195_s4 + $0x10] sm:$0xff] }
 0x4fb   : > { %1151 = vperm.xlu0 %3227, %v1049_v23   ;;  %v5246_v23 = vld [vmem:[#allocation5_spill] sm:$0xff] }
 0x502   : > { %1201 = vperm.xlu2 %3226, %v1059_v40   ;;  %1221 = vperm.xlu1 %3225, %v1063_v19  }
 0x503   : > { %1136 = vperm.xlu0 %3227, %v1046_v63  }
 0x50a   : > { %1216 = vperm.xlu2 %3226, %v1062_v13   ;;  %1146 = vperm.xlu1 %3225, %v1048_v15  }
 0x50b   : > { %1241 = vperm.xlu0 %3227, %v1067_v11  }
 0x512   : > { %1161 = vperm.xlu2 %3226, %v1051_v36   ;;  %1231 = vperm.xlu1 %3225, %v1065_v31   ;;  %v1074_v31 = vld [vmem:[%s5195_s4 + $0x130] sm:$0xff] }
 0x513   : > { %1116 = vperm.xlu0 %3227, %v1042_v14  }
 0x514   : > { %v913_v50 = vpop.permute.xlu0 %912 }
 0x515   : > { %v960_v63 = vmul.f32 %v913_v50, %v3837_v9  ;;  %v961_v13 = vmul.f32 %v913_v50, %v3841_v18 }
 0x51a   : > { %1226 = vperm.xlu2 %3226, %v1064_v42   ;;  %1236 = vperm.xlu1 %3225, %v1066_v43  }
 0x51b   : > { %1111 = vperm.xlu0 %3227, %v1041_v44  }
 0x522   : > { %1141 = vperm.xlu2 %3226, %v1047_v47   ;;  %1131 = vperm.xlu1 %3225, %v1045_v48  }
 0x523   : > { %1086 = vperm.xlu0 %3227, %v1036_v49  }
 0x524   : > { %v938_v51 = vpop.permute.xlu2 %937  ;;  %v923_v55 = vpop.permute.xlu0 %922 }
 0x525   : > { %v970_v45 = vmul.f32 %v938_v51, %v3818_v4  ;;  %v971_v29 = vmul.f32 %v938_v51, %v3821_v38  ;;  %v1072_v4 = vld [vmem:[%s5195_s4 + $0x120] sm:$0xff]  ;;  %v964_v38 = vmul.f32 %v923_v55, %v3736_v59 }
 0x52a   : > { %1126 = vperm.xlu2 %3226, %v1044_v52   ;;  %1106 = vperm.xlu1 %3225, %v1040_v53  }
 0x52b   : > { %1246 = vperm.xlu0 %3227, %v1068_v54  }
 0x52c   : > { %v928_v56 = vpop.permute.xlu1 %927  ;;  %v918_v28 = vpop.permute.xlu2 %917 }
 0x52d   : > { %v908_v7 = vpop.permute.xlu0 %907  ;;  %v966_v32 = vmul.f32 %v928_v56, %v3776_v12  ;;  %v967_v24 = vmul.f32 %v928_v56, %v3779_v16  ;;  %v962_v1 = vmul.f32 %v918_v28, %v3746_v35  ;;  %v963_v40 = vmul.f32 %v918_v28, %v5246_v23  ;;  %v1037_v35 = vld [vmem:[%s5195_s4 + $0x8] sm:$0xff]  ;;  %v1079_v23 = vld [vmem:[%s5195_s4 + $0x158] sm:$0xff] }
 0x52e   : > { %v958_v9 = vmul.f32 %v908_v7, %v3786_v17  ;;  %v959_v18 = vmul.f32 %v908_v7, %v3789_v58  ;;  %v5247_v58 = vld [vmem:[#allocation6_spill] sm:$0xff] }
 0x52f   : > { %v1032_v12 = vpack.c.bf16 %v966_v32, %v964_v38  ;;  %v1030_v59 = vpack.c.bf16 %v962_v1, %v960_v63  ;;  %v5252_v32 = vld [vmem:[#allocation11_spill] sm:$0xff]  ;;  %v3176_v38 = vld [vmem:[%s5194_s3] sm:$0xff] }
 0x530   : > { %v3177_v1 = vld [vmem:[%s5194_s3 + $0x8] sm:$0xff]  ;;  %v2792_v63 = vld [vmem:[%s5197_s6 + $0x20] sm:$0xff] }
 0x532   : > { %1121 = vperm.xlu2 %3226, %v1043_v33   ;;  %1101 = vperm.xlu1 %3225, %v1039_v27   ;;  %v5248_v27 = vld [vmem:[#allocation7_spill] sm:$0xff] }
 0x533   : > { %1256 = vperm.xlu0 %3227, %v1070_v22   ;;  %v1071_v22 = vld [vmem:[%s5195_s4 + $0x118] sm:$0xff] }
 0x534   : > { %v933_v41 = vpop.permute.xlu1 %932 }
 0x535   : > { %v968_v60 = vmul.f32 %v933_v41, %v3756_v26  ;;  %v969_v8 = vmul.f32 %v933_v41, %v3759_v57  ;;  %v965_v26 = vmul.f32 %v923_v55, %v3739_v62  ;;  %v893_v57 = vpop.permute.xlu2 %892  ;;  %v1031_v62 = vpack.c.bf16 %v963_v40, %v961_v13  ;;  %v883_v15 = vpop.permute.xlu0 %882  ;;  %v1078_v41 = vld [vmem:[%s5195_s4 + $0x150] sm:$0xff] }
 0x536   : > { %v953_v44 = vmul.f32 %v893_v57, %v3815_v21  ;;  %v1076_v21 = vld [vmem:[%s5195_s4 + $0x140] sm:$0xff]  ;;  %v2790_v40 = vld [vmem:[%s5197_s6 + $0x10] sm:$0xff] }
 0x537   : > { %v1034_v39 = vpack.c.bf16 %v970_v45, %v968_v60  ;;  %v1035_v6 = vpack.c.bf16 %v971_v29, %v969_v8  ;;  %v1033_v16 = vpack.c.bf16 %v967_v24, %v965_v26  ;;  %v5250_v29 = vld [vmem:[#allocation9_spill] sm:$0xff]  ;;  %v5251_v60 = vld [vmem:[#allocation10_spill] sm:$0xff]  ;;  %v3178_v13 = vld [vmem:[%s5194_s3 + $0x10] sm:$0xff] }
 0x538   : > { %v1075_v26 = vld [vmem:[%s5195_s4 + $0x138] sm:$0xff] }
 0x539   : > { %1468 = vmatpush.bf16.msra.mxu0 %v1034_v39  ;;  %1597 = vmatpush.bf16.msra.mxu2 %v1035_v6 }
 0x53a   : > { %1096 = vperm.xlu2 %3226, %v1038_v0   ;;  %v1073_v0 = vld [vmem:[%s5195_s4 + $0x128] sm:$0xff] }
 0x53b   : > { %1266 = vperm.xlu0 %3227, %v1072_v4   ;;  %v1080_v4 = vld [vmem:[%s5195_s4 + $0x160] sm:$0xff] }
 0x53c   : > { %v903_v19 = vpop.permute.xlu1 %902 }
 0x53d   : > { %1469 = vmatpush.bf16.msra.mxu0 %v1032_v12  ;;  %1598 = vmatpush.bf16.msra.mxu2 %v1033_v16  ;;  %v956_v11 = vmul.f32 %v903_v19, %v3766_v61  ;;  %v957_v36 = vmul.f32 %v903_v19, %v3769_v34  ;;  %v952_v61 = vmul.f32 %v893_v57, %v3812_v20  ;;  %v888_v34 = vpop.permute.xlu2 %887  ;;  %v1069_v20 = vld [vmem:[%s5195_s4 + $0x108] sm:$0xff]  ;;  %v878_v52 = vpop.permute.xlu0 %877  ;;  %v1082_v57 = vld [vmem:[%s5195_s4 + $0x170] sm:$0xff]  ;;  %v2788_v16 = vld [vmem:[%s5197_s6] sm:$0xff] }
 0x53e   : > { %v950_v17 = vmul.f32 %v888_v34, %v3792_v5  ;;  %v951_v49 = vmul.f32 %v888_v34, %v5247_v58  ;;  %v946_v54 = vmul.f32 %v878_v52, %v3844_v3  ;;  %v947_v56 = vmul.f32 %v878_v52, %v3847_v10  ;;  %v5249_v10 = vld [vmem:[#allocation8_spill] sm:$0xff]  ;;  %v1077_v12 = vld [vmem:[%s5195_s4 + $0x148] sm:$0xff] }
 0x53f   : > { %v1028_v14 = vpack.c.bf16 %v958_v9, %v956_v11  ;;  %v1029_v42 = vpack.c.bf16 %v959_v18, %v957_v36  ;;  %v1081_v19 = vld [vmem:[%s5195_s4 + $0x168] sm:$0xff]  ;;  %v2794_v11 = vld [vmem:[%s5197_s6 + $0x30] sm:$0xff]  ;;  %v2796_v9 = vld [vmem:[%s5197_s6 + $0x40] sm:$0xff] }
 0x540   : > { %v3179_v18 = vld [vmem:[%s5194_s3 + $0x18] sm:$0xff] }
 0x541   : > { %1470 = vmatpush.bf16.msra.mxu0 %v1030_v59  ;;  %1599 = vmatpush.bf16.msra.mxu2 %v1031_v62 }
 0x542   : > { %1091 = vperm.xlu2 %3226, %v1037_v35  }
 0x543   : > { %1276 = vperm.xlu0 %3227, %v1074_v31   ;;  %v2789_v31 = vld [vmem:[%s5197_s6 + $0x8] sm:$0xff] }
 0x544   : > { %v898_v43 = vpop.permute.xlu1 %897 }
 0x545   : > { %v954_v47 = vmul.f32 %v898_v43, %v3859_v37  ;;  %v955_v48 = vmul.f32 %v898_v43, %v3863_v2  ;;  %1471 = vmatpush.bf16.msra.mxu0 %v1028_v14  ;;  %1600 = vmatpush.bf16.msra.mxu2 %v1029_v42  ;;  %v948_v37 = vmul.f32 %v883_v15, %v3880_v25  ;;  %v863_v3 = vpop.permute.xlu2 %862  ;;  %v4126_v59 = vpop.permute.xlu0 %1166  ;;  %v2791_v14 = vld [vmem:[%s5197_s6 + $0x18] sm:$0xff] }
 0x546   : > { %v949_v2 = vmul.f32 %v883_v15, %v3883_v46  ;;  %v940_v45 = vmul.f32 %v863_v3, %v5249_v10  ;;  %v941_v7 = vmul.f32 %v863_v3, %v5250_v29  ;;  %v1083_v15 = vld [vmem:[%s5195_s4 + $0x178] sm:$0xff] }
 0x547   : > { %v1026_v50 = vpack.c.bf16 %v954_v47, %v952_v61  ;;  %v1027_v51 = vpack.c.bf16 %v955_v48, %v953_v44  ;;  %v1024_v5 = vpack.c.bf16 %v950_v17, %v948_v37  ;;  %v2798_v61 = vld [vmem:[%s5197_s6 + $0x50] sm:$0xff]  ;;  %v2793_v44 = vld [vmem:[%s5197_s6 + $0x28] sm:$0xff]  ;;  %v2800_v47 = vld [vmem:[%s5197_s6 + $0x60] sm:$0xff] }
 0x548   : > { %v1025_v53 = vpack.c.bf16 %v951_v49, %v949_v2  ;;  %v3180_v48 = vld [vmem:[%s5194_s3 + $0x20] sm:$0xff]  ;;  %v2795_v49 = vld [vmem:[%s5197_s6 + $0x38] sm:$0xff]  ;;  %v2797_v37 = vld [vmem:[%s5197_s6 + $0x48] sm:$0xff] }
 0x549   : > { %1472 = vmatpush.bf16.msra.mxu0 %v1026_v50  ;;  %1601 = vmatpush.bf16.msra.mxu2 %v1027_v51  ;;  %v2802_v50 = vld [vmem:[%s5197_s6 + $0x70] sm:$0xff]  ;;  %v3181_v2 = vld [vmem:[%s5194_s3 + $0x28] sm:$0xff]  ;;  %v3183_v3 = vld [vmem:[%s5194_s3 + $0x38] sm:$0xff] }
 0x54a   : > { %1251 = vperm.xlu2 %3226, %v1069_v20  }
 0x54b   : > { %1286 = vperm.xlu0 %3227, %v1076_v21  }
 0x54c   : > { %v873_v55 = vpop.permute.xlu1 %872 }
 0x54d   : > { %v944_v33 = vmul.f32 %v873_v55, %v3806_v30  ;;  %v945_v28 = vmul.f32 %v873_v55, %v5248_v27  ;;  %1473 = vmatpush.bf16.msra.mxu0 %v1024_v5  ;;  %1602 = vmatpush.bf16.msra.mxu2 %v1025_v53  ;;  %v4128_v62 = vpop.permute.xlu2 %1171  ;;  %v4136_v36 = vpop.permute.xlu0 %1181  ;;  %v3182_v27 = vld [vmem:[%s5194_s3 + $0x30] sm:$0xff] }
 0x54f   : > { %v1022_v25 = vpack.c.bf16 %v946_v54, %v944_v33  ;;  %v1023_v46 = vpack.c.bf16 %v947_v56, %v945_v28  ;;  %v2799_v54 = vld [vmem:[%s5197_s6 + $0x58] sm:$0xff]  ;;  %v2801_v56 = vld [vmem:[%s5197_s6 + $0x68] sm:$0xff] }
 0x551   : > { %1474 = vmatpush.bf16.msra.mxu0 %v1022_v25  ;;  %1603 = vmatpush.bf16.msra.mxu2 %v1023_v46  ;;  %v2803_v46 = vld [vmem:[%s5197_s6 + $0x78] sm:$0xff] }
 0x552   : > { %1261 = vperm.xlu2 %3226, %v1071_v22  }
 0x553   : > { %1296 = vperm.xlu0 %3227, %v1078_v41  }
 0x554   : > { %v868_v30 = vpop.permute.xlu1 %867 }
 0x555   : > { %v942_v8 = vmul.f32 %v868_v30, %v5251_v60  ;;  %v943_v24 = vmul.f32 %v868_v30, %v5252_v32  ;;  %v4138_v35 = vpop.permute.xlu2 %1186  ;;  %v4152_v42 = vpop.permute.xlu0 %1196 }
 0x557   : > { %v1020_v39 = vpack.c.bf16 %v942_v8, %v940_v45  ;;  %v1021_v6 = vpack.c.bf16 %v943_v24, %v941_v7  ;;  %v3184_v8 = vld [vmem:[%s5194_s3 + $0x40] sm:$0xff] }
 0x559   : > { %1475 = vmatpush.bf16.msra.mxu0 %v1020_v39  ;;  %1604 = vmatpush.bf16.msra.mxu2 %v1021_v6 }
 0x55a   : > { %1271 = vperm.xlu2 %3226, %v1073_v0  }
 0x55b   : > { %1306 = vperm.xlu0 %3227, %v1080_v4  }
 0x55c   : > { %1476 = vmatmul.bf16.vlgmr.msra.gmra.mxu0 %v3176_v38  ;;  %1605 = vmatmul.bf16.vlgmr.msra.gmra.mxu2 %v3176_v38  ;;  %v4159_v43 = vpop.permute.xlu1 %1176 }
 0x55d   : > { %v4157_v34 = vpop.permute.xlu2 %1201  ;;  %v4170_v17 = vpop.permute.xlu0 %1211 }
 0x562   : > { %1281 = vperm.xlu2 %3226, %v1075_v26  }
 0x563   : > { %1316 = vperm.xlu0 %3227, %v1082_v57  }
 0x564   : > { %v4180_v51 = vpop.permute.xlu1 %1191 }
 0x565   : > { %v4172_v58 = vpop.permute.xlu2 %1216  ;;  %v4182_v20 = vpop.permute.xlu0 %1156 }
 0x56a   : > { %1291 = vperm.xlu2 %3226, %v1077_v12  }
 0x56b   : > { %2806 = vperm.xlu0 %3227, %v2788_v16  }
 0x56c   : > { %1481 = vmatmul.bf16.gmra.mxu0 %v3177_v1  ;;  %1610 = vmatmul.bf16.gmra.mxu2 %v3177_v1  ;;  %v4192_v52 = vpop.permute.xlu1 %1206 }
 0x56d   : > { %v4184_v21 = vpop.permute.xlu2 %1161  ;;  %v4194_v5 = vpop.permute.xlu0 %1151 }
 0x572   : > { %1301 = vperm.xlu2 %3226, %v1079_v23  }
 0x573   : > { %2816 = vperm.xlu0 %3227, %v2790_v40   ;;  %v3185_v40 = vld [vmem:[%s5194_s3 + $0x48] sm:$0xff] }
 0x574   : > { %v4201_v55 = vpop.permute.xlu1 %1221 }
 0x575   : > { %v4196_v53 = vpop.permute.xlu2 %1226  ;;  %v4206_v33 = vpop.permute.xlu0 %1136 }
 0x57a   : > { %1311 = vperm.xlu2 %3226, %v1081_v19  }
 0x57b   : > { %2826 = vperm.xlu0 %3227, %v2792_v63  }
 0x57c   : > { %1486 = vmatmul.bf16.gmra.mxu0 %v3178_v13  ;;  %1615 = vmatmul.bf16.gmra.mxu2 %v3178_v13  ;;  %v4213_v25 = vpop.permute.xlu1 %1146 }
 0x57d   : > { %v4211_v28 = vpop.permute.xlu2 %1141  ;;  %v4218_v22 = vpop.permute.xlu0 %1241 }
 0x57e   : > { %5253 = vst [vmem:[#allocation2_spill] sm:$0xff] %v4218_v22 }
 0x582   : > { %1321 = vperm.xlu2 %3226, %v1083_v15  }
 0x583   : > { %2836 = vperm.xlu0 %3227, %v2794_v11  }
 0x584   : > { %v4225_v30 = vpop.permute.xlu1 %1231 }
 0x585   : > { %v4220_v41 = vpop.permute.xlu2 %1126  ;;  %v1117_v10 = vpop.permute.xlu0 %1116 }
 0x58a   : > { %2811 = vperm.xlu2 %3226, %v2789_v31  }
 0x58b   : > { %2846 = vperm.xlu0 %3227, %v2796_v9  }
 0x58c   : > { %1491 = vmatmul.bf16.gmra.mxu0 %v3179_v18  ;;  %1620 = vmatmul.bf16.gmra.mxu2 %v3179_v18  ;;  %v4227_v29 = vpop.permute.xlu1 %1236 }
 0x58d   : > { %v1122_v45 = vpop.permute.xlu2 %1121  ;;  %5254 = vst [vmem:[#allocation3_spill] sm:$0xff] %v4227_v29  ;;  %v1112_v7 = vpop.permute.xlu0 %1111 }
 0x592   : > { %2821 = vperm.xlu2 %3226, %v2791_v14  }
 0x593   : > { %2856 = vperm.xlu0 %3227, %v2798_v61  }
 0x594   : > { %v4232_v24 = vpop.permute.xlu1 %1131 }
 0x595   : > { %v1097_v60 = vpop.permute.xlu2 %1096  ;;  %v1087_v6 = vpop.permute.xlu0 %1086 }
 0x59a   : > { %2831 = vperm.xlu2 %3226, %v2793_v44  }
 0x59b   : > { %2866 = vperm.xlu0 %3227, %v2800_v47   ;;  %v3186_v47 = vld [vmem:[%s5194_s3 + $0x50] sm:$0xff] }
 0x59c   : > { %1496 = vmatmul.bf16.gmra.mxu0 %v3180_v48  ;;  %1625 = vmatmul.bf16.gmra.mxu2 %v3180_v48  ;;  %v1107_v12 = vpop.permute.xlu1 %1106 }
 0x59d   : > { %v1092_v0 = vpop.permute.xlu2 %1091 }
 0x5a2   : > { %2841 = vperm.xlu2 %3226, %v2795_v49  }
 0x5a3   : > { %2876 = vperm.xlu0 %3227, %v2802_v50  }
 0x5a4   : > { %v1102_v15 = vpop.permute.xlu1 %1101 }
 0x5aa   : > { %2851 = vperm.xlu2 %3226, %v2797_v37  }
 0x5ac   : > { %1501 = vmatmul.bf16.gmra.mxu0 %v3181_v2  ;;  %1630 = vmatmul.bf16.gmra.mxu2 %v3181_v2 }
 0x5b2   : > { %2861 = vperm.xlu2 %3226, %v2799_v54  }
 0x5ba   : > { %2871 = vperm.xlu2 %3226, %v2801_v56  }
 0x5bc   : > { %1506 = vmatmul.bf16.gmra.mxu0 %v3182_v27  ;;  %1635 = vmatmul.bf16.gmra.mxu2 %v3182_v27 }
 0x5c2   : > { %2881 = vperm.xlu2 %3226, %v2803_v46  }
 0x5cc   : > { %1511 = vmatmul.bf16.gmra.mxu0 %v3183_v3  ;;  %1640 = vmatmul.bf16.gmra.mxu2 %v3183_v3 }
 0x5d9   : > { %v1477_v32 = vpop.f32.mrf.mxu0 }
 0x5da   : > { %v4234_v38 = vadd.f32 %v1477_v32, %v1087_v6 }
 0x5dc   : > { %1516 = vmatmul.bf16.gmra.mxu0 %v3184_v8  ;;  %1645 = vmatmul.bf16.gmra.mxu2 %v3184_v8 }
 0x5df   : > { %v1606_v39 = vpop.f32.mrf.mxu2 }
 0x5e0   : > { %v4240_v1 = vadd.f32 %v1606_v39, %v1087_v6 }
 0x5e1   : > { %v1479_v4 = vpop.f32.mrf.mxu0 }
 0x5e2   : > { %v4236_v26 = vadd.f32 %v1479_v4, %v1092_v0 }
 0x5e7   : > { %v1608_v16 = vpop.f32.mrf.mxu2 }
 0x5e8   : > { %v4242_v23 = vadd.f32 %v1608_v16, %v1092_v0 }
 0x5e9   : > { %v1482_v19 = vpop.f32.mrf.mxu0 }
 0x5ea   : > { %v4249_v31 = vadd.f32 %v1482_v19, %v1097_v60  ;;  %v3188_v19 = vld [vmem:[%s5194_s3 + $0x60] sm:$0xff] }
 0x5ec   : > { %1521 = vmatmul.bf16.gmra.mxu0 %v3185_v40  ;;  %1650 = vmatmul.bf16.gmra.mxu2 %v3185_v40 }
 0x5ef   : > { %v1611_v13 = vpop.f32.mrf.mxu2 }
 0x5f0   : > { %v4255_v61 = vadd.f32 %v1611_v13, %v1097_v60  ;;  %v3187_v60 = vld [vmem:[%s5194_s3 + $0x58] sm:$0xff] }
 0x5f1   : > { %v1484_v11 = vpop.f32.mrf.mxu0 }
 0x5f2   : > { %v4251_v9 = vadd.f32 %v1484_v11, %v1102_v15 }
 0x5f7   : > { %v1613_v14 = vpop.f32.mrf.mxu2 }
 0x5f8   : > { %v4257_v44 = vadd.f32 %v1613_v14, %v1102_v15 }
 0x5f9   : > { %v1487_v48 = vpop.f32.mrf.mxu0 }
 0x5fa   : > { %v4264_v2 = vadd.f32 %v1487_v48, %v1107_v12 }
 0x5fc   : > { %1526 = vmatmul.bf16.gmra.mxu0 %v3186_v47  ;;  %1655 = vmatmul.bf16.gmra.mxu2 %v3186_v47 }
 0x5ff   : > { %v1616_v50 = vpop.f32.mrf.mxu2 }
 0x600   : > { %v4270_v46 = vadd.f32 %v1616_v50, %v1107_v12 }
 0x601   : > { %v1489_v37 = vpop.f32.mrf.mxu0 }
 0x602   : > { %v4266_v54 = vadd.f32 %v1489_v37, %v1112_v7 }
 0x607   : > { %v1618_v27 = vpop.f32.mrf.mxu2 }
 0x608   : > { %v4272_v3 = vadd.f32 %v1618_v27, %v1112_v7  ;;  %v3190_v27 = vld [vmem:[%s5194_s3 + $0x70] sm:$0xff] }
 0x609   : > { %v1492_v8 = vpop.f32.mrf.mxu0 }
 0x60a   : > { %v4279_v0 = vadd.f32 %v1492_v8, %v1117_v10 }
 0x60c   : > { %1531 = vmatmul.bf16.gmra.mxu0 %v3187_v60  ;;  %1660 = vmatmul.bf16.gmra.mxu2 %v3187_v60 }
 0x60f   : > { %v1621_v39 = vpop.f32.mrf.mxu2 }
 0x610   : > { %v4285_v16 = vadd.f32 %v1621_v39, %v1117_v10  ;;  %v3189_v10 = vld [vmem:[%s5194_s3 + $0x68] sm:$0xff] }
 0x611   : > { %v1494_v6 = vpop.f32.mrf.mxu0 }
 0x612   : > { %v4281_v4 = vadd.f32 %v1494_v6, %v1122_v45 }
 0x617   : > { %v1623_v12 = vpop.f32.mrf.mxu2 }
 0x618   : > { %v4287_v40 = vadd.f32 %v1623_v12, %v1122_v45  ;;  %v3191_v12 = vld [vmem:[%s5194_s3 + $0x78] sm:$0xff] }
 0x619   : > { %v1497_v13 = vpop.f32.mrf.mxu0 }
 0x61c   : > { %1536 = vmatmul.bf16.gmra.mxu0 %v3188_v19  ;;  %1665 = vmatmul.bf16.gmra.mxu2 %v3188_v19 }
 0x61f   : > { %v1626_v11 = vpop.f32.mrf.mxu2 }
 0x621   : > { %v1499_v14 = vpop.f32.mrf.mxu0 }
 0x627   : > { %v1628_v47 = vpop.f32.mrf.mxu2 }
 0x629   : > { %v1502_v48 = vpop.f32.mrf.mxu0 }
 0x62c   : > { %1541 = vmatmul.bf16.gmra.mxu0 %v3189_v10  ;;  %1670 = vmatmul.bf16.gmra.mxu2 %v3189_v10 }
 0x62f   : > { %v1631_v45 = vpop.f32.mrf.mxu2 }
 0x631   : > { %v1504_v50 = vpop.f32.mrf.mxu0 }
 0x632   : > { %v1505_v56 = vadd.f32 %v1504_v50, %v4211_v28 }
 0x637   : > { %v1633_v37 = vpop.f32.mrf.mxu2 }
 0x639   : > { %v1507_v60 = vpop.f32.mrf.mxu0 }
 0x63c   : > { %1546 = vmatmul.bf16.gmra.mxu0 %v3190_v27  ;;  %1675 = vmatmul.bf16.gmra.mxu2 %v3190_v27  ;;  %v1508_v27 = vadd.f32 %v1507_v60, %v4213_v25 }
 0x63f   : > { %v1636_v8 = vpop.f32.mrf.mxu2 }
 0x641   : > { %v1509_v39 = vpop.f32.mrf.mxu0 }
 0x642   : > { %v1510_v32 = vadd.f32 %v1509_v39, %v4194_v5  ;;  %v5259_v39 = vpack.c.bf16 %v4272_v3, %v4270_v46  ;;  %v3194_v46 = vld [vmem:[%s5194_s3 + $0x90] sm:$0xff] }
 0x647   : > { %v1638_v6 = vpop.f32.mrf.mxu2 }
 0x649   : > { %v1512_v19 = vpop.f32.mrf.mxu0 }
 0x64a   : > { %v1513_v49 = vadd.f32 %v1512_v19, %v4182_v20  ;;  %v3192_v19 = vld [vmem:[%s5194_s3 + $0x80] sm:$0xff] }
 0x64c   : > { %1551 = vmatmul.bf16.gmra.mxu0 %v3191_v12  ;;  %1680 = vmatmul.bf16.gmra.mxu2 %v3191_v12  ;;  %v1738_v12 = vpack.c.bf16 %v1510_v32, %v1508_v27  ;;  %v1634_v32 = vadd.f32 %v1633_v37, %v4211_v28 }
 0x64f   : > { %v1641_v10 = vpop.f32.mrf.mxu2 }
 0x650   : > { %v1642_v7 = vadd.f32 %v1641_v10, %v4182_v20  ;;  %v1637_v20 = vadd.f32 %v1636_v8, %v4213_v25  ;;  %v5255_v25 = vpack.c.bf16 %v4281_v4, %v4279_v0  ;;  %v5256_v0 = vpack.c.bf16 %v4266_v54, %v4264_v2 }
 0x651   : > { %v1514_v63 = vpop.f32.mrf.mxu0  ;;  %v5260_v2 = vpack.c.bf16 %v4236_v26, %v4234_v38  ;;  %v5261_v54 = vpack.c.bf16 %v4257_v44, %v4255_v61  ;;  %v5262_v26 = vpack.c.bf16 %v4242_v23, %v4240_v1 }
 0x652   : > { %v1515_v57 = vadd.f32 %v1514_v63, %v4184_v21  ;;  %v1503_v63 = vadd.f32 %v1502_v48, %v4206_v33 }
 0x654   : > { %v1740_v18 = vpack.c.bf16 %v1515_v57, %v1513_v49  ;;  %v1639_v49 = vadd.f32 %v1638_v6, %v4194_v5  ;;  %v1736_v50 = vpack.c.bf16 %v1505_v56, %v1503_v63  ;;  %v1627_v56 = vadd.f32 %v1626_v11, %v4220_v41 }
 0x656   : > { %1798 = vmatpush.bf16.msrb.mxu1 %v1740_v18  ;;  %v1500_v18 = vadd.f32 %v1499_v14, %v4232_v24  ;;  %v1739_v60 = vpack.c.bf16 %v1639_v49, %v1637_v20 }
 0x657   : > { %v1643_v15 = vpop.f32.mrf.mxu2 }
 0x658   : > { %v1644_v29 = vadd.f32 %v1643_v15, %v4184_v21  ;;  %v1498_v21 = vadd.f32 %v1497_v13, %v4220_v41 }
 0x659   : > { %v1517_v22 = vpop.f32.mrf.mxu0 }
 0x65a   : > { %1799 = vmatpush.bf16.msrb.mxu1 %v1738_v12  ;;  %v1741_v57 = vpack.c.bf16 %v1644_v29, %v1642_v7  ;;  %v1734_v48 = vpack.c.bf16 %v1500_v18, %v1498_v21  ;;  %v1632_v29 = vadd.f32 %v1631_v45, %v4206_v33  ;;  %v1629_v7 = vadd.f32 %v1628_v47, %v4232_v24  ;;  %v3193_v24 = vld [vmem:[%s5194_s3 + $0x88] sm:$0xff] }
 0x65b   : > { %v1518_v47 = vadd.f32 %v1517_v22, %v4126_v59  ;;  %v5258_v45 = vpack.c.bf16 %v4251_v9, %v4249_v31 }
 0x65c   : > { %1556 = vmatmul.bf16.gmra.mxu0 %v3192_v19  ;;  %1685 = vmatmul.bf16.gmra.mxu2 %v3192_v19  ;;  %v1737_v14 = vpack.c.bf16 %v1634_v32, %v1632_v29  ;;  %v1735_v37 = vpack.c.bf16 %v1629_v7, %v1627_v56  ;;  %v3196_v32 = vld [vmem:[%s5194_s3 + $0xa0] sm:$0xff] }
 0x65d   : > { %1887 = vmatpush.bf16.msrb.mxu3 %v1741_v57 }
 0x65e   : > { %1800 = vmatpush.bf16.msrb.mxu1 %v1736_v50 }
 0x65f   : > { %v1646_v15 = vpop.f32.mrf.mxu2 }
 0x660   : > { %v1647_v8 = vadd.f32 %v1646_v15, %v4126_v59 }
 0x661   : > { %1888 = vmatpush.bf16.msrb.mxu3 %v1739_v60  ;;  %v1519_v5 = vpop.f32.mrf.mxu0 }
 0x662   : > { %1801 = vmatpush.bf16.msrb.mxu1 %v1734_v48  ;;  %v1520_v28 = vadd.f32 %v1519_v5, %v4128_v62 }
 0x664   : > { %v1742_v4 = vpack.c.bf16 %v1520_v28, %v1518_v47 }
 0x665   : > { %1889 = vmatpush.bf16.msrb.mxu3 %v1737_v14 }
 0x666   : > { %1802 = vmatpush.bf16.msrb.mxu1 %v5255_v25  ;;  %v3197_v25 = vld [vmem:[%s5194_s3 + $0xa8] sm:$0xff] }
 0x667   : > { %v1648_v13 = vpop.f32.mrf.mxu2 }
 0x668   : > { %v1649_v33 = vadd.f32 %v1648_v13, %v4128_v62  ;;  %v5257_v62 = vpack.c.bf16 %v4287_v40, %v4285_v16 }
 0x669   : > { %1890 = vmatpush.bf16.msrb.mxu3 %v1735_v37  ;;  %v1522_v41 = vpop.f32.mrf.mxu0 }
 0x66a   : > { %v1743_v11 = vpack.c.bf16 %v1649_v33, %v1647_v8  ;;  %1803 = vmatpush.bf16.msrb.mxu1 %v5256_v0  ;;  %v1523_v3 = vadd.f32 %v1522_v41, %v4159_v43 }
 0x66c   : > { %1561 = vmatmul.bf16.gmra.mxu0 %v3193_v24  ;;  %1690 = vmatmul.bf16.gmra.mxu2 %v3193_v24 }
 0x66d   : > { %1774 = vxpose.binary.xlu1.c.b16.start [1/16] %v1743_v11, %v1742_v4, 128  ;;  %v3198_v11 = vld [vmem:[%s5194_s3 + $0xb0] sm:$0xff] }
 0x66e   : > { %1891 = vmatpush.bf16.msrb.mxu3 %v5257_v62  ;;  %1804 = vmatpush.bf16.msrb.mxu1 %v5258_v45 }
 0x66f   : > { %v1651_v59 = vpop.f32.mrf.mxu2 }
 0x670   : > { %v1652_v31 = vadd.f32 %v1651_v59, %v4159_v43  ;;  %v3195_v43 = vld [vmem:[%s5194_s3 + $0x98] sm:$0xff] }
 0x671   : > { %v1524_v22 = vpop.f32.mrf.mxu0 }
 0x672   : > { %1892 = vmatpush.bf16.msrb.mxu3 %v5259_v39  ;;  %1805 = vmatpush.bf16.msrb.mxu1 %v5260_v2  ;;  %v1525_v16 = vadd.f32 %v1524_v22, %v4136_v36 }
 0x674   : > { %v1744_v61 = vpack.c.bf16 %v1525_v16, %v1523_v3  ;;  %v5263_v3 = vld [vmem:[#allocation2_spill] sm:$0xff] }
 0x676   : > { %1893 = vmatpush.bf16.msrb.mxu3 %v5261_v54  ;;  %v3199_v54 = vld [vmem:[%s5194_s3 + $0xb8] sm:$0xff] }
 0x677   : > { %v1653_v40 = vpop.f32.mrf.mxu2 }
 0x678   : > { %v1654_v9 = vadd.f32 %v1653_v40, %v4136_v36 }
 0x679   : > { %v1527_v6 = vpop.f32.mrf.mxu0 }
 0x67a   : > { %v1745_v38 = vpack.c.bf16 %v1654_v9, %v1652_v31  ;;  %1894 = vmatpush.bf16.msrb.mxu3 %v5262_v26  ;;  %v1528_v1 = vadd.f32 %v1527_v6, %v4138_v35  ;;  %v5264_v26 = vld [vmem:[#allocation3_spill] sm:$0xff] }
 0x67c   : > { %1566 = vmatmul.bf16.gmra.mxu0 %v3194_v46  ;;  %1695 = vmatmul.bf16.gmra.mxu2 %v3194_v46 }
 0x67d   : > { %1775 = vxpose.binary.xlu1.c.b16.cont [2/16] %v1745_v38, %v1744_v61, 128 }
 0x67f   : > { %v1656_v44 = vpop.f32.mrf.mxu2 }
 0x680   : > { %v1657_v12 = vadd.f32 %v1656_v44, %v4138_v35 }
 0x681   : > { %v1529_v10 = vpop.f32.mrf.mxu0 }
 0x682   : > { %v1530_v36 = vadd.f32 %v1529_v10, %v4180_v51 }
 0x684   : > { %v1746_v57 = vpack.c.bf16 %v1530_v36, %v1528_v1 }
 0x687   : > { %v1658_v27 = vpop.f32.mrf.mxu2 }
 0x688   : > { %v1659_v19 = vadd.f32 %v1658_v27, %v4180_v51 }
 0x689   : > { %v1532_v23 = vpop.f32.mrf.mxu0 }
 0x68a   : > { %v1747_v63 = vpack.c.bf16 %v1659_v19, %v1657_v12  ;;  %v1533_v35 = vadd.f32 %v1532_v23, %v4152_v42 }
 0x68c   : > { %1571 = vmatmul.bf16.gmra.mxu0 %v3195_v43  ;;  %1700 = vmatmul.bf16.gmra.mxu2 %v3195_v43 }
 0x68d   : > { %1776 = vxpose.binary.xlu1.c.b16.cont [3/16] %v1747_v63, %v1746_v57, 128 }
 0x68f   : > { %v1661_v49 = vpop.f32.mrf.mxu2 }
 0x690   : > { %v1662_v21 = vadd.f32 %v1661_v49, %v4152_v42 }
 0x691   : > { %v1534_v18 = vpop.f32.mrf.mxu0 }
 0x692   : > { %v1535_v50 = vadd.f32 %v1534_v18, %v4157_v34 }
 0x694   : > { %v1748_v48 = vpack.c.bf16 %v1535_v50, %v1533_v35 }
 0x697   : > { %v1663_v20 = vpop.f32.mrf.mxu2 }
 0x698   : > { %v1664_v51 = vadd.f32 %v1663_v20, %v4157_v34 }
 0x699   : > { %v1537_v15 = vpop.f32.mrf.mxu0 }
 0x69a   : > { %v1749_v60 = vpack.c.bf16 %v1664_v51, %v1662_v21  ;;  %v1538_v42 = vadd.f32 %v1537_v15, %v4192_v52 }
 0x69c   : > { %1576 = vmatmul.bf16.gmra.mxu0 %v3196_v32  ;;  %1705 = vmatmul.bf16.gmra.mxu2 %v3196_v32 }
 0x69d   : > { %1777 = vxpose.binary.xlu1.c.b16.cont [4/16] %v1749_v60, %v1748_v48, 128 }
 0x69f   : > { %v1666_v29 = vpop.f32.mrf.mxu2 }
 0x6a0   : > { %v1667_v56 = vadd.f32 %v1666_v29, %v4192_v52 }
 0x6a1   : > { %v1539_v5 = vpop.f32.mrf.mxu0 }
 0x6a2   : > { %v1540_v7 = vadd.f32 %v1539_v5, %v4170_v17 }
 0x6a4   : > { %v1750_v37 = vpack.c.bf16 %v1540_v7, %v1538_v42 }
 0x6a7   : > { %v1668_v14 = vpop.f32.mrf.mxu2 }
 0x6a8   : > { %v1669_v34 = vadd.f32 %v1668_v14, %v4170_v17 }
 0x6a9   : > { %v1542_v28 = vpop.f32.mrf.mxu0 }
 0x6aa   : > { %v1751_v13 = vpack.c.bf16 %v1669_v34, %v1667_v56  ;;  %v1543_v52 = vadd.f32 %v1542_v28, %v4172_v58 }
 0x6ac   : > { %1581 = vmatmul.bf16.gmra.mxu0 %v3197_v25  ;;  %1710 = vmatmul.bf16.gmra.mxu2 %v3197_v25 }
 0x6ad   : > { %1778 = vxpose.binary.xlu1.c.b16.cont [5/16] %v1751_v13, %v1750_v37, 128 }
 0x6af   : > { %v1671_v8 = vpop.f32.mrf.mxu2 }
 0x6b0   : > { %v1672_v41 = vadd.f32 %v1671_v8, %v4172_v58 }
 0x6b1   : > { %v1544_v33 = vpop.f32.mrf.mxu0 }
 0x6b2   : > { %v1545_v24 = vadd.f32 %v1544_v33, %v4201_v55 }
 0x6b4   : > { %v1752_v62 = vpack.c.bf16 %v1545_v24, %v1543_v52 }
 0x6b7   : > { %v1673_v47 = vpop.f32.mrf.mxu2 }
 0x6b8   : > { %v1674_v17 = vadd.f32 %v1673_v47, %v4201_v55 }
 0x6b9   : > { %v1547_v0 = vpop.f32.mrf.mxu0 }
 0x6ba   : > { %v1753_v4 = vpack.c.bf16 %v1674_v17, %v1672_v41  ;;  %v1548_v58 = vadd.f32 %v1547_v0, %v4196_v53 }
 0x6bc   : > { %1586 = vmatmul.bf16.gmra.mxu0 %v3198_v11  ;;  %1715 = vmatmul.bf16.gmra.mxu2 %v3198_v11 }
 0x6bd   : > { %1779 = vxpose.binary.xlu1.c.b16.cont [6/16] %v1753_v4, %v1752_v62, 128 }
 0x6bf   : > { %v1676_v45 = vpop.f32.mrf.mxu2 }
 0x6c0   : > { %v1677_v2 = vadd.f32 %v1676_v45, %v4196_v53 }
 0x6c1   : > { %v1549_v59 = vpop.f32.mrf.mxu0 }
 0x6c2   : > { %v1550_v22 = vadd.f32 %v1549_v59, %v4225_v30 }
 0x6c4   : > { %v1754_v31 = vpack.c.bf16 %v1550_v22, %v1548_v58 }
 0x6c7   : > { %v1678_v39 = vpop.f32.mrf.mxu2 }
 0x6c8   : > { %v1679_v55 = vadd.f32 %v1678_v39, %v4225_v30 }
 0x6c9   : > { %v1552_v40 = vpop.f32.mrf.mxu0 }
 0x6ca   : > { %v1755_v16 = vpack.c.bf16 %v1679_v55, %v1677_v2  ;;  %v1553_v44 = vadd.f32 %v1552_v40, %v5264_v26 }
 0x6cc   : > { %1591 = vmatmul.bf16.gmra.mxu0 %v3199_v54  ;;  %1720 = vmatmul.bf16.gmra.mxu2 %v3199_v54 }
 0x6cd   : > { %1780 = vxpose.binary.xlu1.c.b16.cont [7/16] %v1755_v16, %v1754_v31, 128 }
 0x6cf   : > { %v1681_v9 = vpop.f32.mrf.mxu2 }
 0x6d0   : > { %v1682_v61 = vadd.f32 %v1681_v9, %v5264_v26 }
 0x6d1   : > { %v1554_v46 = vpop.f32.mrf.mxu0 }
 0x6d2   : > { %v1555_v6 = vadd.f32 %v1554_v46, %v5263_v3 }
 0x6d4   : > { %v1756_v36 = vpack.c.bf16 %v1555_v6, %v1553_v44 }
 0x6d7   : > { %v1683_v38 = vpop.f32.mrf.mxu2 }
 0x6d8   : > { %v1684_v30 = vadd.f32 %v1683_v38, %v5263_v3 }
 0x6da   : > { %v1757_v10 = vpack.c.bf16 %v1684_v30, %v1682_v61 }
 0x6dd   : > { %1781 = vxpose.binary.xlu1.c.b16.end [8/16] %v1757_v10, %v1756_v36, 128 }
 0x719   : > { %v1782_v53 = vpop.trf.xlu1 }
 0x71a   : > { %1806 = vmatmul.bf16.vlgmr.msrb.gmra.mxu1 %v1782_v53  ;;  %1895 = vmatmul.bf16.vlgmr.msrb.gmra.mxu3 %v1782_v53 }
 0x721   : > { %v1783_v27 = vpop.trf.xlu1 }
 0x729   : > { %v1784_v12 = vpop.trf.xlu1 }
 0x72a   : > { %1811 = vmatmul.bf16.gmra.mxu1 %v1784_v12  ;;  %1900 = vmatmul.bf16.gmra.mxu3 %v1784_v12 }
 0x731   : > { %v1785_v19 = vpop.trf.xlu1 }
 0x739   : > { %v1786_v43 = vpop.trf.xlu1 }
 0x73a   : > { %1816 = vmatmul.bf16.gmra.mxu1 %v1786_v43  ;;  %1905 = vmatmul.bf16.gmra.mxu3 %v1786_v43 }
 0x741   : > { %v1787_v1 = vpop.trf.xlu1 }
 0x749   : > { %v1788_v23 = vpop.trf.xlu1 }
 0x74a   : > { %1821 = vmatmul.bf16.gmra.mxu1 %v1788_v23  ;;  %1910 = vmatmul.bf16.gmra.mxu3 %v1788_v23 }
 0x751   : > { %v1789_v63 = vpop.trf.xlu1 }
 0x759   : > { %v1790_v57 = vpop.trf.xlu1 }
 0x75a   : > { %1826 = vmatmul.bf16.gmra.mxu1 %v1790_v57  ;;  %1915 = vmatmul.bf16.gmra.mxu3 %v1790_v57 }
 0x761   : > { %v1791_v49 = vpop.trf.xlu1 }
 0x769   : > { %v1792_v18 = vpop.trf.xlu1 }
 0x76a   : > { %1831 = vmatmul.bf16.gmra.mxu1 %v1792_v18  ;;  %1920 = vmatmul.bf16.gmra.mxu3 %v1792_v18 }
 0x771   : > { %v1793_v50 = vpop.trf.xlu1 }
 0x779   : > { %v1794_v20 = vpop.trf.xlu1 }
 0x77a   : > { %1836 = vmatmul.bf16.gmra.mxu1 %v1794_v20  ;;  %1925 = vmatmul.bf16.gmra.mxu3 %v1794_v20 }
 0x781   : > { %v1795_v21 = vpop.trf.xlu1 }
 0x789   : > { %v1796_v51 = vpop.trf.xlu1 }
 0x78a   : > { %1841 = vmatmul.bf16.gmra.mxu1 %v1796_v51  ;;  %1930 = vmatmul.bf16.gmra.mxu3 %v1796_v51 }
 0x791   : > { %v1797_v22 = vpop.trf.xlu1 }
 0x797   : > { %v4399_v32 = vpop.f32.mrf.mxu1 }
 0x79a   : > { %1846 = vmatmul.bf16.gmra.mxu1 %v1783_v27  ;;  %1935 = vmatmul.bf16.gmra.mxu3 %v1783_v27 }
 0x79d   : > { %v4401_v35 = vpop.f32.mrf.mxu3 }
 0x79f   : > { %v4403_v15 = vpop.f32.mrf.mxu1 }
 0x7a5   : > { %v4405_v60 = vpop.f32.mrf.mxu3 }
 0x7a6   : > { %5265 = vst [vmem:[#allocation4_spill] sm:$0xff] %v4405_v60 }
 0x7a7   : > { %v4407_v48 = vpop.f32.mrf.mxu1 }
 0x7a8   : > { %5266 = vst [vmem:[#allocation5_spill] sm:$0xff] %v4407_v48 }
 0x7aa   : > { %1851 = vmatmul.bf16.gmra.mxu1 %v1785_v19  ;;  %1940 = vmatmul.bf16.gmra.mxu3 %v1785_v19 }
 0x7ad   : > { %v4409_v29 = vpop.f32.mrf.mxu3 }
 0x7ae   : > { %5267 = vst [vmem:[#allocation6_spill] sm:$0xff] %v4409_v29 }
 0x7af   : > { %v4411_v5 = vpop.f32.mrf.mxu1 }
 0x7b0   : > { %5268 = vst [vmem:[#allocation7_spill] sm:$0xff] %v4411_v5  ;;  %v1977_v57 = vmax.f32 %v4403_v15, %v4411_v5 }
 0x7b5   : > { %v4413_v7 = vpop.f32.mrf.mxu3 }
 0x7b6   : > { %5269 = vst [vmem:[#allocation8_spill] sm:$0xff] %v4413_v7 }
 0x7b7   : > { %v4415_v14 = vpop.f32.mrf.mxu1 }
 0x7ba   : > { %1856 = vmatmul.bf16.gmra.mxu1 %v1787_v1  ;;  %1945 = vmatmul.bf16.gmra.mxu3 %v1787_v1 }
 0x7bd   : > { %v4417_v56 = vpop.f32.mrf.mxu3 }
 0x7bf   : > { %v4419_v34 = vpop.f32.mrf.mxu1 }
 0x7c0   : > { %5270 = vst [vmem:[#allocation9_spill] sm:$0xff] %v4419_v34  ;;  %v1979_v18 = vmax.f32 %v1977_v57, %v4419_v34 }
 0x7c5   : > { %v4421_v25 = vpop.f32.mrf.mxu3 }
 0x7c6   : > { %5271 = vst [vmem:[#allocation10_spill] sm:$0xff] %v4421_v25 }
 0x7c7   : > { %v4423_v42 = vpop.f32.mrf.mxu1 }
 0x7ca   : > { %1861 = vmatmul.bf16.gmra.mxu1 %v1789_v63  ;;  %1950 = vmatmul.bf16.gmra.mxu3 %v1789_v63  ;;  %v1976_v63 = vmax.f32 %v4399_v32, %v4407_v48 }
 0x7cd   : > { %v4425_v28 = vpop.f32.mrf.mxu3 }
 0x7cf   : > { %v4427_v13 = vpop.f32.mrf.mxu1 }
 0x7d0   : > { %5272 = vst [vmem:[#allocation11_spill] sm:$0xff] %v4427_v13 }
 0x7d5   : > { %v4429_v37 = vpop.f32.mrf.mxu3 }
 0x7d6   : > { %5273 = vst [vmem:[#allocation2_spill] sm:$0xff] %v4429_v37 }
 0x7d7   : > { %v4431_v8 = vpop.f32.mrf.mxu1 }
 0x7d8   : > { %5274 = vst [vmem:[#allocation3_spill] sm:$0xff] %v4431_v8 }
 0x7da   : > { %1866 = vmatmul.bf16.gmra.mxu1 %v1791_v49  ;;  %1955 = vmatmul.bf16.gmra.mxu3 %v1791_v49  ;;  %v1978_v49 = vmax.f32 %v1976_v63, %v4415_v14 }
 0x7dc   : > { %v1980_v20 = vmax.f32 %v1978_v49, %v4423_v42 }
 0x7dd   : > { %v4433_v33 = vpop.f32.mrf.mxu3 }
 0x7df   : > { %v4435_v24 = vpop.f32.mrf.mxu1 }
 0x7e5   : > { %v4437_v47 = vpop.f32.mrf.mxu3 }
 0x7e6   : > { %5275 = vst [vmem:[#allocation12_spill] sm:$0xff] %v4437_v47 }
 0x7e7   : > { %v4439_v41 = vpop.f32.mrf.mxu1 }
 0x7ea   : > { %1871 = vmatmul.bf16.gmra.mxu1 %v1793_v50  ;;  %1960 = vmatmul.bf16.gmra.mxu3 %v1793_v50 }
 0x7ed   : > { %v4441_v17 = vpop.f32.mrf.mxu3 }
 0x7ef   : > { %v4443_v11 = vpop.f32.mrf.mxu1 }
 0x7f5   : > { %v4445_v52 = vpop.f32.mrf.mxu3 }
 0x7f6   : > { %5276 = vst [vmem:[#allocation13_spill] sm:$0xff] %v4445_v52 }
 0x7f7   : > { %v4447_v0 = vpop.f32.mrf.mxu1 }
 0x7fa   : > { %1876 = vmatmul.bf16.gmra.mxu1 %v1795_v21  ;;  %1965 = vmatmul.bf16.gmra.mxu3 %v1795_v21  ;;  %v1981_v21 = vmax.f32 %v1979_v18, %v4427_v13 }
 0x7fd   : > { %v4449_v4 = vpop.f32.mrf.mxu3 }
 0x7ff   : > { %v4451_v62 = vpop.f32.mrf.mxu1 }
 0x805   : > { %v4453_v45 = vpop.f32.mrf.mxu3 }
 0x807   : > { %v4455_v59 = vpop.f32.mrf.mxu1 }
 0x80a   : > { %1881 = vmatmul.bf16.gmra.mxu1 %v1797_v22  ;;  %1970 = vmatmul.bf16.gmra.mxu3 %v1797_v22  ;;  %v1982_v22 = vmax.f32 %v1980_v20, %v4431_v8 }
 0x80c   : > { %v1984_v48 = vmax.f32 %v1982_v22, %v4439_v41  ;;  %v2014_v22 = vmax.f32 %v4405_v60, %v4413_v7 }
 0x80d   : > { %v4457_v39 = vpop.f32.mrf.mxu3 }
 0x80e   : > { %v1986_v63 = vmax.f32 %v1984_v48, %v4447_v0 }
 0x80f   : > { %v4459_v2 = vpop.f32.mrf.mxu1 }
 0x810   : > { %v1988_v49 = vmax.f32 %v1986_v63, %v4455_v59 }
 0x815   : > { %v4461_v55 = vpop.f32.mrf.mxu3 }
 0x817   : > { %v4463_v54 = vpop.f32.mrf.mxu1 }
 0x818   : > { %v1990_v13 = vmax.f32 %v1988_v49, %v4463_v54 }
 0x81d   : > { %v4465_v58 = vpop.f32.mrf.mxu3 }
 0x81f   : > { %v4467_v16 = vpop.f32.mrf.mxu1 }
 0x825   : > { %v4469_v40 = vpop.f32.mrf.mxu3 }
 0x826   : > { %5277 = vst [vmem:[#allocation14_spill] sm:$0xff] %v4469_v40 }
 0x827   : > { %v4471_v31 = vpop.f32.mrf.mxu1 }
 0x82d   : > { %v4473_v9 = vpop.f32.mrf.mxu3 }
 0x82f   : > { %v4475_v46 = vpop.f32.mrf.mxu1 }
 0x835   : > { %v4477_v3 = vpop.f32.mrf.mxu3 }
 0x837   : > { %v4479_v6 = vpop.f32.mrf.mxu1 }
 0x83d   : > { %v4481_v38 = vpop.f32.mrf.mxu3 }
 0x83f   : > { %v4483_v26 = vpop.f32.mrf.mxu1 }
 0x840   : > { %5278 = vst [vmem:[#allocation15_spill] sm:$0xff] %v4483_v26 }
 0x845   : > { %v4485_v61 = vpop.f32.mrf.mxu3 }
 0x847   : > { %v4487_v30 = vpop.f32.mrf.mxu1 }
 0x84d   : > { %v4489_v44 = vpop.f32.mrf.mxu3 }
 0x84f   : > { %v4491_v10 = vpop.f32.mrf.mxu1 }
 0x855   : > { %v4493_v36 = vpop.f32.mrf.mxu3 }
 0x856   : > { %5279 = vst [vmem:[#allocation16_spill] sm:$0xff] %v4493_v36 }
 0x857   : > { %v4495_v53 = vpop.f32.mrf.mxu1 }
 0x85d   : > { %v4497_v27 = vpop.f32.mrf.mxu3 }
 0x85f   : > { %v4499_v12 = vpop.f32.mrf.mxu1 }
 0x865   : > { %v4501_v19 = vpop.f32.mrf.mxu3 }
 0x866   : > { %5280 = vst [vmem:[#allocation17_spill] sm:$0xff] %v4501_v19 }
 0x867   : > { %v4503_v43 = vpop.f32.mrf.mxu1 }
 0x86d   : > { %v4505_v1 = vpop.f32.mrf.mxu3 }
 0x86e   : > { %5281 = vst [vmem:[#allocation18_spill] sm:$0xff] %v4505_v1  ;;  %v1983_v1 = vmax.f32 %v1981_v21, %v4435_v24  ;;  %v1992_v21 = vmax.f32 %v1990_v13, %v4471_v31  ;;  %v2016_v13 = vmax.f32 %v2014_v22, %v4421_v25 }
 0x86f   : > { %v4507_v23 = vpop.f32.mrf.mxu1 }
 0x870   : > { %v1985_v5 = vmax.f32 %v1983_v1, %v4443_v11  ;;  %v1994_v48 = vmax.f32 %v1992_v21, %v4479_v6 }
 0x872   : > { %v1987_v57 = vmax.f32 %v1985_v5, %v4451_v62 }
 0x874   : > { %v1989_v18 = vmax.f32 %v1987_v57, %v4459_v2  ;;  %v1996_v57 = vmax.f32 %v1994_v48, %v4487_v30 }
 0x875   : > { %v4519_v51 = vpop.f32.mrf.mxu3 }
 0x876   : > { %5282 = vst [vmem:[#allocation19_spill] sm:$0xff] %v4519_v51  ;;  %v1991_v20 = vmax.f32 %v1989_v18, %v4467_v16  ;;  %v2013_v18 = vmax.f32 %v4401_v35, %v4409_v29 }
 0x877   : > { %v4515_v50 = vpop.f32.mrf.mxu1 }
 0x878   : > { %v1993_v1 = vmax.f32 %v1991_v20, %v4475_v46  ;;  %v1998_v20 = vmax.f32 %v1996_v57, %v4495_v53 }
 0x87a   : > { %v1995_v5 = vmax.f32 %v1993_v1, %v4483_v26  ;;  %v2015_v1 = vmax.f32 %v2013_v18, %v4417_v56  ;;  %v2018_v26 = vmax.f32 %v2016_v13, %v4429_v37  ;;  %v2000_v7 = vmax.f32 %v1998_v20, %v4503_v43 }
 0x87c   : > { %v1997_v49 = vmax.f32 %v1995_v5, %v4491_v10  ;;  %v2017_v5 = vmax.f32 %v2015_v1, %v4425_v28  ;;  %v2020_v29 = vmax.f32 %v2018_v26, %v4437_v47  ;;  %v2002_v22 = vmax.f32 %v2000_v7, %v4515_v50 }
 0x87d   : > { %v4533_v8 = vpop.f32.mrf.mxu3 }
 0x87e   : > { %v1999_v21 = vmax.f32 %v1997_v49, %v4499_v12  ;;  %v2019_v49 = vmax.f32 %v2017_v5, %v4433_v33  ;;  %v2022_v18 = vmax.f32 %v2020_v29, %v4445_v52 }
 0x87f   : > { %v4527_v34 = vpop.f32.mrf.mxu1 }
 0x880   : > { %v2001_v60 = vmax.f32 %v1999_v21, %v4507_v23  ;;  %v2021_v21 = vmax.f32 %v2019_v49, %v4441_v17  ;;  %v2024_v1 = vmax.f32 %v2022_v18, %v4453_v45 }
 0x882   : > { %v2003_v57 = vmax.f32 %v2001_v60, %v4527_v34  ;;  %v2023_v26 = vmax.f32 %v2021_v21, %v4449_v4  ;;  %v2026_v7 = vmax.f32 %v2024_v1, %v4461_v55 }
 0x884   : > { %v2025_v5 = vmax.f32 %v2023_v26, %v4457_v39  ;;  %v2028_v29 = vmax.f32 %v2026_v7, %v4469_v40 }
 0x885   : > { %v4554_v48 = vpop.f32.mrf.mxu3 }
 0x887   : > { %v4541_v63 = vpop.f32.mrf.mxu1 }
 0x888   : > { %v2004_v13 = vmax.f32 %v2002_v22, %v4541_v63  ;;  %v2027_v22 = vmax.f32 %v2025_v5, %v4465_v58 }
 0x88a   : > { %v2029_v18 = vmax.f32 %v2027_v22, %v4473_v9  ;;  %v5283_v22 = vld [vmem:[#allocation18_spill] sm:$0xff] }
 0x88c   : > { %v2031_v21 = vmax.f32 %v2029_v18, %v4481_v38 }
 0x88d   : > { %v4572_v52 = vpop.f32.mrf.mxu3 }
 0x88e   : > { %v2033_v7 = vmax.f32 %v2031_v21, %v4489_v44 }
 0x88f   : > { %v4562_v25 = vpop.f32.mrf.mxu1 }
 0x890   : > { %v2005_v20 = vmax.f32 %v2003_v57, %v4562_v25  ;;  %v2030_v57 = vmax.f32 %v2028_v29, %v4477_v3 }
 0x892   : > { %v2006_v37 = vmax.f32 %v2004_v13, %v2005_v20  ;;  %v2032_v13 = vmax.f32 %v2030_v57, %v4485_v61 }
 0x894   : > { %v2007_v60 = vrot.slane %v2006_v37, 4  ;;  %v2034_v1 = vmax.f32 %v2032_v13, %v4493_v36 }
 0x895   : > { %v4586_v29 = vpop.f32.mrf.mxu3 }
 0x896   : > { %v2008_v47 = vmax.f32 %v2006_v37, %v2007_v60  ;;  %v2036_v40 = vmax.f32 %v2034_v1, %v4501_v19  ;;  %v2035_v37 = vmax.f32 %v2033_v7, %v4497_v27 }
 0x898   : > { %v2009_v49 = vrot.slane %v2008_v47, 2  ;;  %v2038_v60 = vmax.f32 %v2036_v40, %v4519_v51  ;;  %v2037_v57 = vmax.f32 %v2035_v37, %v5283_v22 }
 0x89a   : > { %v2010_v20 = vmax.f32 %v2008_v47, %v2009_v49  ;;  %v2040_v47 = vmax.f32 %v2038_v60, %v4554_v48  ;;  %v2039_v49 = vmax.f32 %v2037_v57, %v4533_v8 }
 0x89c   : > { %v2011_v26 = vrot.slane %v2010_v20, 1  ;;  %v2042_v18 = vmax.f32 %v2040_v47, %v4586_v29  ;;  %v2041_v40 = vmax.f32 %v2039_v49, %v4572_v52 }
 0x89e   : > { %v4584_v5 = vmax.f32 %v2010_v20, %v2011_v26  ;;  %v5284_v20 = vld [vmem:[#allocation5_spill] sm:$0xff]  ;;  %v5285_v26 = vld [vmem:[#allocation7_spill] sm:$0xff]  ;;  %v2043_v37 = vmax.f32 %v2041_v40, %v2042_v18 }
 0x89f   : > { %v5287_v18 = vld [vmem:[#allocation11_spill] sm:$0xff] }
 0x8a0   : > { %v2050_v13 = vsub.f32 %v4399_v32, %v4584_v5  ;;  %v2052_v21 = vsub.f32 %v4403_v15, %v4584_v5  ;;  %v2054_v1 = vsub.f32 %v5284_v20, %v4584_v5  ;;  %v2056_v7 = vsub.f32 %v5285_v26, %v4584_v5  ;;  %v5286_v32 = vld [vmem:[#allocation9_spill] sm:$0xff] }
 0x8a1   : > { %v2058_v57 = vsub.f32 %v4415_v14, %v4584_v5  ;;  %v2060_v19 = vsub.f32 %v5286_v32, %v4584_v5  ;;  %v2044_v49 = vrot.slane %v2043_v37, 4  ;;  %v2062_v20 = vsub.f32 %v4423_v42, %v4584_v5 }
 0x8a2   : > { %v2114_v60 = vmul.f32 1.442695, %v2050_v13  ;;  %v2118_v36 = vmul.f32 1.442695, %v2052_v21  ;;  %v2122_v47 = vmul.f32 1.442695, %v2054_v1  ;;  %v2064_v13 = vsub.f32 %v5287_v18, %v4584_v5 }
 0x8a3   : > { %v2126_v15 = vmul.f32 1.442695, %v2056_v7  ;;  %v2130_v51 = vmul.f32 1.442695, %v2058_v57  ;;  %v5288_v21 = vld [vmem:[#allocation3_spill] sm:$0xff]  ;;  %v2045_v1 = vmax.f32 %v2043_v37, %v2044_v49  ;;  %v2070_v42 = vsub.f32 %v4439_v41, %v4584_v5 }
 0x8a4   : > { %3236 = vpow2.f32 %v2114_v60  ;;  %v2066_v40 = vsub.f32 %v5288_v21, %v4584_v5  ;;  %v2134_v14 = vmul.f32 1.442695, %v2060_v19  ;;  %v2138_v60 = vmul.f32 1.442695, %v2062_v20 }
 0x8a5   : > { %3238 = vpow2.f32 %v2118_v36  ;;  %v2068_v36 = vsub.f32 %v4435_v24, %v4584_v5  ;;  %v2072_v57 = vsub.f32 %v4443_v11, %v4584_v5  ;;  %v2074_v32 = vsub.f32 %v4447_v0, %v4584_v5 }
 0x8a6   : > { %3240 = vpow2.f32 %v2122_v47  ;;  %v2142_v47 = vmul.f32 1.442695, %v2064_v13  ;;  %v2146_v24 = vmul.f32 1.442695, %v2066_v40  ;;  %v2076_v41 = vsub.f32 %v4451_v62, %v4584_v5 }
 0x8a7   : > { %3242 = vpow2.f32 %v2126_v15  ;;  %v2046_v15 = vrot.slane %v2045_v1, 2  ;;  %v2078_v11 = vsub.f32 %v4455_v59, %v4584_v5  ;;  %v2154_v18 = vmul.f32 1.442695, %v2070_v42 }
 0x8a8   : > { %3244 = vpow2.f32 %v2130_v51  ;;  %v2150_v51 = vmul.f32 1.442695, %v2068_v36  ;;  %v2080_v13 = vsub.f32 %v4459_v2, %v4584_v5  ;;  %v2158_v0 = vmul.f32 1.442695, %v2072_v57 }
 0x8a9   : > { %3246 = vpow2.f32 %v2134_v14  ;;  %v2082_v62 = vsub.f32 %v4463_v54, %v4584_v5  ;;  %v2162_v14 = vmul.f32 1.442695, %v2074_v32  ;;  %v2047_v36 = vmax.f32 %v2045_v1, %v2046_v15 }
 0x8aa   : > { %v4611_v26 = vpop.eup %3236  ;;  %3248 = vpow2.f32 %v2138_v60  ;;  %v2084_v59 = vsub.f32 %v4467_v16, %v4584_v5  ;;  %v2166_v42 = vmul.f32 1.442695, %v2076_v41  ;;  %v2086_v57 = vsub.f32 %v4471_v31, %v4584_v5  ;;  %v5290_v31 = vld [vmem:[#allocation15_spill] sm:$0xff] }
 0x8ab   : > { %v4615_v7 = vpop.eup %3238  ;;  %3250 = vpow2.f32 %v2142_v47  ;;  %v2170_v47 = vmul.f32 1.442695, %v2078_v11  ;;  %v2088_v54 = vsub.f32 %v4475_v46, %v4584_v5  ;;  %v2090_v16 = vsub.f32 %v4479_v6, %v4584_v5 }
 0x8ac   : > { %5289 = vst [vmem:[#allocation18_spill] sm:$0xff] %v4615_v7  ;;  %v2242_v19 = vadd.f32 %v4615_v7, %v4611_v26  ;;  %v4623_v37 = vpop.eup %3240  ;;  %3252 = vpow2.f32 %v2146_v24  ;;  %v2178_v24 = vmul.f32 1.442695, %v2082_v62  ;;  %v2048_v15 = vrot.slane %v2047_v36, 1 }
 0x8ad   : > { %v4630_v20 = vpop.eup %3242  ;;  %3254 = vpow2.f32 %v2150_v51  ;;  %v2092_v51 = vsub.f32 %v5290_v31, %v4584_v5 }
 0x8ae   : > { %v2243_v49 = vadd.f32 %v4623_v37, %v2242_v19  ;;  %v4637_v40 = vpop.eup %3244  ;;  %3256 = vpow2.f32 %v2154_v18  ;;  %v2174_v19 = vmul.f32 1.442695, %v2080_v13  ;;  %v2094_v18 = vsub.f32 %v4487_v30, %v4584_v5 }
 0x8af   : > { %v4644_v2 = vpop.eup %3246  ;;  %3258 = vpow2.f32 %v2158_v0  ;;  %v2186_v13 = vmul.f32 1.442695, %v2086_v57  ;;  %v2096_v0 = vsub.f32 %v4491_v10, %v4584_v5  ;;  %v2100_v57 = vsub.f32 %v4499_v12, %v4584_v5 }
 0x8b0   : > { %v2244_v21 = vadd.f32 %v4630_v20, %v2243_v49  ;;  %v4651_v32 = vpop.eup %3248  ;;  %3260 = vpow2.f32 %v2162_v14  ;;  %v2182_v49 = vmul.f32 1.442695, %v2084_v59  ;;  %v2098_v59 = vsub.f32 %v4495_v53, %v4584_v5 }
 0x8b1   : > { %v4655_v41 = vpop.eup %3250  ;;  %3262 = vpow2.f32 %v2166_v42  ;;  %v2194_v42 = vmul.f32 1.442695, %v2090_v16  ;;  %v2198_v10 = vmul.f32 1.442695, %v2092_v51  ;;  %v2202_v53 = vmul.f32 1.442695, %v2094_v18 }
 0x8b2   : > { %v2245_v60 = vadd.f32 %v4637_v40, %v2244_v21  ;;  %v4660_v11 = vpop.eup %3252  ;;  %3264 = vpow2.f32 %v2170_v47  ;;  %v2190_v21 = vmul.f32 1.442695, %v2088_v54  ;;  %v2112_v12 = vsub.f32 %v4562_v25, %v4584_v5 }
 0x8b3   : > { %v4664_v6 = vpop.eup %3254  ;;  %3266 = vpow2.f32 %v2174_v19  ;;  %v2110_v19 = vsub.f32 %v4541_v63, %v4584_v5  ;;  %v2214_v63 = vmul.f32 1.442695, %v2100_v57  ;;  %v5294_v57 = vld [vmem:[#allocation6_spill] sm:$0xff] }
 0x8b4   : > { %v2246_v1 = vadd.f32 %v4644_v2, %v2245_v60  ;;  %v4669_v14 = vpop.eup %3256  ;;  %3268 = vpow2.f32 %v2178_v24  ;;  %v4673_v60 = vmax.f32 %v2047_v36, %v2048_v15  ;;  %v2206_v36 = vmul.f32 1.442695, %v2096_v0 }
 0x8b5   : > { %v4675_v30 = vpop.eup %3258  ;;  %3270 = vpow2.f32 %v2182_v49  ;;  %v2210_v15 = vmul.f32 1.442695, %v2098_v59  ;;  %v2102_v0 = vsub.f32 %v4503_v43, %v4584_v5  ;;  %v2234_v25 = vmul.f32 1.442695, %v2110_v19  ;;  %v4715_v19 = vpop.f32.mrf.mxu0 }
 0x8b6   : > { %v2247_v46 = vadd.f32 %v4651_v32, %v2246_v1  ;;  %v4680_v54 = vpop.eup %3260  ;;  %3272 = vpow2.f32 %v2186_v13  ;;  %v2051_v31 = vsub.f32 %v4401_v35, %v4673_v60  ;;  %v2106_v35 = vsub.f32 %v4515_v50, %v4584_v5  ;;  %5295 = vst [vmem:[#allocation9_spill] sm:$0xff] %v4715_v19 }
 0x8b7   : > { %v4684_v1 = vpop.eup %3262  ;;  %3274 = vpow2.f32 %v2190_v21  ;;  %v2238_v50 = vmul.f32 1.442695, %v2112_v12  ;;  %v2081_v7 = vsub.f32 %v4461_v55, %v4673_v60  ;;  %v2077_v55 = vsub.f32 %v4453_v45, %v4673_v60 }
 0x8b8   : > { %v2248_v62 = vadd.f32 %v4655_v41, %v2247_v46  ;;  %v4687_v24 = vpop.eup %3264  ;;  %3276 = vpow2.f32 %v2194_v42  ;;  %v5291_v46 = vld [vmem:[#allocation4_spill] sm:$0xff]  ;;  %v2108_v42 = vsub.f32 %v4527_v34, %v4584_v5  ;;  %v2116_v43 = vmul.f32 1.442695, %v2051_v31 }
 0x8b9   : > { %v4693_v51 = vpop.eup %3266  ;;  %3278 = vpow2.f32 %v2198_v10  ;;  %v2053_v18 = vsub.f32 %v5291_v46, %v4673_v60  ;;  %v2055_v10 = vsub.f32 %v5294_v57, %v4673_v60  ;;  %v2218_v46 = vmul.f32 1.442695, %v2102_v0  ;;  %v5297_v34 = vld [vmem:[#allocation8_spill] sm:$0xff] }
 0x8ba   : > { %v2249_v47 = vadd.f32 %v4660_v11, %v2248_v62  ;;  %v4698_v13 = vpop.eup %3268  ;;  %3280 = vpow2.f32 %v2202_v53  ;;  %v4717_v53 = vpop.f32.mrf.mxu2  ;;  %v2104_v31 = vsub.f32 %v4507_v23, %v4584_v5  ;;  %v2226_v19 = vmul.f32 1.442695, %v2106_v35 }
 0x8bb   : > { %5292 = vst [vmem:[#allocation5_spill] sm:$0xff] %v4698_v13  ;;  %v4702_v21 = vpop.eup %3270  ;;  %3282 = vpow2.f32 %v2206_v36  ;;  %v2063_v35 = vsub.f32 %v4425_v28, %v4673_v60 }
 0x8bc   : > { %v2250_v16 = vadd.f32 %v4664_v6, %v2249_v47  ;;  %5293 = vst [vmem:[#allocation7_spill] sm:$0xff] %v4702_v21  ;;  %v4707_v59 = vpop.eup %3272  ;;  %3284 = vpow2.f32 %v2210_v15  ;;  %v2057_v15 = vsub.f32 %v5297_v34, %v4673_v60  ;;  %v5298_v34 = vld [vmem:[#allocation10_spill] sm:$0xff] }
 0x8bd   : > { %v4713_v47 = vpop.eup %3274  ;;  %5296 = vst [vmem:[#allocation11_spill] sm:$0xff] %v4717_v53  ;;  %3286 = vpow2.f32 %v2214_v63  ;;  %v2059_v63 = vsub.f32 %v4417_v56, %v4673_v60  ;;  %v2061_v23 = vsub.f32 %v5298_v34, %v4673_v60  ;;  %v2222_v56 = vmul.f32 1.442695, %v2104_v31 }
 0x8be   : > { %v2251_v49 = vadd.f32 %v4669_v14, %v2250_v16  ;;  %v2120_v16 = vmul.f32 1.442695, %v2053_v18  ;;  %3288 = vpow2.f32 %v2234_v25  ;;  %v2124_v18 = vmul.f32 1.442695, %v2055_v10 }
 0x8bf   : > { %3290 = vpow2.f32 %v2116_v43  ;;  %v2230_v25 = vmul.f32 1.442695, %v2108_v42  ;;  %v2128_v43 = vmul.f32 1.442695, %v2057_v15  ;;  %v5299_v42 = vld [vmem:[#allocation2_spill] sm:$0xff] }
 0x8c0   : > { %v2252_v62 = vadd.f32 %v4675_v30, %v2251_v49  ;;  %v4720_v49 = vpop.eup %3276  ;;  %3292 = vpow2.f32 %v2120_v16  ;;  %v2067_v16 = vsub.f32 %v4433_v33, %v4673_v60  ;;  %v2136_v15 = vmul.f32 1.442695, %v2061_v23 }
 0x8c1   : > { %v4724_v57 = vpop.eup %3278  ;;  %3294 = vpow2.f32 %v2238_v50  ;;  %v2065_v50 = vsub.f32 %v5299_v42, %v4673_v60  ;;  %v2140_v33 = vmul.f32 1.442695, %v2063_v35 }
 0x8c2   : > { %v2253_v36 = vadd.f32 %v4680_v54, %v2252_v62  ;;  %v4729_v12 = vpop.eup %3280  ;;  %3296 = vpow2.f32 %v2218_v46  ;;  %v2132_v46 = vmul.f32 1.442695, %v2059_v63  ;;  %v2148_v35 = vmul.f32 1.442695, %v2067_v16 }
 0x8c3   : > { %v4733_v0 = vpop.eup %3282  ;;  %3298 = vpow2.f32 %v2226_v19  ;;  %v2079_v19 = vsub.f32 %v4457_v39, %v4673_v60  ;;  %v2075_v39 = vsub.f32 %v4449_v4, %v4673_v60  ;;  %v2144_v23 = vmul.f32 1.442695, %v2065_v50 }
 0x8c4   : > { %v2254_v53 = vadd.f32 %v4684_v1, %v2253_v36  ;;  %v4738_v5 = vpop.eup %3284  ;;  %3300 = vpow2.f32 %v2124_v18  ;;  %v1559_v18 = vpop.f32.mrf.mxu0 }
 0x8c5   : > { %v4742_v36 = vpop.eup %3286  ;;  %3302 = vpow2.f32 %v2230_v25  ;;  %v4764_v25 = vpop.f32.mrf.mxu2 }
 0x8c6   : > { %v2255_v62 = vadd.f32 %v4687_v24, %v2254_v53  ;;  %v4747_v53 = vpop.eup %3288  ;;  %3304 = vpow2.f32 %v2128_v43 }
 0x8c7   : > { %v4751_v34 = vpop.eup %3290  ;;  %3306 = vpow2.f32 %v2222_v56 }
 0x8c8   : > { %v2256_v10 = vadd.f32 %v4693_v51, %v2255_v62  ;;  %v4756_v31 = vpop.eup %3292  ;;  %v5301_v62 = vld [vmem:[#allocation12_spill] sm:$0xff]  ;;  %3308 = vpow2.f32 %v2132_v46 }
 0x8c9   : > { %5300 = vst [vmem:[#allocation3_spill] sm:$0xff] %v4756_v31  ;;  %v2069_v42 = vsub.f32 %v5301_v62, %v4673_v60  ;;  %v4762_v63 = vpop.eup %3294  ;;  %v2071_v62 = vsub.f32 %v4441_v17, %v4673_v60  ;;  %3310 = vpow2.f32 %v2136_v15  ;;  %v2279_v4 = vadd.f32 %v4756_v31, %v4751_v34  ;;  %v5302_v31 = vld [vmem:[#allocation13_spill] sm:$0xff] }
 0x8ca   : > { %v2257_v28 = vadd.f32 %v4698_v13, %v2256_v10  ;;  %v4769_v13 = vpop.eup %3296  ;;  %3312 = vpow2.f32 %v2140_v33  ;;  %v2330_v17 = vpack.c.bf16 %v4693_v51, %v4687_v24  ;;  %v2346_v45 = vpack.c.bf16 %v4762_v63, %v4747_v53 }
 0x8cb   : > { %v4775_v43 = vpop.eup %3298  ;;  %3314 = vpow2.f32 %v2144_v23  ;;  %v2164_v15 = vmul.f32 1.442695, %v2075_v39  ;;  %v2073_v33 = vsub.f32 %v5302_v31, %v4673_v60  ;;  %v2152_v39 = vmul.f32 1.442695, %v2069_v42 }
 0x8cc   : > { %v2258_v10 = vadd.f32 %v4702_v21, %v2257_v28  ;;  %v2172_v28 = vmul.f32 1.442695, %v2079_v19  ;;  %v4780_v50 = vpop.eup %3300  ;;  %v2176_v21 = vmul.f32 1.442695, %v2081_v7  ;;  %3316 = vpow2.f32 %v2148_v35  ;;  %2348 = vmatpush.bf16.msra.mxu1 %v2330_v17  ;;  %2397 = vmatpush.bf16.msra.mxu3 %v2346_v45 }
 0x8cd   : > { %v4786_v16 = vpop.eup %3302  ;;  %v2280_v19 = vadd.f32 %v4780_v50, %v2279_v4  ;;  %v2168_v7 = vmul.f32 1.442695, %v2077_v55  ;;  %v2328_v4 = vpack.c.bf16 %v4684_v1, %v4680_v54  ;;  %v2156_v17 = vmul.f32 1.442695, %v2071_v62  ;;  %v4812_v54 = vpop.f32.mrf.mxu0 }
 0x8ce   : > { %v2259_v56 = vadd.f32 %v4707_v59, %v2258_v10  ;;  %v4790_v10 = vpop.eup %3304  ;;  %3318 = vpow2.f32 %v2172_v28  ;;  %v2344_v31 = vpack.c.bf16 %v4786_v16, %v4775_v43  ;;  %5303 = vst [vmem:[#allocation15_spill] sm:$0xff] %v4812_v54  ;;  %v4814_v1 = vpop.f32.mrf.mxu2 }
 0x8cf   : > { %v4794_v24 = vpop.eup %3306  ;;  %3320 = vpow2.f32 %v2176_v21  ;;  %5304 = vst [vmem:[#allocation4_spill] sm:$0xff] %v4814_v1 }
 0x8d0   : > { %v2260_v46 = vadd.f32 %v4713_v47, %v2259_v56  ;;  %v2281_v56 = vadd.f32 %v4790_v10, %v2280_v19  ;;  %v4798_v23 = vpop.eup %3308  ;;  %3322 = vpow2.f32 %v2164_v15  ;;  %2349 = vmatpush.bf16.msra.mxu1 %v2328_v4  ;;  %2398 = vmatpush.bf16.msra.mxu3 %v2344_v31  ;;  %v4820_v15 = vpop.permute.xlu2 %1251 }
 0x8d1   : > { %v4804_v55 = vpop.eup %3310  ;;  %3324 = vpow2.f32 %v2168_v7  ;;  %v2342_v7 = vpack.c.bf16 %v4794_v24, %v4769_v13 }
 0x8d2   : > { %v2261_v51 = vadd.f32 %v4720_v49, %v2260_v46  ;;  %v2282_v28 = vadd.f32 %v4798_v23, %v2281_v56  ;;  %v4808_v45 = vpop.eup %3312  ;;  %v2160_v46 = vmul.f32 1.442695, %v2073_v33  ;;  %3326 = vpow2.f32 %v2152_v39 }
 0x8d3   : > { %v4810_v21 = vpop.eup %3314  ;;  %v2326_v33 = vpack.c.bf16 %v4675_v30, %v4669_v14  ;;  %v4829_v56 = vadd.f32 %v1559_v18, %v4820_v15  ;;  %3328 = vpow2.f32 %v2156_v17  ;;  %v2083_v39 = vsub.f32 %v4465_v58, %v4673_v60  ;;  %v5305_v14 = vld [vmem:[#allocation14_spill] sm:$0xff] }
 0x8d4   : > { %v2262_v35 = vadd.f32 %v4724_v57, %v2261_v51  ;;  %v2283_v19 = vadd.f32 %v4804_v55, %v2282_v28  ;;  %v4818_v62 = vpop.eup %3316  ;;  %v2085_v30 = vsub.f32 %v5305_v14, %v4673_v60  ;;  %v2087_v28 = vsub.f32 %v4473_v9, %v4673_v60  ;;  %2399 = vmatpush.bf16.msra.mxu3 %v2342_v7 }
 0x8d5   : > { %v4826_v51 = vpop.eup %3318  ;;  %3330 = vpow2.f32 %v2160_v46  ;;  %2350 = vmatpush.bf16.msra.mxu1 %v2326_v33  ;;  %v2111_v17 = vsub.f32 %v4572_v52, %v4673_v60  ;;  %v2089_v14 = vsub.f32 %v4477_v3, %v4673_v60  ;;  %v2113_v9 = vsub.f32 %v4586_v29, %v4673_v60 }
 0x8d6   : > { %v2263_v42 = vadd.f32 %v4729_v12, %v2262_v35  ;;  %v2284_v31 = vadd.f32 %v4808_v45, %v2283_v19  ;;  %v4833_v35 = vpop.eup %3320  ;;  %v2324_v46 = vpack.c.bf16 %v4664_v6, %v4660_v11  ;;  %v2340_v33 = vpack.c.bf16 %v4742_v36, %v4738_v5 }
 0x8d7   : > { %v3323_v18 = vpop.eup %3322  ;;  %v2331_v58 = vpack.c.bf16 %v4833_v35, %v4826_v51  ;;  %v2091_v7 = vsub.f32 %v4481_v38, %v4673_v60  ;;  %v2109_v6 = vsub.f32 %v4554_v48, %v4673_v60  ;;  %v2099_v29 = vsub.f32 %v4497_v27, %v4673_v60  ;;  %v5306_v27 = vld [vmem:[#allocation19_spill] sm:$0xff] }
 0x8d8   : > { %v2264_v4 = vadd.f32 %v4733_v0, %v2263_v42  ;;  %v2285_v19 = vadd.f32 %v4810_v21, %v2284_v31  ;;  %v3325_v1 = vpop.eup %3324  ;;  %2400 = vmatpush.bf16.msra.mxu3 %v2340_v33  ;;  %v2240_v54 = vmul.f32 1.442695, %v2113_v9  ;;  %v2322_v11 = vpack.c.bf16 %v4655_v41, %v4651_v32 }
 0x8d9   : > { %2446 = vmatpush.bf16.msrb.mxu0 %v2331_v58  ;;  %v4861_v3 = vpop.eup %3326  ;;  %2351 = vmatpush.bf16.msra.mxu1 %v2324_v46  ;;  %v2338_v48 = vpack.c.bf16 %v4733_v0, %v4729_v12  ;;  %v4879_v46 = vpop.f32.mrf.mxu2  ;;  %v2105_v9 = vsub.f32 %v5306_v27, %v4673_v60  ;;  %v2184_v32 = vmul.f32 1.442695, %v2085_v30  ;;  %v2232_v41 = vmul.f32 1.442695, %v2109_v6  ;;  %v5314_v27 = vld [vmem:[#allocation9_spill] sm:$0xff] }
 0x8da   : > { %v2265_v42 = vadd.f32 %v4738_v5, %v2264_v4  ;;  %v2107_v4 = vsub.f32 %v4533_v8, %v4673_v60  ;;  %v2286_v31 = vadd.f32 %v4818_v62, %v2285_v19  ;;  %v2180_v5 = vmul.f32 1.442695, %v2083_v39  ;;  %v3329_v38 = vpop.eup %3328  ;;  %v4877_v39 = vpop.f32.mrf.mxu0 }
 0x8db   : > { %v2329_v19 = vpack.c.bf16 %v3325_v1, %v3323_v18  ;;  %v3331_v58 = vpop.eup %3330  ;;  %v2192_v6 = vmul.f32 1.442695, %v2089_v14 }
 0x8dc   : > { %v2266_v52 = vadd.f32 %v4742_v36, %v2265_v42  ;;  %v2236_v36 = vmul.f32 1.442695, %v2111_v17  ;;  %v2287_v42 = vadd.f32 %v4861_v3, %v2286_v31  ;;  %v2103_v17 = vsub.f32 %v5283_v22, %v4673_v60  ;;  %2401 = vmatpush.bf16.msra.mxu3 %v2338_v48  ;;  %v5311_v48 = vld [vmem:[#allocation5_spill] sm:$0xff] }
 0x8dd   : > { %v2228_v33 = vmul.f32 1.442695, %v2107_v4  ;;  %2447 = vmatpush.bf16.msrb.mxu0 %v2329_v19  ;;  %3332 = vpow2.f32 %v2180_v5  ;;  %2352 = vmatpush.bf16.msra.mxu1 %v2322_v11  ;;  %v2327_v31 = vpack.c.bf16 %v3331_v58, %v3329_v38  ;;  %v2320_v22 = vpack.c.bf16 %v4644_v2, %v4637_v40  ;;  %v5307_v11 = vld [vmem:[#allocation17_spill] sm:$0xff]  ;;  %v5310_v19 = vld [vmem:[#allocation18_spill] sm:$0xff] }
 0x8de   : > { %v2267_v8 = vadd.f32 %v4769_v13, %v2266_v52  ;;  %v2288_v52 = vadd.f32 %v3329_v38, %v2287_v42  ;;  %3334 = vpow2.f32 %v2236_v36  ;;  %v2336_v4 = vpack.c.bf16 %v4724_v57, %v4720_v49 }
 0x8df   : > { %3336 = vpow2.f32 %v2240_v54  ;;  %v2220_v5 = vmul.f32 1.442695, %v2103_v17  ;;  %v2224_v36 = vmul.f32 1.442695, %v2105_v9  ;;  %v2325_v2 = vpack.c.bf16 %v4861_v3, %v4818_v62 }
 0x8e0   : > { %v2268_v13 = vadd.f32 %v4794_v24, %v2267_v8  ;;  %v2289_v0 = vadd.f32 %v3331_v58, %v2288_v52  ;;  %v2188_v24 = vmul.f32 1.442695, %v2087_v28  ;;  %3338 = vpow2.f32 %v2228_v33  ;;  %2402 = vmatpush.bf16.msra.mxu3 %v2336_v4  ;;  %v1247_v33 = vpop.permute.xlu0 %1246 }
 0x8e1   : > { %2448 = vmatpush.bf16.msrb.mxu0 %v2327_v31  ;;  %3340 = vpow2.f32 %v2232_v41  ;;  %2353 = vmatpush.bf16.msra.mxu1 %v2320_v22  ;;  %v2196_v57 = vmul.f32 1.442695, %v2091_v7  ;;  %v2334_v28 = vpack.c.bf16 %v4713_v47, %v4707_v59  ;;  %v1689_v7 = vadd.f32 %v4764_v25, %v4820_v15 }
 0x8e2   : > { %v2269_v12 = vadd.f32 %v4775_v43, %v2268_v13  ;;  %v2290_v30 = vadd.f32 %v3323_v18, %v2289_v0  ;;  %v2101_v43 = vsub.f32 %v5307_v11, %v4673_v60  ;;  %3342 = vpow2.f32 %v2184_v32  ;;  %v4917_v47 = vpop.f32.mrf.mxu0  ;;  %v5312_v13 = vld [vmem:[#allocation7_spill] sm:$0xff] }
 0x8e3   : > { %v4897_v49 = vpop.eup %3332  ;;  %3344 = vpow2.f32 %v2188_v24  ;;  %v2323_v25 = vpack.c.bf16 %v4810_v21, %v4808_v45  ;;  %v5309_v38 = vsub.f32 %v4485_v61, %v4673_v60  ;;  %v2316_v58 = vpack.c.bf16 %v5310_v19, %v4611_v26  ;;  %v5315_v26 = vld [vmem:[#allocation11_spill] sm:$0xff] }
 0x8e4   : > { %v2270_v8 = vadd.f32 %v4786_v16, %v2269_v12  ;;  %v2291_v40 = vadd.f32 %v3325_v1, %v2290_v30  ;;  %v2318_v16 = vpack.c.bf16 %v4630_v20, %v4623_v37  ;;  %v4903_v18 = vpop.eup %3334  ;;  %3346 = vpow2.f32 %v2220_v5  ;;  %v5308_v37 = vld [vmem:[#allocation16_spill] sm:$0xff]  ;;  %2403 = vmatpush.bf16.msra.mxu3 %v2334_v28 }
 0x8e5   : > { %2449 = vmatpush.bf16.msrb.mxu0 %v2325_v2  ;;  %v4909_v62 = vpop.eup %3336  ;;  %v2097_v20 = vsub.f32 %v5308_v37, %v4673_v60  ;;  %v2216_v3 = vmul.f32 1.442695, %v2101_v43  ;;  %3348 = vpow2.f32 %v2224_v36  ;;  %v2200_v42 = vmul.f32 1.442695, %v5309_v38  ;;  %v5318_v38 = vld [vmem:[#allocation4_spill] sm:$0xff] }
 0x8e6   : > { %v2271_v54 = vadd.f32 %v4747_v53, %v2270_v8  ;;  %v2212_v53 = vmul.f32 1.442695, %v2099_v29  ;;  %v2292_v1 = vadd.f32 %v4826_v51, %v2291_v40  ;;  %2354 = vmatpush.bf16.msra.mxu1 %v2318_v16  ;;  %v4915_v59 = vpop.eup %3338  ;;  %3350 = vpow2.f32 %v2192_v6  ;;  %v5316_v16 = vld [vmem:[#allocation3_spill] sm:$0xff] }
 0x8e7   : > { %v2347_v29 = vpack.c.bf16 %v4909_v62, %v4903_v18  ;;  %v4926_v15 = vpop.eup %3340  ;;  %3352 = vpow2.f32 %v2196_v57  ;;  %v2332_v17 = vpack.c.bf16 %v5312_v13, %v5311_v48  ;;  %v5313_v52 = vsub.f32 %v4489_v44, %v4673_v60 }
 0x8e8   : > { %v4906_v14 = vadd.f32 %v4762_v63, %v2271_v54  ;;  %v4919_v63 = vpop.f32.mrf.mxu2  ;;  %v2293_v51 = vadd.f32 %v4833_v35, %v2292_v1  ;;  %v4935_v35 = vpop.eup %3342  ;;  %3354 = vpow2.f32 %v2212_v53  ;;  %v1558_v9 = vadd.f32 %v5314_v27, %v1247_v33 }
 0x8e9   : > { %v2204_v45 = vmul.f32 1.442695, %v5313_v52  ;;  %2495 = vmatpush.bf16.msrb.mxu2 %v2347_v29  ;;  %2450 = vmatpush.bf16.msrb.mxu0 %v2323_v25  ;;  %v4941_v61 = vpop.eup %3344  ;;  %v1687_v32 = vadd.f32 %v5315_v26, %v1247_v33  ;;  %v2208_v41 = vmul.f32 1.442695, %v2097_v20  ;;  %3356 = vpow2.f32 %v2216_v3  ;;  %v1257_v3 = vpop.permute.xlu0 %1256  ;;  %v5317_v29 = vld [vmem:[#allocation15_spill] sm:$0xff] }
 0x8ea   : > { %v2294_v21 = vadd.f32 %v4897_v49, %v2293_v51  ;;  %2355 = vmatpush.bf16.msra.mxu1 %v2316_v58  ;;  %2404 = vmatpush.bf16.msra.mxu3 %v2332_v17  ;;  %v3347_v12 = vpop.eup %3346  ;;  %v2345_v44 = vpack.c.bf16 %v4926_v15, %v4915_v59  ;;  %v2321_v60 = vpack.c.bf16 %v4804_v55, %v4798_v23  ;;  %3358 = vpow2.f32 %v2200_v42  ;;  %v1569_v43 = vpop.f32.mrf.mxu0 }
 0x8eb   : > { %v3349_v31 = vpop.eup %3348  ;;  %v1758_v24 = vpack.c.bf16 %v4829_v56, %v1558_v9  ;;  %v4951_v22 = vpack.c.bf16 %v1689_v7, %v1687_v32  ;;  %3360 = vpow2.f32 %v2204_v45  ;;  %v2319_v55 = vpack.c.bf16 %v4790_v10, %v4780_v50  ;;  %v1262_v7 = vpop.permute.xlu2 %1261 }
 0x8ec   : > { %v2295_v0 = vadd.f32 %v4935_v35, %v2294_v21  ;;  %v3351_v4 = vpop.eup %3350  ;;  %3362 = vpow2.f32 %v2208_v41  ;;  %v2343_v23 = vpack.c.bf16 %v3349_v31, %v3347_v12  ;;  %v2317_v28 = vpack.c.bf16 %v5316_v16, %v4751_v34 }
 0x8ed   : > { %2496 = vmatpush.bf16.msrb.mxu2 %v2345_v44  ;;  %2451 = vmatpush.bf16.msrb.mxu0 %v2321_v60  ;;  %v3353_v5 = vpop.eup %3352  ;;  %v1565_v10 = vadd.f32 %v4877_v39, %v1262_v7  ;;  %v1694_v20 = vadd.f32 %v4879_v46, %v1262_v7  ;;  %v1563_v25 = vadd.f32 %v5317_v29, %v1257_v3 }
 0x8ee   : > { %v2296_v8 = vadd.f32 %v4941_v61, %v2295_v0  ;;  %2356 = vmatmul.bf16.vlgmr.msra.gmra.mxu1 %v1758_v24  ;;  %2405 = vmatmul.bf16.vlgmr.msra.gmra.mxu3 %v4951_v22  ;;  %v3355_v30 = vpop.eup %3354  ;;  %v1692_v42 = vadd.f32 %v5318_v38, %v1257_v3  ;;  %v2335_v46 = vpack.c.bf16 %v3351_v4, %v4941_v61 }
 0x8ef   : > { %v3357_v56 = vpop.eup %3356  ;;  %v1760_v13 = vpack.c.bf16 %v1565_v10, %v1563_v25  ;;  %v2333_v21 = vpack.c.bf16 %v4935_v35, %v4897_v49 }
 0x8f0   : > { %v2297_v11 = vadd.f32 %v3351_v4, %v2296_v8  ;;  %v1698_v6 = vpop.f32.mrf.mxu2  ;;  %v3359_v54 = vpop.eup %3358  ;;  %v2341_v57 = vpack.c.bf16 %v3357_v56, %v3355_v30  ;;  %v1761_v17 = vpack.c.bf16 %v1694_v20, %v1692_v42 }
 0x8f1   : > { %2497 = vmatpush.bf16.msrb.mxu2 %v2343_v23  ;;  %2452 = vmatpush.bf16.msrb.mxu0 %v2319_v55  ;;  %v3361_v40 = vpop.eup %3360  ;;  %v2337_v48 = vpack.c.bf16 %v3359_v54, %v3353_v5 }
 0x8f2   : > { %v2298_v36 = vadd.f32 %v3353_v5, %v2297_v11  ;;  %v3363_v53 = vpop.eup %3362  ;;  %v1572_v34 = vpop.f32.mrf.mxu0 }
 0x8f3   : > { %v2339_v50 = vpack.c.bf16 %v3363_v53, %v3361_v40  ;;  %v1272_v32 = vpop.permute.xlu2 %1271 }
 0x8f4   : > { %v2299_v2 = vadd.f32 %v3359_v54, %v2298_v36  ;;  %v1699_v0 = vadd.f32 %v1698_v6, %v1272_v32 }
 0x8f5   : > { %2498 = vmatpush.bf16.msrb.mxu2 %v2341_v57  ;;  %2453 = vmatpush.bf16.msrb.mxu0 %v2317_v28 }
 0x8f6   : > { %v2300_v1 = vadd.f32 %v3361_v40, %v2299_v2 }
 0x8f8   : > { %v2301_v37 = vadd.f32 %v3363_v53, %v2300_v1  ;;  %2454 = vmatmul.bf16.vlgmr.msrb.gmra.mxu0 %v1758_v24  ;;  %v1701_v19 = vpop.f32.mrf.mxu2 }
 0x8f9   : > { %2499 = vmatpush.bf16.msrb.mxu2 %v2339_v50 }
 0x8fa   : > { %v2302_v51 = vadd.f32 %v3355_v30, %v2301_v37  ;;  %v1574_v27 = vpop.f32.mrf.mxu0 }
 0x8fb   : > { %v1282_v60 = vpop.permute.xlu2 %1281 }
 0x8fc   : > { %v2303_v58 = vadd.f32 %v3357_v56, %v2302_v51 }
 0x8fd   : > { %2500 = vmatpush.bf16.msrb.mxu2 %v2337_v48 }
 0x8fe   : > { %v2304_v33 = vadd.f32 %v3347_v12, %v2303_v58  ;;  %2361 = vmatmul.bf16.gmra.mxu1 %v1760_v13  ;;  %2410 = vmatmul.bf16.gmra.mxu3 %v1761_v17  ;;  %v1570_v12 = vadd.f32 %v1569_v43, %v1272_v32 }
 0x900   : > { %v2305_v39 = vadd.f32 %v3349_v31, %v2304_v33  ;;  %v1703_v9 = vpop.f32.mrf.mxu2 }
 0x901   : > { %2501 = vmatpush.bf16.msrb.mxu2 %v2335_v46  ;;  %v1704_v24 = vadd.f32 %v1703_v9, %v1282_v60 }
 0x902   : > { %v2306_v52 = vadd.f32 %v4915_v59, %v2305_v39  ;;  %v1267_v59 = vpop.permute.xlu0 %1266 }
 0x903   : > { %v1697_v61 = vadd.f32 %v4919_v63, %v1267_v59  ;;  %v1292_v23 = vpop.permute.xlu2 %1291 }
 0x904   : > { %v2307_v45 = vadd.f32 %v4926_v15, %v2306_v52  ;;  %v1568_v15 = vadd.f32 %v4917_v47, %v1267_v59  ;;  %v2273_v52 = vrot.slane %v4906_v14, 4 }
 0x905   : > { %2502 = vmatpush.bf16.msrb.mxu2 %v2333_v21  ;;  %v1763_v35 = vpack.c.bf16 %v1699_v0, %v1697_v61 }
 0x906   : > { %v2308_v26 = vadd.f32 %v4903_v18, %v2307_v45  ;;  %v1762_v49 = vpack.c.bf16 %v1570_v12, %v1568_v15  ;;  %v1577_v18 = vpop.f32.mrf.mxu0 }
 0x908   : > { %v4970_v41 = vadd.f32 %v4909_v62, %v2308_v26  ;;  %2503 = vmatmul.bf16.vlgmr.msrb.gmra.mxu2 %v4951_v22  ;;  %2459 = vmatmul.bf16.gmra.mxu0 %v1760_v13  ;;  %v1706_v44 = vpop.f32.mrf.mxu2  ;;  %v1575_v62 = vadd.f32 %v1574_v27, %v1282_v60  ;;  %v2274_v26 = vadd.f32 %v2273_v52, %v4906_v14 }
 0x90a   : > { %v1277_v31 = vpop.permute.xlu0 %1276  ;;  %v2275_v15 = vrot.slane %v2274_v26, 2 }
 0x90b   : > { %v1573_v8 = vadd.f32 %v1572_v34, %v1277_v31  ;;  %v1702_v5 = vadd.f32 %v1701_v19, %v1277_v31  ;;  %v1302_v16 = vpop.permute.xlu2 %1301 }
 0x90c   : > { %v2276_v61 = vadd.f32 %v2275_v15, %v2274_v26 }
 0x90d   : > { %v1764_v30 = vpack.c.bf16 %v1575_v62, %v1573_v8  ;;  %v1765_v47 = vpack.c.bf16 %v1704_v24, %v1702_v5 }
 0x90e   : > { %2366 = vmatmul.bf16.gmra.mxu1 %v1762_v49  ;;  %2415 = vmatmul.bf16.gmra.mxu3 %v1763_v35  ;;  %v1579_v4 = vpop.f32.mrf.mxu0 }
 0x90f   : > { %v1580_v55 = vadd.f32 %v1579_v4, %v1292_v23 }
 0x910   : > { %v1708_v22 = vpop.f32.mrf.mxu2 }
 0x911   : > { %v1709_v56 = vadd.f32 %v1708_v22, %v1292_v23 }
 0x912   : > { %v1287_v43 = vpop.permute.xlu0 %1286 }
 0x913   : > { %v1578_v6 = vadd.f32 %v1577_v18, %v1287_v43  ;;  %v1707_v36 = vadd.f32 %v1706_v44, %v1287_v43  ;;  %v1312_v25 = vpop.permute.xlu2 %1311  ;;  %v2310_v44 = vrot.slane %v4970_v41, 4 }
 0x915   : > { %v1766_v54 = vpack.c.bf16 %v1580_v55, %v1578_v6  ;;  %v1767_v40 = vpack.c.bf16 %v1709_v56, %v1707_v36  ;;  %v2311_v14 = vadd.f32 %v2310_v44, %v4970_v41 }
 0x916   : > { %v1582_v63 = vpop.f32.mrf.mxu0 }
 0x917   : > { %v2312_v8 = vrot.slane %v2311_v14, 2 }
 0x918   : > { %2508 = vmatmul.bf16.gmra.mxu2 %v1761_v17  ;;  %2464 = vmatmul.bf16.gmra.mxu0 %v1762_v49  ;;  %v1711_v11 = vpop.f32.mrf.mxu2  ;;  %v2277_v49 = vrot.slane %v2276_v61, 1 }
 0x91a   : > { %v1297_v37 = vpop.permute.xlu0 %1296 }
 0x91b   : > { %v1583_v50 = vadd.f32 %v1582_v63, %v1297_v37  ;;  %v1712_v10 = vadd.f32 %v1711_v11, %v1297_v37  ;;  %v1322_v45 = vpop.permute.xlu2 %1321 }
 0x91e   : > { %2371 = vmatmul.bf16.gmra.mxu1 %v1764_v30  ;;  %2420 = vmatmul.bf16.gmra.mxu3 %v1765_v47  ;;  %v1584_v2 = vpop.f32.mrf.mxu0 }
 0x91f   : > { %v1585_v1 = vadd.f32 %v1584_v2, %v1302_v16 }
 0x920   : > { %v1713_v57 = vpop.f32.mrf.mxu2 }
 0x921   : > { %v1714_v7 = vadd.f32 %v1713_v57, %v1302_v16  ;;  %v1768_v20 = vpack.c.bf16 %v1585_v1, %v1583_v50 }
 0x922   : > { %v1307_v34 = vpop.permute.xlu0 %1306 }
 0x923   : > { %v1769_v3 = vpack.c.bf16 %v1714_v7, %v1712_v10 }
 0x926   : > { %v1587_v28 = vpop.f32.mrf.mxu0 }
 0x927   : > { %v1588_v19 = vadd.f32 %v1587_v28, %v1307_v34 }
 0x928   : > { %2513 = vmatmul.bf16.gmra.mxu2 %v1763_v35  ;;  %2469 = vmatmul.bf16.gmra.mxu0 %v1764_v30  ;;  %v1716_v53 = vpop.f32.mrf.mxu2  ;;  %v2278_v35 = vadd.f32 %v2277_v49, %v2276_v61 }
 0x929   : > { %v1717_v58 = vadd.f32 %v1716_v53, %v1307_v34 }
 0x92a   : > { %v1317_v9 = vpop.permute.xlu0 %1316  ;;  %3364 = vrcp.f32 %v2278_v35 }
 0x92e   : > { %2376 = vmatmul.bf16.gmra.mxu1 %v1766_v54  ;;  %2425 = vmatmul.bf16.gmra.mxu3 %v1767_v40  ;;  %v1589_v51 = vpop.f32.mrf.mxu0 }
 0x92f   : > { %v1590_v38 = vadd.f32 %v1589_v51, %v1312_v25 }
 0x930   : > { %v1718_v29 = vpop.f32.mrf.mxu2  ;;  %v4978_v62 = vpop.eup %3364 }
 0x931   : > { %v1719_v42 = vadd.f32 %v1718_v29, %v1312_v25  ;;  %v1770_v17 = vpack.c.bf16 %v1590_v38, %v1588_v19 }
 0x933   : > { %v1771_v33 = vpack.c.bf16 %v1719_v42, %v1717_v58 }
 0x936   : > { %v1592_v48 = vpop.f32.mrf.mxu0 }
 0x937   : > { %v1593_v32 = vadd.f32 %v1592_v48, %v1317_v9 }
 0x938   : > { %2518 = vmatmul.bf16.gmra.mxu2 %v1765_v47  ;;  %2474 = vmatmul.bf16.gmra.mxu0 %v1766_v54  ;;  %v1721_v13 = vpop.f32.mrf.mxu2  ;;  %v2313_v47 = vadd.f32 %v2312_v8, %v2311_v14 }
 0x939   : > { %v1722_v12 = vadd.f32 %v1721_v13, %v1317_v9 }
 0x93a   : > { %v2314_v56 = vrot.slane %v2313_v47, 1 }
 0x93c   : > { %v2315_v6 = vadd.f32 %v2314_v56, %v2313_v47 }
 0x93e   : > { %2381 = vmatmul.bf16.gmra.mxu1 %v1768_v20  ;;  %2430 = vmatmul.bf16.gmra.mxu3 %v1769_v3  ;;  %v1594_v39 = vpop.f32.mrf.mxu0  ;;  %3366 = vrcp.f32 %v2315_v6 }
 0x93f   : > { %v1595_v21 = vadd.f32 %v1594_v39, %v1322_v45 }
 0x940   : > { %v1723_v46 = vpop.f32.mrf.mxu2 }
 0x941   : > { %v1724_v27 = vadd.f32 %v1723_v46, %v1322_v45  ;;  %v1772_v0 = vpack.c.bf16 %v1595_v21, %v1593_v32 }
 0x943   : > { %v1773_v59 = vpack.c.bf16 %v1724_v27, %v1722_v12 }
 0x944   : > { %v4995_v7 = vpop.eup %3366 }
 0x948   : > { %2523 = vmatmul.bf16.gmra.mxu2 %v1767_v40  ;;  %2479 = vmatmul.bf16.gmra.mxu0 %v1768_v20 }
 0x94e   : > { %2386 = vmatmul.bf16.gmra.mxu1 %v1770_v17  ;;  %2435 = vmatmul.bf16.gmra.mxu3 %v1771_v33 }
 0x958   : > { %2528 = vmatmul.bf16.gmra.mxu2 %v1769_v3  ;;  %2484 = vmatmul.bf16.gmra.mxu0 %v1770_v17 }
 0x95e   : > { %2391 = vmatmul.bf16.gmra.mxu1 %v1772_v0  ;;  %2440 = vmatmul.bf16.gmra.mxu3 %v1773_v59 }
 0x968   : > { %2533 = vmatmul.bf16.gmra.mxu2 %v1771_v33  ;;  %2489 = vmatmul.bf16.gmra.mxu0 %v1772_v0 }
 0x96b   : > { %v2357_v18 = vpop.f32.mrf.mxu1 }
 0x971   : > { %v2406_v60 = vpop.f32.mrf.mxu3 }
 0x972   : > { %v2407_v31 = vadd.f32 %v2406_v60, %v2357_v18 }
 0x973   : > { %v2359_v24 = vpop.f32.mrf.mxu1 }
 0x974   : > { %v4982_v4 = vmul.f32 %v4978_v62, %v2407_v31 }
 0x975   : > { %v2455_v22 = vpop.f32.mrf.mxu0 }
 0x978   : > { %2538 = vmatmul.bf16.gmra.mxu2 %v1773_v59 }
 0x979   : > { %v2408_v5 = vpop.f32.mrf.mxu3 }
 0x97a   : > { %v2409_v30 = vadd.f32 %v2408_v5, %v2359_v24 }
 0x97b   : > { %v2362_v63 = vpop.f32.mrf.mxu1 }
 0x97c   : > { %v4985_v11 = vmul.f32 %v4978_v62, %v2409_v30 }
 0x97d   : > { %v2457_v23 = vpop.f32.mrf.mxu0 }
 0x97e   : > { %v2594_v55 = vpack.c.bf16 %v4985_v11, %v4982_v4  ;;  %v3202_v4 = vld [vmem:[%s5196_s5 + $0x10] sm:$0xff]  ;;  %v3203_v11 = vld [vmem:[%s5196_s5 + $0x18] sm:$0xff] }
 0x981   : > { %v2411_v41 = vpop.f32.mrf.mxu3 }
 0x982   : > { %v2412_v43 = vadd.f32 %v2411_v41, %v2362_v63 }
 0x983   : > { %v2364_v36 = vpop.f32.mrf.mxu1 }
 0x984   : > { %v4990_v54 = vmul.f32 %v4978_v62, %v2412_v43 }
 0x985   : > { %v2460_v40 = vpop.f32.mrf.mxu0 }
 0x989   : > { %v2413_v2 = vpop.f32.mrf.mxu3 }
 0x98a   : > { %v2414_v57 = vadd.f32 %v2413_v2, %v2364_v36 }
 0x98b   : > { %v2504_v16 = vpop.f32.mrf.mxu2  ;;  %v2367_v28 = vpop.f32.mrf.mxu1 }
 0x98c   : > { %v2505_v53 = vadd.f32 %v2504_v16, %v2455_v22  ;;  %v4993_v1 = vmul.f32 %v4978_v62, %v2414_v57 }
 0x98d   : > { %v2462_v37 = vpop.f32.mrf.mxu0 }
 0x98e   : > { %v4998_v50 = vmul.f32 %v4995_v7, %v2505_v53  ;;  %v2596_v10 = vpack.c.bf16 %v4993_v1, %v4990_v54  ;;  %v3201_v1 = vld [vmem:[%s5196_s5 + $0x8] sm:$0xff] }
 0x991   : > { %v2416_v20 = vpop.f32.mrf.mxu3 }
 0x992   : > { %v2417_v3 = vadd.f32 %v2416_v20, %v2367_v28 }
 0x993   : > { %v2506_v51 = vpop.f32.mrf.mxu2  ;;  %v2369_v29 = vpop.f32.mrf.mxu1 }
 0x994   : > { %v2507_v25 = vadd.f32 %v2506_v51, %v2457_v23  ;;  %v5003_v38 = vmul.f32 %v4978_v62, %v2417_v3 }
 0x995   : > { %v2465_v42 = vpop.f32.mrf.mxu0 }
 0x996   : > { %v5006_v34 = vmul.f32 %v4995_v7, %v2507_v25 }
 0x998   : > { %v2595_v19 = vpack.c.bf16 %v5006_v34, %v4998_v50  ;;  %v3206_v50 = vld [vmem:[%s5196_s5 + $0x30] sm:$0xff] }
 0x999   : > { %v2418_v58 = vpop.f32.mrf.mxu3 }
 0x99a   : > { %v2419_v48 = vadd.f32 %v2418_v58, %v2369_v29 }
 0x99b   : > { %v2509_v13 = vpop.f32.mrf.mxu2  ;;  %v2372_v17 = vpop.f32.mrf.mxu1 }
 0x99c   : > { %v2510_v33 = vadd.f32 %v2509_v13, %v2460_v40  ;;  %v5011_v39 = vmul.f32 %v4978_v62, %v2419_v48 }
 0x99d   : > { %v2467_v52 = vpop.f32.mrf.mxu0 }
 0x99e   : > { %v5014_v46 = vmul.f32 %v4995_v7, %v2510_v33  ;;  %v2598_v45 = vpack.c.bf16 %v5011_v39, %v5003_v38  ;;  %v3200_v38 = vld [vmem:[%s5196_s5] sm:$0xff] }
 0x9a1   : > { %v2421_v21 = vpop.f32.mrf.mxu3 }
 0x9a2   : > { %v2422_v27 = vadd.f32 %v2421_v21, %v2372_v17 }
 0x9a3   : > { %v2511_v9 = vpop.f32.mrf.mxu2  ;;  %v2374_v26 = vpop.f32.mrf.mxu1 }
 0x9a4   : > { %v2512_v32 = vadd.f32 %v2511_v9, %v2462_v37  ;;  %v5019_v12 = vmul.f32 %v4978_v62, %v2422_v27 }
 0x9a5   : > { %v2470_v59 = vpop.f32.mrf.mxu0 }
 0x9a6   : > { %v5022_v0 = vmul.f32 %v4995_v7, %v2512_v32 }
 0x9a8   : > { %v2597_v15 = vpack.c.bf16 %v5022_v0, %v5014_v46  ;;  %v2807_v0 = vpop.permute.xlu0 %2806 }
 0x9a9   : > { %v2423_v61 = vpop.f32.mrf.mxu3 }
 0x9aa   : > { %v2424_v49 = vadd.f32 %v2423_v61, %v2374_v26 }
 0x9ab   : > { %v2514_v35 = vpop.f32.mrf.mxu2  ;;  %v2377_v18 = vpop.f32.mrf.mxu1 }
 0x9ac   : > { %v2515_v44 = vadd.f32 %v2514_v35, %v2465_v42  ;;  %v5027_v60 = vmul.f32 %v4978_v62, %v2424_v49 }
 0x9ad   : > { %v2472_v22 = vpop.f32.mrf.mxu0 }
 0x9ae   : > { %v5030_v31 = vmul.f32 %v4995_v7, %v2515_v44  ;;  %v2600_v14 = vpack.c.bf16 %v5027_v60, %v5019_v12 }
 0x9b1   : > { %v2426_v24 = vpop.f32.mrf.mxu3 }
 0x9b2   : > { %v2427_v8 = vadd.f32 %v2426_v24, %v2377_v18 }
 0x9b3   : > { %v2516_v5 = vpop.f32.mrf.mxu2  ;;  %v2379_v30 = vpop.f32.mrf.mxu1 }
 0x9b4   : > { %v2517_v47 = vadd.f32 %v2516_v5, %v2467_v52  ;;  %v5035_v63 = vmul.f32 %v4978_v62, %v2427_v8 }
 0x9b5   : > { %v2475_v57 = vpop.f32.mrf.mxu0 }
 0x9b6   : > { %v5038_v23 = vmul.f32 %v4995_v7, %v2517_v47 }
 0x9b8   : > { %v2599_v56 = vpack.c.bf16 %v5038_v23, %v5030_v31  ;;  %v3369_v23 = vld [vmem:[%s3465_s29 + $0x10] sm:$0xff] }
 0x9b9   : > { %v2428_v41 = vpop.f32.mrf.mxu3 }
 0x9ba   : > { %v2429_v43 = vadd.f32 %v2428_v41, %v2379_v30 }
 0x9bb   : > { %v2519_v6 = vpop.f32.mrf.mxu2  ;;  %v2382_v36 = vpop.f32.mrf.mxu1 }
 0x9bc   : > { %v2520_v40 = vadd.f32 %v2519_v6, %v2470_v59  ;;  %v2564_v2 = vmul.f32 %v4978_v62, %v2429_v43 }
 0x9bd   : > { %v2477_v29 = vpop.f32.mrf.mxu0 }
 0x9be   : > { %v5044_v16 = vmul.f32 %v4995_v7, %v2520_v40  ;;  %v2602_v28 = vpack.c.bf16 %v2564_v2, %v5035_v63 }
 0x9c1   : > { %v2431_v53 = vpop.f32.mrf.mxu3 }
 0x9c3   : > { %v2521_v37 = vpop.f32.mrf.mxu2  ;;  %v2384_v20 = vpop.f32.mrf.mxu1 }
 0x9c4   : > { %v2522_v3 = vadd.f32 %v2521_v37, %v2472_v22 }
 0x9c5   : > { %v2480_v33 = vpop.f32.mrf.mxu0 }
 0x9c6   : > { %v5048_v51 = vmul.f32 %v4995_v7, %v2522_v3  ;;  %v2432_v3 = vadd.f32 %v2431_v53, %v2382_v36 }
 0x9c8   : > { %v2601_v25 = vpack.c.bf16 %v5048_v51, %v5044_v16  ;;  %v2812_v16 = vpop.permute.xlu2 %2811 }
 0x9c9   : > { %v2433_v42 = vpop.f32.mrf.mxu3 }
 0x9ca   : > { %v2434_v40 = vadd.f32 %v2433_v42, %v2384_v20 }
 0x9cb   : > { %v2524_v58 = vpop.f32.mrf.mxu2  ;;  %v2387_v48 = vpop.f32.mrf.mxu1 }
 0x9cc   : > { %v2525_v13 = vadd.f32 %v2524_v58, %v2475_v57  ;;  %v2568_v58 = vmul.f32 %v4978_v62, %v2434_v40 }
 0x9cd   : > { %v2482_v49 = vpop.f32.mrf.mxu0 }
 0x9ce   : > { %v5053_v17 = vmul.f32 %v4995_v7, %v2525_v13 }
 0x9d1   : > { %v2436_v52 = vpop.f32.mrf.mxu3 }
 0x9d2   : > { %v2437_v41 = vadd.f32 %v2436_v52, %v2387_v48 }
 0x9d3   : > { %v2526_v21 = vpop.f32.mrf.mxu2  ;;  %v2389_v9 = vpop.f32.mrf.mxu1 }
 0x9d4   : > { %v2527_v27 = vadd.f32 %v2526_v21, %v2477_v29  ;;  %v2570_v29 = vmul.f32 %v4978_v62, %v2437_v41  ;;  %v2566_v21 = vmul.f32 %v4978_v62, %v2432_v3 }
 0x9d5   : > { %v2485_v24 = vpop.f32.mrf.mxu0 }
 0x9d6   : > { %v2565_v26 = vmul.f32 %v4995_v7, %v2527_v27  ;;  %v2604_v48 = vpack.c.bf16 %v2568_v58, %v2566_v21 }
 0x9d8   : > { %v2603_v32 = vpack.c.bf16 %v2565_v26, %v5053_v17 }
 0x9d9   : > { %v2438_v59 = vpop.f32.mrf.mxu3 }
 0x9da   : > { %v2439_v30 = vadd.f32 %v2438_v59, %v2389_v9 }
 0x9db   : > { %v2529_v61 = vpop.f32.mrf.mxu2  ;;  %v2392_v35 = vpop.f32.mrf.mxu1 }
 0x9dc   : > { %v2572_v2 = vmul.f32 %v4978_v62, %v2439_v30  ;;  %v2530_v12 = vadd.f32 %v2529_v61, %v2480_v33  ;;  %v3370_v33 = vld [vmem:[%s3465_s29 + $0x20] sm:$0xff]  ;;  %v2817_v61 = vpop.permute.xlu0 %2816 }
 0x9dd   : > { %v2487_v37 = vpop.f32.mrf.mxu0 }
 0x9de   : > { %v2606_v13 = vpack.c.bf16 %v2572_v2, %v2570_v29  ;;  %v3374_v29 = vld [vmem:[%s3465_s29 + $0x18] sm:$0xff] }
 0x9e1   : > { %v2441_v18 = vpop.f32.mrf.mxu3 }
 0x9e2   : > { %v2442_v22 = vadd.f32 %v2441_v18, %v2392_v35 }
 0x9e3   : > { %v2531_v44 = vpop.f32.mrf.mxu2  ;;  %v2394_v8 = vpop.f32.mrf.mxu1 }
 0x9e4   : > { %v2574_v43 = vmul.f32 %v4978_v62, %v2442_v22  ;;  %v2532_v35 = vadd.f32 %v2531_v44, %v2482_v49  ;;  %v2827_v40 = vpop.permute.xlu0 %2826 }
 0x9e5   : > { %v2490_v52 = vpop.f32.mrf.mxu0 }
 0x9e6   : > { %v2569_v39 = vmul.f32 %v4995_v7, %v2532_v35 }
 0x9e9   : > { %v2443_v5 = vpop.f32.mrf.mxu3 }
 0x9ea   : > { %v2444_v47 = vadd.f32 %v2443_v5, %v2394_v8  ;;  %v2822_v8 = vpop.permute.xlu2 %2821 }
 0x9eb   : > { %v2534_v63 = vpop.f32.mrf.mxu2 }
 0x9ec   : > { %v2576_v6 = vmul.f32 %v4978_v62, %v2444_v47  ;;  %v2535_v62 = vadd.f32 %v2534_v63, %v2485_v24  ;;  %v3371_v24 = vld [vmem:[%s3465_s29 + $0x30] sm:$0xff]  ;;  %v3372_v63 = vld [vmem:[%s3465_s29 + $0x8] sm:$0xff] }
 0x9ed   : > { %v2492_v53 = vpop.f32.mrf.mxu0 }
 0x9ee   : > { %v2608_v57 = vpack.c.bf16 %v2576_v6, %v2574_v43  ;;  %v2571_v60 = vmul.f32 %v4995_v7, %v2535_v62  ;;  %v3373_v43 = vld [vmem:[%s3465_s29 + $0x40] sm:$0xff]  ;;  %v2837_v62 = vpop.permute.xlu0 %2836 }
 0x9f0   : > { %2658 = vmatpush.bf16.msrb.mxu1 %v2608_v57 }
 0x9f2   : > { %v2832_v21 = vpop.permute.xlu2 %2831 }
 0x9f3   : > { %v2536_v17 = vpop.f32.mrf.mxu2 }
 0x9f4   : > { %2659 = vmatpush.bf16.msrb.mxu1 %v2606_v13  ;;  %v2537_v42 = vadd.f32 %v2536_v17, %v2487_v37  ;;  %v3375_v13 = vld [vmem:[%s3465_s29 + $0x50] sm:$0xff] }
 0x9f8   : > { %2660 = vmatpush.bf16.msrb.mxu1 %v2604_v48 }
 0x9fb   : > { %v2539_v27 = vpop.f32.mrf.mxu2 }
 0x9fc   : > { %2661 = vmatpush.bf16.msrb.mxu1 %v2602_v28  ;;  %v2540_v36 = vadd.f32 %v2539_v27, %v2490_v52  ;;  %v2573_v28 = vmul.f32 %v4995_v7, %v2537_v42  ;;  %v3377_v42 = vld [vmem:[%s3465_s29 + $0x60] sm:$0xff] }
 0x9fe   : > { %v2575_v26 = vmul.f32 %v4995_v7, %v2540_v36 }
 0xa00   : > { %2662 = vmatpush.bf16.msrb.mxu1 %v2600_v14  ;;  %v2567_v14 = vmul.f32 %v4995_v7, %v2530_v12 }
 0xa02   : > { %v2605_v54 = vpack.c.bf16 %v2569_v39, %v2567_v14  ;;  %v2842_v39 = vpop.permute.xlu2 %2841 }
 0xa03   : > { %v2541_v20 = vpop.f32.mrf.mxu2 }
 0xa04   : > { %v2542_v9 = vadd.f32 %v2541_v20, %v2492_v53  ;;  %2663 = vmatpush.bf16.msrb.mxu1 %v2598_v45  ;;  %v2607_v45 = vpack.c.bf16 %v2573_v28, %v2571_v60  ;;  %v3376_v53 = vld [vmem:[%s3465_s29 + $0x28] sm:$0xff]  ;;  %v3379_v60 = vld [vmem:[%s3465_s29 + $0x70] sm:$0xff] }
 0xa06   : > { %v2577_v59 = vmul.f32 %v4995_v7, %v2542_v9  ;;  %v3205_v7 = vld [vmem:[%s5196_s5 + $0x28] sm:$0xff] }
 0xa08   : > { %v2609_v18 = vpack.c.bf16 %v2577_v59, %v2575_v26  ;;  %2664 = vmatpush.bf16.msrb.mxu1 %v2596_v10  ;;  %v3207_v10 = vld [vmem:[%s5196_s5 + $0x38] sm:$0xff] }
 0xa0a   : > { %2707 = vmatpush.bf16.msrb.mxu3 %v2609_v18  ;;  %v3378_v18 = vld [vmem:[%s3465_s29 + $0x38] sm:$0xff] }
 0xa0c   : > { %2665 = vmatpush.bf16.msrb.mxu1 %v2594_v55  ;;  %v3204_v55 = vld [vmem:[%s5196_s5 + $0x20] sm:$0xff] }
 0xa0e   : > { %2708 = vmatpush.bf16.msrb.mxu3 %v2607_v45 }
 0xa0f   : > { %2666 = vmatmul.bf16.vlgmr.msrb.gmra.mxu1 %v3200_v38 }
 0xa12   : > { %2709 = vmatpush.bf16.msrb.mxu3 %v2605_v54 }
 0xa16   : > { %2710 = vmatpush.bf16.msrb.mxu3 %v2603_v32 }
 0xa1a   : > { %2711 = vmatpush.bf16.msrb.mxu3 %v2601_v25 }
 0xa1e   : > { %2712 = vmatpush.bf16.msrb.mxu3 %v2599_v56 }
 0xa1f   : > { %2671 = vmatmul.bf16.gmra.mxu1 %v3201_v1 }
 0xa22   : > { %2713 = vmatpush.bf16.msrb.mxu3 %v2597_v15 }
 0xa26   : > { %2714 = vmatpush.bf16.msrb.mxu3 %v2595_v19  ;;  %v3368_v19 = vld [vmem:[%s3465_s29] sm:$0xff] }
 0xa29   : > { %2715 = vmatmul.bf16.vlgmr.msrb.gmra.mxu3 %v3200_v38 }
 0xa2f   : > { %2676 = vmatmul.bf16.gmra.mxu1 %v3202_v4 }
 0xa39   : > { %2720 = vmatmul.bf16.gmra.mxu3 %v3201_v1 }
 0xa3f   : > { %2681 = vmatmul.bf16.gmra.mxu1 %v3203_v11 }
 0xa49   : > { %2725 = vmatmul.bf16.gmra.mxu3 %v3202_v4  ;;  %v3380_v4 = vld [vmem:[%s3465_s29 + $0x48] sm:$0xff] }
 0xa4f   : > { %2686 = vmatmul.bf16.gmra.mxu1 %v3204_v55 }
 0xa59   : > { %2730 = vmatmul.bf16.gmra.mxu3 %v3203_v11 }
 0xa5f   : > { %2691 = vmatmul.bf16.gmra.mxu1 %v3205_v7 }
 0xa69   : > { %2735 = vmatmul.bf16.gmra.mxu3 %v3204_v55  ;;  %v3381_v55 = vld [vmem:[%s3465_s29 + $0x80] sm:$0xff] }
 0xa6f   : > { %2696 = vmatmul.bf16.gmra.mxu1 %v3206_v50 }
 0xa79   : > { %2740 = vmatmul.bf16.gmra.mxu3 %v3205_v7 }
 0xa7f   : > { %2701 = vmatmul.bf16.gmra.mxu1 %v3207_v10 }
 0xa89   : > { %2745 = vmatmul.bf16.gmra.mxu3 %v3206_v50  ;;  %v2847_v50 = vpop.permute.xlu0 %2846 }
 0xa8c   : > { %v2667_v34 = vpop.f32.mrf.mxu1 }
 0xa8d   : > { %v2756_v46 = vadd.f32 %v3368_v19, %v2667_v34 }
 0xa8f   : > { %v2884_v15 = vadd.f32 %v2807_v0, %v2756_v46 }
 0xa91   : > { %2916 = vst [vmem:[%s5123_s13] sm:$0xff] %v2884_v15 }
 0xa94   : > { %v2669_v31 = vpop.f32.mrf.mxu1 }
 0xa95   : > { %v2758_v56 = vadd.f32 %v3369_v23, %v2669_v31  ;;  %v3383_v31 = vld [vmem:[%s3465_s29 + $0x90] sm:$0xff] }
 0xa97   : > { %v2886_v51 = vadd.f32 %v2812_v16, %v2758_v56  ;;  %v2852_v56 = vpop.permute.xlu2 %2851 }
 0xa99   : > { %2750 = vmatmul.bf16.gmra.mxu3 %v3207_v10  ;;  %2918 = vst [vmem:[%s5123_s13 + $0x10] sm:$0xff] %v2886_v51 }
 0xa9c   : > { %v2672_v25 = vpop.f32.mrf.mxu1 }
 0xa9d   : > { %v2760_v32 = vadd.f32 %v3370_v33, %v2672_v25 }
 0xa9f   : > { %v2888_v49 = vadd.f32 %v2817_v61, %v2760_v32  ;;  %v3384_v32 = vld [vmem:[%s3465_s29 + $0x68] sm:$0xff] }
 0xaa1   : > { %2920 = vst [vmem:[%s5123_s13 + $0x20] sm:$0xff] %v2888_v49  ;;  %v3385_v49 = vld [vmem:[%s3465_s29 + $0xa0] sm:$0xff] }
 0xaa4   : > { %v2674_v44 = vpop.f32.mrf.mxu1 }
 0xaa5   : > { %v2762_v22 = vadd.f32 %v3371_v24, %v2674_v44  ;;  %v2857_v24 = vpop.permute.xlu0 %2856 }
 0xaa7   : > { %v2890_v5 = vadd.f32 %v2822_v8, %v2762_v22 }
 0xaa9   : > { %2922 = vst [vmem:[%s5123_s13 + $0x30] sm:$0xff] %v2890_v5 }
 0xaac   : > { %v2716_v30 = vpop.f32.mrf.mxu3  ;;  %v2677_v47 = vpop.f32.mrf.mxu1 }
 0xaad   : > { %v2757_v41 = vadd.f32 %v3372_v63, %v2716_v30  ;;  %v2764_v6 = vadd.f32 %v3373_v43, %v2677_v47  ;;  %v3386_v47 = vld [vmem:[%s3465_s29 + $0x78] sm:$0xff] }
 0xaaf   : > { %v2885_v2 = vadd.f32 %v2807_v0, %v2757_v41  ;;  %v2892_v57 = vadd.f32 %v2827_v40, %v2764_v6  ;;  %v3382_v0 = vld [vmem:[%s3465_s29 + $0x58] sm:$0xff]  ;;  %v3387_v41 = vld [vmem:[%s3465_s29 + $0xb0] sm:$0xff]  ;;  %v2862_v6 = vpop.permute.xlu2 %2861 }
 0xab1   : > { %2917 = vst [vmem:[%s5123_s13 + $0x8] sm:$0xff] %v2885_v2 }
 0xab2   : > { %2924 = vst [vmem:[%s5123_s13 + $0x40] sm:$0xff] %v2892_v57 }
 0xab4   : > { %v2718_v37 = vpop.f32.mrf.mxu3  ;;  %v2679_v3 = vpop.f32.mrf.mxu1 }
 0xab5   : > { %v2759_v58 = vadd.f32 %v3374_v29, %v2718_v37  ;;  %v2766_v17 = vadd.f32 %v3375_v13, %v2679_v3  ;;  %v3388_v3 = vld [vmem:[%s3465_s29 + $0x88] sm:$0xff] }
 0xab7   : > { %v2887_v48 = vadd.f32 %v2812_v16, %v2759_v58  ;;  %v2894_v52 = vadd.f32 %v2832_v21, %v2766_v17  ;;  %v3389_v58 = vld [vmem:[%s3465_s29 + $0xc0] sm:$0xff]  ;;  %v2867_v17 = vpop.permute.xlu0 %2866 }
 0xab9   : > { %2919 = vst [vmem:[%s5123_s13 + $0x18] sm:$0xff] %v2887_v48 }
 0xaba   : > { %2926 = vst [vmem:[%s5123_s13 + $0x50] sm:$0xff] %v2894_v52 }
 0xabc   : > { %v2721_v27 = vpop.f32.mrf.mxu3  ;;  %v2682_v36 = vpop.f32.mrf.mxu1 }
 0xabd   : > { %v2761_v20 = vadd.f32 %v3376_v53, %v2721_v27  ;;  %v2768_v9 = vadd.f32 %v3377_v42, %v2682_v36  ;;  %v3390_v36 = vld [vmem:[%s3465_s29 + $0x98] sm:$0xff] }
 0xabf   : > { %v2889_v26 = vadd.f32 %v2817_v61, %v2761_v20  ;;  %v2896_v59 = vadd.f32 %v2837_v62, %v2768_v9  ;;  %v3391_v20 = vld [vmem:[%s3465_s29 + $0xd0] sm:$0xff]  ;;  %v2872_v9 = vpop.permute.xlu2 %2871 }
 0xac1   : > { %2921 = vst [vmem:[%s5123_s13 + $0x28] sm:$0xff] %v2889_v26 }
 0xac2   : > { %2928 = vst [vmem:[%s5123_s13 + $0x60] sm:$0xff] %v2896_v59 }
 0xac4   : > { %v2723_v35 = vpop.f32.mrf.mxu3  ;;  %v2684_v28 = vpop.f32.mrf.mxu1 }
 0xac5   : > { %v2763_v12 = vadd.f32 %v3378_v18, %v2723_v35  ;;  %v2770_v38 = vadd.f32 %v3379_v60, %v2684_v28  ;;  %v3392_v28 = vld [vmem:[%s3465_s29 + $0xa8] sm:$0xff] }
 0xac7   : > { %v2891_v45 = vadd.f32 %v2822_v8, %v2763_v12  ;;  %v2898_v14 = vadd.f32 %v2842_v39, %v2770_v38  ;;  %v3393_v12 = vld [vmem:[%s3465_s29 + $0xe0] sm:$0xff]  ;;  %v2877_v38 = vpop.permute.xlu0 %2876 }
 0xac9   : > { %2923 = vst [vmem:[%s5123_s13 + $0x38] sm:$0xff] %v2891_v45 }
 0xaca   : > { %2930 = vst [vmem:[%s5123_s13 + $0x70] sm:$0xff] %v2898_v14 }
 0xacc   : > { %v2726_v54 = vpop.f32.mrf.mxu3  ;;  %v2687_v1 = vpop.f32.mrf.mxu1 }
 0xacd   : > { %v2765_v11 = vadd.f32 %v3380_v4, %v2726_v54  ;;  %v2772_v7 = vadd.f32 %v3381_v55, %v2687_v1  ;;  %v3394_v1 = vld [vmem:[%s3465_s29 + $0xb8] sm:$0xff] }
 0xacf   : > { %v2893_v10 = vadd.f32 %v2827_v40, %v2765_v11  ;;  %v2900_v34 = vadd.f32 %v2847_v50, %v2772_v7  ;;  %v3395_v11 = vld [vmem:[%s3465_s29 + $0xf0] sm:$0xff]  ;;  %v2882_v7 = vpop.permute.xlu2 %2881 }
 0xad1   : > { %2925 = vst [vmem:[%s5123_s13 + $0x48] sm:$0xff] %v2893_v10 }
 0xad2   : > { %2932 = vst [vmem:[%s5123_s13 + $0x80] sm:$0xff] %v2900_v34 }
 0xad4   : > { %v2728_v19 = vpop.f32.mrf.mxu3  ;;  %v2689_v46 = vpop.f32.mrf.mxu1 }
 0xad5   : > { %v2767_v15 = vadd.f32 %v3382_v0, %v2728_v19  ;;  %v2774_v23 = vadd.f32 %v3383_v31, %v2689_v46  ;;  %v3396_v19 = vld [vmem:[%s3465_s29 + $0xc8] sm:$0xff]  ;;  %v3397_v31 = vld [vmem:[%s3465_s29 + $0xd8] sm:$0xff] }
 0xad7   : > { %v2895_v16 = vadd.f32 %v2832_v21, %v2767_v15  ;;  %v2902_v51 = vadd.f32 %v2852_v56, %v2774_v23 }
 0xad9   : > { %2927 = vst [vmem:[%s5123_s13 + $0x58] sm:$0xff] %v2895_v16 }
 0xada   : > { %2934 = vst [vmem:[%s5123_s13 + $0x90] sm:$0xff] %v2902_v51  ;;  %v3398_v51 = vld [vmem:[%s3465_s29 + $0xe8] sm:$0xff] }
 0xadc   : > { %v2731_v25 = vpop.f32.mrf.mxu3  ;;  %v2692_v33 = vpop.f32.mrf.mxu1 }
 0xadd   : > { %v2769_v61 = vadd.f32 %v3384_v32, %v2731_v25  ;;  %v2776_v44 = vadd.f32 %v3385_v49, %v2692_v33 }
 0xadf   : > { %v2897_v22 = vadd.f32 %v2837_v62, %v2769_v61  ;;  %v2904_v8 = vadd.f32 %v2857_v24, %v2776_v44  ;;  %v3399_v61 = vld [vmem:[%s3465_s29 + $0xf8] sm:$0xff] }
 0xae1   : > { %2929 = vst [vmem:[%s5123_s13 + $0x68] sm:$0xff] %v2897_v22 }
 0xae2   : > { %2936 = vst [vmem:[%s5123_s13 + $0xa0] sm:$0xff] %v2904_v8 }
 0xae4   : > { %v2733_v5 = vpop.f32.mrf.mxu3  ;;  %v2694_v30 = vpop.f32.mrf.mxu1 }
 0xae5   : > { %v2771_v63 = vadd.f32 %v3386_v47, %v2733_v5  ;;  %v2778_v43 = vadd.f32 %v3387_v41, %v2694_v30 }
 0xae7   : > { %v2899_v40 = vadd.f32 %v2842_v39, %v2771_v63  ;;  %v2906_v2 = vadd.f32 %v2862_v6, %v2778_v43 }
 0xae9   : > { %2931 = vst [vmem:[%s5123_s13 + $0x78] sm:$0xff] %v2899_v40 }
 0xaea   : > { %2938 = vst [vmem:[%s5123_s13 + $0xb0] sm:$0xff] %v2906_v2 }
 0xaec   : > { %v2736_v57 = vpop.f32.mrf.mxu3  ;;  %v2697_v37 = vpop.f32.mrf.mxu1 }
 0xaed   : > { %v2773_v29 = vadd.f32 %v3388_v3, %v2736_v57  ;;  %v2780_v13 = vadd.f32 %v3389_v58, %v2697_v37 }
 0xaef   : > { %v2901_v21 = vadd.f32 %v2847_v50, %v2773_v29  ;;  %v2908_v48 = vadd.f32 %v2867_v17, %v2780_v13 }
 0xaf1   : > { %2933 = vst [vmem:[%s5123_s13 + $0x88] sm:$0xff] %v2901_v21 }
 0xaf2   : > { %2940 = vst [vmem:[%s5123_s13 + $0xc0] sm:$0xff] %v2908_v48 }
 0xaf4   : > { %v2738_v52 = vpop.f32.mrf.mxu3  ;;  %v2699_v27 = vpop.f32.mrf.mxu1 }
 0xaf5   : > { %v2775_v53 = vadd.f32 %v3390_v36, %v2738_v52  ;;  %v2782_v42 = vadd.f32 %v3391_v20, %v2699_v27 }
 0xaf7   : > { %v2903_v62 = vadd.f32 %v2852_v56, %v2775_v53  ;;  %v2910_v26 = vadd.f32 %v2872_v9, %v2782_v42 }
 0xaf9   : > { %2935 = vst [vmem:[%s5123_s13 + $0x98] sm:$0xff] %v2903_v62 }
 0xafa   : > { %2942 = vst [vmem:[%s5123_s13 + $0xd0] sm:$0xff] %v2910_v26 }
 0xafc   : > { %v2741_v59 = vpop.f32.mrf.mxu3  ;;  %v2702_v35 = vpop.f32.mrf.mxu1 }
 0xafd   : > { %v2777_v18 = vadd.f32 %v3392_v28, %v2741_v59  ;;  %v2784_v60 = vadd.f32 %v3393_v12, %v2702_v35 }
 0xaff   : > { %v2905_v39 = vadd.f32 %v2857_v24, %v2777_v18  ;;  %v2912_v45 = vadd.f32 %v2877_v38, %v2784_v60 }
 0xb01   : > { %2937 = vst [vmem:[%s5123_s13 + $0xa8] sm:$0xff] %v2905_v39 }
 0xb02   : > { %2944 = vst [vmem:[%s5123_s13 + $0xe0] sm:$0xff] %v2912_v45 }
 0xb04   : > { %v2743_v14 = vpop.f32.mrf.mxu3  ;;  %v2704_v54 = vpop.f32.mrf.mxu1 }
 0xb05   : > { %v2779_v4 = vadd.f32 %v3394_v1, %v2743_v14  ;;  %v2786_v55 = vadd.f32 %v3395_v11, %v2704_v54 }
 0xb07   : > { %v2907_v50 = vadd.f32 %v2862_v6, %v2779_v4  ;;  %v2914_v10 = vadd.f32 %v2882_v7, %v2786_v55 }
 0xb09   : > { %2939 = vst [vmem:[%s5123_s13 + $0xb8] sm:$0xff] %v2907_v50 }
 0xb0a   : > { %2946 = vst [vmem:[%s5123_s13 + $0xf0] sm:$0xff] %v2914_v10 }
 0xb0c   : > { %v2746_v34 = vpop.f32.mrf.mxu3 }
 0xb0d   : > { %v2781_v46 = vadd.f32 %v3396_v19, %v2746_v34 }
 0xb0f   : > { %v2909_v0 = vadd.f32 %v2867_v17, %v2781_v46 }
 0xb11   : > { %2941 = vst [vmem:[%s5123_s13 + $0xc8] sm:$0xff] %v2909_v0 }
 0xb14   : > { %v2748_v15 = vpop.f32.mrf.mxu3 }
 0xb15   : > { %v2783_v23 = vadd.f32 %v3397_v31, %v2748_v15 }
 0xb17   : > { %v2911_v56 = vadd.f32 %v2872_v9, %v2783_v23 }
 0xb19   : > { %2943 = vst [vmem:[%s5123_s13 + $0xd8] sm:$0xff] %v2911_v56 }
 0xb1c   : > { %v2751_v16 = vpop.f32.mrf.mxu3 }
 0xb1d   : > { %v2785_v25 = vadd.f32 %v3398_v51, %v2751_v16 }
 0xb1f   : > { %v2913_v33 = vadd.f32 %v2877_v38, %v2785_v25 }
 0xb21   : > { %2945 = vst [vmem:[%s5123_s13 + $0xe8] sm:$0xff] %v2913_v33 }
 0xb24   : > { %v2753_v32 = vpop.f32.mrf.mxu3 }
 0xb25   : > { %v2787_v49 = vadd.f32 %v3399_v61, %v2753_v32 }
 0xb27   : > { %v2915_v44 = vadd.f32 %v2882_v7, %v2787_v49 }
 0xb29   : > { %2947 = vst [vmem:[%s5123_s13 + $0xf8] sm:$0xff] %v2915_v44 }
 0xb2a PF: > { %s17_s24 = sadd.s32 1, %s3406_s24  }
 0xb2b   : > { %p14_p4 = scmp.ge.s32.totalorder %s17_s24, 4  }
 0xb2d   :  { %16 = sbr.rel (!%p14_p4) target bundleno = 1 (0x1), region = 78 }

</bundles_post_ra>
